<compile_context>
chip_gen: v5e
topology: v5e:2x2
jax: 0.10.0
libtpu: 0.0.40
codegen_flags: <defaults>
</compile_context>

<pallas_src>
import jax
import jax.numpy as jnp
from jax.experimental import pallas as pl
from jax.experimental.pallas import tpu as pltpu

EPS = 1e-5  # torch.nn.LayerNorm default eps


def eccm_kernel(emb_ref, pp_ref, wfus_ref, tail_ref, o_ref):
    # emb_ref:  (L, TB)              concat([magnitude, syndrome])^T batch tile
    # pp_ref:   (D, L, 1 + 2*N_dec)  lane-packed params: [src^T, w_0^T, b_0^T, w_1^T, ...]
    # wfus_ref: (n, D*L)             fused output weight: w_dim[d] * w_len[j, l]
    # tail_ref: (n, 3)               [fused bias, norm_output.weight, norm_output.bias]
    # o_ref:    (n, TB)
    emb = emb_ref[...]                                    # (L, TB)
    x = pp_ref[:, :, 0:1] * emb[None, :, :]               # (D, L, TB)

    D, L = pp_ref.shape[0], pp_ref.shape[1]
    n_dec = (pp_ref.shape[2] - 1) // 2
    TB = emb_ref.shape[1]
    inv_dl = 1.0 / float(D * L)

    for i in range(n_dec):                                # static tiny loop (N_dec)
        w = pp_ref[:, :, 1 + 2 * i:2 + 2 * i]             # (D, L, 1)
        b = pp_ref[:, :, 2 + 2 * i:3 + 2 * i]             # (D, L, 1)
        t = jnp.tanh(x)
        # LayerNorm over (L, D) jointly per batch lane; one traversal of t.
        # (One-pass moments E[t^2]-mu^2: benign since tanh is bounded, eps=1e-5.)
        mu = jnp.sum(jnp.sum(t, axis=0), axis=0, keepdims=True) * inv_dl        # (1, TB)
        msq = jnp.sum(jnp.sum(t * t, axis=0), axis=0, keepdims=True) * inv_dl   # (1, TB)
        inv_std = jax.lax.rsqrt(msq - mu * mu + EPS)                            # (1, TB)
        x = (t - mu[None]) * inv_std[None] * w + b

    # Fused output projections: one MXU matmul with K = D*L.
    if L % 8 == 0:
        z = jnp.dot(wfus_ref[...], x.reshape(D * L, TB),
                    preferred_element_type=jnp.float32)                         # (n, TB)
    else:
        # Fallback when L is not a sublane multiple: accumulate per-d slices.
        z = jnp.zeros((wfus_ref.shape[0], TB), jnp.float32)
        for d in range(D):
            z = z + jnp.dot(wfus_ref[:, d * L:(d + 1) * L], x[d],
                            preferred_element_type=jnp.float32)
    z = z + tail_ref[:, 0:1]                              # pre-folded bias

    # Final tanh + LayerNorm over n (sublane axis), batch on lanes.
    t = jnp.tanh(z)
    inv_n = 1.0 / float(z.shape[0])
    mu = jnp.sum(t, axis=0, keepdims=True) * inv_n
    msq = jnp.sum(t * t, axis=0, keepdims=True) * inv_n
    inv_std = jax.lax.rsqrt(msq - mu * mu + EPS)
    o_ref[...] = ((t - mu) * inv_std * tail_ref[:, 1:2]
                  + tail_ref[:, 2:3]).astype(o_ref.dtype)


def eccm_forward(magnitude, syndrome, params, *, tb=512):
    B, n = magnitude.shape
    pc = syndrome.shape[-1]
    L = n + pc
    D = params["src_embed"].shape[-1]
    n_dec = params["ln_w"].shape[0]
    C = 1 + 2 * n_dec

    # --- batch tile: multiple of 128, VMEM-aware, >=2 grid steps when possible ---
    tb = max(128, (int(tb) // 128) * 128)                 # round down to 128 multiple
    Bp128 = pl.cdiv(B, 128) * 128
    TB = min(tb, Bp128)
    # keep a handful of (D, L, TB) f32 temporaries comfortably inside VMEM
    while TB > 128 and 8 * D * L * TB * 4 > (24 << 20):
        TB = max(128, ((TB // 2) // 128) * 128)
    # prefer >=2 batch tiles so the 'parallel' axis can span both v7x TensorCores
    if Bp128 // TB < 2 and Bp128 >= 256:
        TB = max(128, ((Bp128 // 2) // 128) * 128)
    Bp = pl.cdiv(Bp128, TB) * TB
    grid = Bp // TB

    # --- plain-JAX glue: batch-on-lanes layouts, lane-packing, weight/bias folding ---
    emb = jnp.concatenate([magnitude, syndrome], axis=-1).astype(jnp.float32)   # (B, L)
    embT = jnp.pad(emb.T, ((0, 0), (0, Bp - B)))                                # (L, Bp)

    planes = [params["src_embed"].T]                                            # (D, L)
    for i in range(n_dec):
        planes.append(params["ln_w"][i].T)
        planes.append(params["ln_b"][i].T)
    pp = jnp.stack(planes, axis=-1).astype(jnp.float32)                         # (D, L, C)

    w_dim = params["w_dim"].reshape(D)
    wfused = jnp.einsum("d,jl->jdl", w_dim, params["w_len"]).reshape(n, D * L)  # (n, D*L)
    bfused = params["b_len"] * jnp.sum(w_dim) + params["b_dim"]                 # (n,)
    tail = jnp.stack([bfused, params["on_w"], params["on_b"]], axis=-1)         # (n, 3)
    tail = tail.astype(jnp.float32)

    # --- VMEM budget: sized from the working set, floor 32 MiB, cap 64 MiB ---
    est = 4 * (2 * (L + n) * TB + 2 * D * L * max(C, 128)
               + 2 * n * D * L + 10 * D * L * TB)
    vmem_limit = int(min(max(est, 32 << 20), 64 << 20))

    out = pl.pallas_call(
        eccm_kernel,
        out_shape=jax.ShapeDtypeStruct((n, Bp), jnp.float32),
        grid_spec=pltpu.PrefetchScalarGridSpec(
            num_scalar_prefetch=0,
            grid=(grid,),
            in_specs=[
                pl.BlockSpec((L, TB), lambda b: (0, b)),          # emb^T batch tile
                pl.BlockSpec((D, L, C), lambda b: (0, 0, 0)),     # packed src/LN params
                pl.BlockSpec((n, D * L), lambda b: (0, 0)),       # fused output weight
                pl.BlockSpec((n, 3), lambda b: (0, 0)),           # fused bias + out-LN
            ],
            out_specs=pl.BlockSpec((n, TB), lambda b: (0, b)),
        ),
        compiler_params=pltpu.CompilerParams(
            dimension_semantics=("parallel",),
            vmem_limit_bytes=vmem_limit),
    )(embT, pp, wfused, tail)
    return out.T[:B]                                                            # (B, n)


# ----------------------------- reference (pure JAX) -----------------------------
def eccm_reference(magnitude, syndrome, params):
    emb = jnp.concatenate([magnitude, syndrome], axis=-1)[..., None]     # (B, L, 1)
    out = params["src_embed"][None] * emb                                # (B, L, D)
    for l in range(params["ln_w"].shape[0]):
        t = jnp.tanh(out)
        mu = jnp.mean(t, axis=(-2, -1), keepdims=True)
        var = jnp.mean((t - mu) ** 2, axis=(-2, -1), keepdims=True)
        out = (t - mu) / jnp.sqrt(var + EPS) * params["ln_w"][l] + params["ln_b"][l]
    out = jnp.swapaxes(out, -2, -1) @ params["w_len"].T + params["b_len"]  # (B, D, n)
    out = jnp.swapaxes(out, -2, -1) @ params["w_dim"].T + params["b_dim"]  # (B, n, 1)
    out = out[..., 0]
    t = jnp.tanh(out)
    mu = jnp.mean(t, axis=-1, keepdims=True)
    var = jnp.mean((t - mu) ** 2, axis=-1, keepdims=True)
    return (t - mu) / jnp.sqrt(var + EPS) * params["on_w"] + params["on_b"]


# ----------------------------- deterministic init -----------------------------
def init_params(key, n, pc, d_model, n_dec):
    L = n + pc
    ks = jax.random.split(key, 9)

    def xavier(k, shape):
        a = (6.0 / (shape[-1] + shape[-2])) ** 0.5
        return jax.random.uniform(k, shape, jnp.float32, -a, a)

    return dict(
        src_embed=xavier(ks[0], (L, d_model)),                                   # (L, D)
        ln_w=1.0 + 0.1 * jax.random.normal(ks[1], (n_dec, L, d_model), jnp.float32),
        ln_b=0.1 * jax.random.normal(ks[2], (n_dec, L, d_model), jnp.float32),
        w_len=xavier(ks[3], (n, L)),                                             # (n, L)
        b_len=0.1 * jax.random.normal(ks[4], (n,), jnp.float32),
        w_dim=xavier(ks[5], (1, d_model)),                                       # (1, D)
        b_dim=0.1 * jax.random.normal(ks[6], (1,), jnp.float32),
        on_w=1.0 + 0.1 * jax.random.normal(ks[7], (n,), jnp.float32),
        on_b=0.1 * jax.random.normal(ks[8], (n,), jnp.float32),
    )


if __name__ == "__main__":
    n, pc, d_model, n_dec, B = 12, 4, 32, 2, 2          # L = n + pc = 16
    key = jax.random.PRNGKey(0)
    kp, km, ks_ = jax.random.split(key, 3)
    params = init_params(kp, n, pc, d_model, n_dec)

    magnitude = jax.random.normal(km, (B, n), jnp.float32)
    syndrome = jnp.sign(jax.random.normal(ks_, (B, pc), jnp.float32))

    out = eccm_forward(magnitude, syndrome, params)
    out = jax.block_until_ready(out)

    ref = eccm_reference(magnitude, syndrome, params)
    assert out.shape == (B, n), out.shape
    assert jnp.allclose(out, ref, atol=2e-3, rtol=2e-3), (out, ref)
    print("KERNEL_OK")
</pallas_src>

<mosaic_0001>
module attributes {stable_mosaic.version = 11 : i64} {
  func.func @eccm_kernel(%arg0: i32, %arg1: memref<16x128xf32, #tpu.memory_space<vmem>>, %arg2: memref<32x16x5xf32, #tpu.memory_space<vmem>>, %arg3: memref<12x512xf32, #tpu.memory_space<vmem>>, %arg4: memref<12x3xf32, #tpu.memory_space<vmem>>, %arg5: memref<12x128xf32, #tpu.memory_space<vmem>>) attributes {dimension_semantics = [#tpu.dimension_semantics<parallel>], iteration_bounds = array<i64: 1>, scalar_prefetch = 0 : i64, scratch_operands = 0 : i64, tpu.core_type = #tpu.core_type<tc>, window_params = [{transform_indices = @transform_0, window_bounds = array<i64: 16, 128>}, {pipeline_mode = #tpu.pipeline_mode<synchronous>, transform_indices = @transform_1, window_bounds = array<i64: 32, 16, 5>}, {pipeline_mode = #tpu.pipeline_mode<synchronous>, transform_indices = @transform_2, window_bounds = array<i64: 12, 512>}, {pipeline_mode = #tpu.pipeline_mode<synchronous>, transform_indices = @transform_3, window_bounds = array<i64: 12, 3>}, {transform_indices = @transform_4, window_bounds = array<i64: 12, 128>}]} {
    %c0 = arith.constant 0 : index
    %c0_0 = arith.constant 0 : index
    %0 = vector.load %arg1[%c0, %c0_0] : memref<16x128xf32, #tpu.memory_space<vmem>>, vector<16x128xf32>
    %c0_1 = arith.constant 0 : index
    %c0_2 = arith.constant 0 : index
    %c0_3 = arith.constant 0 : index
    %1 = vector.load %arg2[%c0_1, %c0_2, %c0_3] : memref<32x16x5xf32, #tpu.memory_space<vmem>>, vector<32x16x1xf32>
    %2 = vector.shape_cast %0 : vector<16x128xf32> to vector<1x16x128xf32>
    %3 = vector.broadcast %1 : vector<32x16x1xf32> to vector<32x16x128xf32>
    %4 = vector.broadcast %2 : vector<1x16x128xf32> to vector<32x16x128xf32>
    %5 = arith.mulf %3, %4 : vector<32x16x128xf32>
    %c0_4 = arith.constant 0 : index
    %c0_5 = arith.constant 0 : index
    %c1 = arith.constant 1 : index
    %6 = vector.load %arg2[%c0_4, %c0_5, %c1] : memref<32x16x5xf32, #tpu.memory_space<vmem>>, vector<32x16x1xf32>
    %c0_6 = arith.constant 0 : index
    %c0_7 = arith.constant 0 : index
    %c2 = arith.constant 2 : index
    %7 = vector.load %arg2[%c0_6, %c0_7, %c2] : memref<32x16x5xf32, #tpu.memory_space<vmem>>, vector<32x16x1xf32>
    %8 = math.tanh %5 : vector<32x16x128xf32>
    %cst = arith.constant dense<0.000000e+00> : vector<16x128xf32>
    %9 = vector.multi_reduction <add>, %8, %cst [0] : vector<32x16x128xf32> to vector<16x128xf32>
    %cst_8 = arith.constant dense<0.000000e+00> : vector<128xf32>
    %10 = vector.multi_reduction <add>, %9, %cst_8 [0] : vector<16x128xf32> to vector<128xf32>
    %11 = vector.shape_cast %10 : vector<128xf32> to vector<1x128xf32>
    %cst_9 = arith.constant 0.001953125 : f32
    %12 = vector.broadcast %cst_9 : f32 to vector<1x128xf32>
    %13 = arith.mulf %11, %12 : vector<1x128xf32>
    %14 = arith.mulf %8, %8 : vector<32x16x128xf32>
    %cst_10 = arith.constant dense<0.000000e+00> : vector<16x128xf32>
    %15 = vector.multi_reduction <add>, %14, %cst_10 [0] : vector<32x16x128xf32> to vector<16x128xf32>
    %cst_11 = arith.constant dense<0.000000e+00> : vector<128xf32>
    %16 = vector.multi_reduction <add>, %15, %cst_11 [0] : vector<16x128xf32> to vector<128xf32>
    %17 = vector.shape_cast %16 : vector<128xf32> to vector<1x128xf32>
    %cst_12 = arith.constant 0.001953125 : f32
    %18 = vector.broadcast %cst_12 : f32 to vector<1x128xf32>
    %19 = arith.mulf %17, %18 : vector<1x128xf32>
    %20 = arith.mulf %13, %13 : vector<1x128xf32>
    %21 = arith.subf %19, %20 : vector<1x128xf32>
    %cst_13 = arith.constant 9.99999974E-6 : f32
    %22 = vector.broadcast %cst_13 : f32 to vector<1x128xf32>
    %23 = arith.addf %21, %22 : vector<1x128xf32>
    %24 = math.rsqrt %23 : vector<1x128xf32>
    %25 = vector.shape_cast %13 : vector<1x128xf32> to vector<1x1x128xf32>
    %26 = vector.broadcast %25 : vector<1x1x128xf32> to vector<32x16x128xf32>
    %27 = arith.subf %8, %26 : vector<32x16x128xf32>
    %28 = vector.shape_cast %24 : vector<1x128xf32> to vector<1x1x128xf32>
    %29 = vector.broadcast %28 : vector<1x1x128xf32> to vector<32x16x128xf32>
    %30 = arith.mulf %27, %29 : vector<32x16x128xf32>
    %31 = vector.broadcast %6 : vector<32x16x1xf32> to vector<32x16x128xf32>
    %32 = arith.mulf %30, %31 : vector<32x16x128xf32>
    %33 = vector.broadcast %7 : vector<32x16x1xf32> to vector<32x16x128xf32>
    %34 = arith.addf %32, %33 : vector<32x16x128xf32>
    %c0_14 = arith.constant 0 : index
    %c0_15 = arith.constant 0 : index
    %c3 = arith.constant 3 : index
    %35 = vector.load %arg2[%c0_14, %c0_15, %c3] : memref<32x16x5xf32, #tpu.memory_space<vmem>>, vector<32x16x1xf32>
    %c0_16 = arith.constant 0 : index
    %c0_17 = arith.constant 0 : index
    %c4 = arith.constant 4 : index
    %36 = vector.load %arg2[%c0_16, %c0_17, %c4] : memref<32x16x5xf32, #tpu.memory_space<vmem>>, vector<32x16x1xf32>
    %37 = math.tanh %34 : vector<32x16x128xf32>
    %cst_18 = arith.constant dense<0.000000e+00> : vector<16x128xf32>
    %38 = vector.multi_reduction <add>, %37, %cst_18 [0] : vector<32x16x128xf32> to vector<16x128xf32>
    %cst_19 = arith.constant dense<0.000000e+00> : vector<128xf32>
    %39 = vector.multi_reduction <add>, %38, %cst_19 [0] : vector<16x128xf32> to vector<128xf32>
    %40 = vector.shape_cast %39 : vector<128xf32> to vector<1x128xf32>
    %cst_20 = arith.constant 0.001953125 : f32
    %41 = vector.broadcast %cst_20 : f32 to vector<1x128xf32>
    %42 = arith.mulf %40, %41 : vector<1x128xf32>
    %43 = arith.mulf %37, %37 : vector<32x16x128xf32>
    %cst_21 = arith.constant dense<0.000000e+00> : vector<16x128xf32>
    %44 = vector.multi_reduction <add>, %43, %cst_21 [0] : vector<32x16x128xf32> to vector<16x128xf32>
    %cst_22 = arith.constant dense<0.000000e+00> : vector<128xf32>
    %45 = vector.multi_reduction <add>, %44, %cst_22 [0] : vector<16x128xf32> to vector<128xf32>
    %46 = vector.shape_cast %45 : vector<128xf32> to vector<1x128xf32>
    %cst_23 = arith.constant 0.001953125 : f32
    %47 = vector.broadcast %cst_23 : f32 to vector<1x128xf32>
    %48 = arith.mulf %46, %47 : vector<1x128xf32>
    %49 = arith.mulf %42, %42 : vector<1x128xf32>
    %50 = arith.subf %48, %49 : vector<1x128xf32>
    %cst_24 = arith.constant 9.99999974E-6 : f32
    %51 = vector.broadcast %cst_24 : f32 to vector<1x128xf32>
    %52 = arith.addf %50, %51 : vector<1x128xf32>
    %53 = math.rsqrt %52 : vector<1x128xf32>
    %54 = vector.shape_cast %42 : vector<1x128xf32> to vector<1x1x128xf32>
    %55 = vector.broadcast %54 : vector<1x1x128xf32> to vector<32x16x128xf32>
    %56 = arith.subf %37, %55 : vector<32x16x128xf32>
    %57 = vector.shape_cast %53 : vector<1x128xf32> to vector<1x1x128xf32>
    %58 = vector.broadcast %57 : vector<1x1x128xf32> to vector<32x16x128xf32>
    %59 = arith.mulf %56, %58 : vector<32x16x128xf32>
    %60 = vector.broadcast %35 : vector<32x16x1xf32> to vector<32x16x128xf32>
    %61 = arith.mulf %59, %60 : vector<32x16x128xf32>
    %62 = vector.broadcast %36 : vector<32x16x1xf32> to vector<32x16x128xf32>
    %63 = arith.addf %61, %62 : vector<32x16x128xf32>
    %c0_25 = arith.constant 0 : index
    %c0_26 = arith.constant 0 : index
    %64 = vector.load %arg3[%c0_25, %c0_26] : memref<12x512xf32, #tpu.memory_space<vmem>>, vector<12x512xf32>
    %65 = vector.shape_cast %63 : vector<32x16x128xf32> to vector<512x128xf32>
    %cst_27 = arith.constant dense<0.000000e+00> : vector<12x128xf32>
    %66 = tpu.matmul %64, %65, %cst_27 {dimension_numbers = #tpu.dot_dimension_numbers<[1], [0], [0], [1], [0, 0, 1, 1], [], []>} : vector<12x512xf32>, vector<512x128xf32>, vector<12x128xf32> -> vector<12x128xf32>
    %c0_28 = arith.constant 0 : index
    %c0_29 = arith.constant 0 : index
    %67 = vector.load %arg4[%c0_28, %c0_29] : memref<12x3xf32, #tpu.memory_space<vmem>>, vector<12x1xf32>
    %68 = vector.broadcast %67 : vector<12x1xf32> to vector<12x128xf32>
    %69 = arith.addf %66, %68 : vector<12x128xf32>
    %70 = math.tanh %69 : vector<12x128xf32>
    %cst_30 = arith.constant dense<0.000000e+00> : vector<128xf32>
    %71 = vector.multi_reduction <add>, %70, %cst_30 [0] : vector<12x128xf32> to vector<128xf32>
    %72 = vector.shape_cast %71 : vector<128xf32> to vector<1x128xf32>
    %cst_31 = arith.constant 0.0833333358 : f32
    %73 = vector.broadcast %cst_31 : f32 to vector<1x128xf32>
    %74 = arith.mulf %72, %73 : vector<1x128xf32>
    %75 = arith.mulf %70, %70 : vector<12x128xf32>
    %cst_32 = arith.constant dense<0.000000e+00> : vector<128xf32>
    %76 = vector.multi_reduction <add>, %75, %cst_32 [0] : vector<12x128xf32> to vector<128xf32>
    %77 = vector.shape_cast %76 : vector<128xf32> to vector<1x128xf32>
    %cst_33 = arith.constant 0.0833333358 : f32
    %78 = vector.broadcast %cst_33 : f32 to vector<1x128xf32>
    %79 = arith.mulf %77, %78 : vector<1x128xf32>
    %80 = arith.mulf %74, %74 : vector<1x128xf32>
    %81 = arith.subf %79, %80 : vector<1x128xf32>
    %cst_34 = arith.constant 9.99999974E-6 : f32
    %82 = vector.broadcast %cst_34 : f32 to vector<1x128xf32>
    %83 = arith.addf %81, %82 : vector<1x128xf32>
    %84 = math.rsqrt %83 : vector<1x128xf32>
    %85 = vector.broadcast %74 : vector<1x128xf32> to vector<12x128xf32>
    %86 = arith.subf %70, %85 : vector<12x128xf32>
    %87 = vector.broadcast %84 : vector<1x128xf32> to vector<12x128xf32>
    %88 = arith.mulf %86, %87 : vector<12x128xf32>
    %c0_35 = arith.constant 0 : index
    %c1_36 = arith.constant 1 : index
    %89 = vector.load %arg4[%c0_35, %c1_36] : memref<12x3xf32, #tpu.memory_space<vmem>>, vector<12x1xf32>
    %90 = vector.broadcast %89 : vector<12x1xf32> to vector<12x128xf32>
    %91 = arith.mulf %88, %90 : vector<12x128xf32>
    %c0_37 = arith.constant 0 : index
    %c2_38 = arith.constant 2 : index
    %92 = vector.load %arg4[%c0_37, %c2_38] : memref<12x3xf32, #tpu.memory_space<vmem>>, vector<12x1xf32>
    %93 = vector.broadcast %92 : vector<12x1xf32> to vector<12x128xf32>
    %94 = arith.addf %91, %93 : vector<12x128xf32>
    %c0_39 = arith.constant 0 : index
    %c0_40 = arith.constant 0 : index
    %95 = vector.load %arg5[%c0_39, %c0_40] : memref<12x128xf32, #tpu.memory_space<vmem>>, vector<12x128xf32>
    tpu.vector_store %arg5[%c0_39, %c0_40], %94 {strides = array<i32>} : memref<12x128xf32, #tpu.memory_space<vmem>>, vector<12x128xf32>,
    return
  }
  func.func @transform_0(%arg0: i32) -> (i32, i32) {
    %c0_i32 = arith.constant 0 : i32
    %c0_i32_0 = arith.constant 0 : i32
    return %c0_i32, %arg0 : i32, i32
  }
  func.func @transform_1(%arg0: i32) -> (i32, i32, i32) {
    %c0_i32 = arith.constant 0 : i32
    %c0_i32_0 = arith.constant 0 : i32
    %c0_i32_1 = arith.constant 0 : i32
    %c0_i32_2 = arith.constant 0 : i32
    return %c0_i32, %c0_i32_0, %c0_i32_1 : i32, i32, i32
  }
  func.func @transform_2(%arg0: i32) -> (i32, i32) {
    %c0_i32 = arith.constant 0 : i32
    %c0_i32_0 = arith.constant 0 : i32
    %c0_i32_1 = arith.constant 0 : i32
    return %c0_i32, %c0_i32_0 : i32, i32
  }
  func.func @transform_3(%arg0: i32) -> (i32, i32) {
    %c0_i32 = arith.constant 0 : i32
    %c0_i32_0 = arith.constant 0 : i32
    %c0_i32_1 = arith.constant 0 : i32
    return %c0_i32, %c0_i32_0 : i32, i32
  }
  func.func @transform_4(%arg0: i32) -> (i32, i32) {
    %c0_i32 = arith.constant 0 : i32
    %c0_i32_0 = arith.constant 0 : i32
    return %c0_i32, %arg0 : i32, i32
  }
}

</mosaic_0001>

<bundles_post_ra>
// kernel: tpu_custom_call.1
= control target key start
LH: loop header
LB: loop body
LE: loop exit
PB: predicated region body
PF: predicated region fallthrough
CT: control target
= control target key end

     0   :  { %v6899_v3 = vmov 0   ;;  %s6894_s0 = inlined_call_operand.vmem [shape: f32[16,128], index: 0, kind: input, shape index: {}]   ;;  %s6895_s1 = inlined_call_operand.vmem [shape: f32[32,16,5], index: 1, kind: input, shape index: {}]   ;;  %s6896_s2 = inlined_call_operand.vmem [shape: f32[12,512], index: 2, kind: input, shape index: {}]   ;;  %s6897_s3 = inlined_call_operand.vmem [shape: f32[12,3], index: 3, kind: input, shape index: {}]   ;;  %s6898_s4 = inlined_call_operand.hbm [shape: f32[12,128], index: 4, kind: output, shape index: {}]  }
   0x1   :  { %v3253_v0 = vld [vmem:[%s6895_s1 + $0x20] sm:$0xff]  ;;  %v3258_v1 = vld [vmem:[%s6895_s1 + $0x10] sm:$0xff]  ;;  %2768 = vset.pattern.permute.xlu2 %v6899_v3  ;;  %2767 = vset.pattern.permute.xlu1 %v6899_v3 }
   0x2   :  { %v3263_v2 = vld [vmem:[%s6895_s1] sm:$0xff]  ;;  %2766 = vset.pattern.permute.xlu0 %v6899_v3  ;;  %106 = vperm.xlu2 %2768, %v3253_v0  }
   0x3   :  { %96 = vperm.xlu1 %2767, %v3258_v1   ;;  %86 = vperm.xlu0 %2766, %v3263_v2  }
   0x4   :  { %9 = vsyncpa [#allocation3], 0  ;;  %v3274_v4 = vld [vmem:[%s6895_s1 + $0x28] sm:$0xff]  ;;  %v3279_v5 = vld [vmem:[%s6895_s1 + $0x18] sm:$0xff]  ;;  %vm2680_vm6 = vcmask 1043456   ;;  %s3223_s17 = smov 128  }
   0x5   :  { %v3284_v6 = vld [vmem:[%s6895_s1 + $0x8] sm:$0xff]  ;;  %v3292_v7 = vld [vmem:[%s6895_s1 + $0x40] sm:$0xff]  ;;  %v3297_v8 = vld [vmem:[%s6895_s1 + $0x38] sm:$0xff]  ;;  %s3224_s18 = smov 8  }
   0x6   :  { %v3302_v9 = vld [vmem:[%s6895_s1 + $0x30] sm:$0xff]  ;;  %v3310_v10 = vld [vmem:[%s6895_s1 + $0x58] sm:$0xff]  ;;  %v3320_v12 = vld [vmem:[%s6895_s1 + $0x48] sm:$0xff] }
   0x7   :  { %v3315_v11 = vld [vmem:[%s6895_s1 + $0x50] sm:$0xff]  ;;  %v3333_v14 = vld [vmem:[%s6895_s1 + $0x68] sm:$0xff]  ;;  %v3338_v15 = vld [vmem:[%s6895_s1 + $0x60] sm:$0xff] }
   0x8   :  { %v3328_v13 = vld [vmem:[%s6895_s1 + $0x70] sm:$0xff]  ;;  %v3346_v16 = vld [vmem:[%s6895_s1 + $0x88] sm:$0xff]  ;;  %v3351_v17 = vld [vmem:[%s6895_s1 + $0x80] sm:$0xff] }
   0x9   :  { %v3356_v18 = vld [vmem:[%s6895_s1 + $0x78] sm:$0xff]  ;;  %v3364_v19 = vld [vmem:[%s6895_s1 + $0xa0] sm:$0xff]  ;;  %v3374_v21 = vld [vmem:[%s6895_s1 + $0x90] sm:$0xff] }
   0xa   :  { %111 = vperm.xlu2 %2768, %v3274_v4   ;;  %v3369_v20 = vld [vmem:[%s6895_s1 + $0x98] sm:$0xff]  ;;  %v3387_v23 = vld [vmem:[%s6895_s1 + $0xb0] sm:$0xff]  ;;  %v3392_v24 = vld [vmem:[%s6895_s1 + $0xa8] sm:$0xff] }
   0xb   :  { %101 = vperm.xlu1 %2767, %v3279_v5   ;;  %91 = vperm.xlu0 %2766, %v3284_v6   ;;  %v3382_v22 = vld [vmem:[%s6895_s1 + $0xb8] sm:$0xff]  ;;  %v3400_v25 = vld [vmem:[%s6895_s1 + $0xd0] sm:$0xff]  ;;  %v3405_v26 = vld [vmem:[%s6895_s1 + $0xc8] sm:$0xff] }
   0xc   :  { %v3410_v27 = vld [vmem:[%s6895_s1 + $0xc0] sm:$0xff]  ;;  %v3418_v28 = vld [vmem:[%s6895_s1 + $0xe8] sm:$0xff]  ;;  %v3428_v30 = vld [vmem:[%s6895_s1 + $0xd8] sm:$0xff] }
   0xd   :  { %v3423_v29 = vld [vmem:[%s6895_s1 + $0xe0] sm:$0xff]  ;;  %v3441_v32 = vld [vmem:[%s6895_s1 + $0xf8] sm:$0xff]  ;;  %v3446_v33 = vld [vmem:[%s6895_s1 + $0xf0] sm:$0xff] }
   0xe   :  { %v3436_v31 = vld [vmem:[%s6895_s1 + $0x100] sm:$0xff]  ;;  %v3454_v34 = vld [vmem:[%s6895_s1 + $0x118] sm:$0xff]  ;;  %v3459_v35 = vld [vmem:[%s6895_s1 + $0x110] sm:$0xff] }
   0xf   :  { %7112 = vst [vmem:[#allocation5_spill] sm:$0xff] %v3436_v31  ;;  %v3464_v36 = vld [vmem:[%s6895_s1 + $0x108] sm:$0xff]  ;;  %v3474_v38 = vld [vmem:[%s6895_s1 + $0x130] sm:$0xff]  ;;  %v3484_v40 = vld [vmem:[%s6895_s1 + $0x120] sm:$0xff] }
  0x10   :  { %7113 = vst [vmem:[#allocation6_spill] sm:$0xff] %v3454_v34  ;;  %v3479_v39 = vld [vmem:[%s6895_s1 + $0x128] sm:$0xff]  ;;  %v3499_v43 = vld [vmem:[%s6895_s1 + $0x140] sm:$0xff]  ;;  %v3504_v44 = vld [vmem:[%s6895_s1 + $0x138] sm:$0xff] }
  0x11   :  { %7114 = vst [vmem:[#allocation7_spill] sm:$0xff] %v3459_v35  ;;  %v3494_v42 = vld [vmem:[%s6895_s1 + $0x148] sm:$0xff]  ;;  %v3514_v46 = vld [vmem:[%s6895_s1 + $0x160] sm:$0xff]  ;;  %v3519_v47 = vld [vmem:[%s6895_s1 + $0x158] sm:$0xff] }
  0x12   :  { %126 = vperm.xlu2 %2768, %v3292_v7   ;;  %7115 = vst [vmem:[#allocation8_spill] sm:$0xff] %v3464_v36  ;;  %v3524_v48 = vld [vmem:[%s6895_s1 + $0x150] sm:$0xff]  ;;  %v3538_v52 = vld [vmem:[%s6895_s1 + $0x178] sm:$0xff]  ;;  %v3548_v54 = vld [vmem:[%s6895_s1 + $0x168] sm:$0xff] }
  0x13   :  { %121 = vperm.xlu1 %2767, %v3297_v8   ;;  %116 = vperm.xlu0 %2766, %v3302_v9   ;;  %7116 = vst [vmem:[#allocation9_spill] sm:$0xff] %v3474_v38  ;;  %v3543_v53 = vld [vmem:[%s6895_s1 + $0x170] sm:$0xff]  ;;  %v3567_v59 = vld [vmem:[%s6895_s1 + $0x188] sm:$0xff]  ;;  %v3572_v60 = vld [vmem:[%s6895_s1 + $0x180] sm:$0xff] }
  0x14   :  { %7117 = vst [vmem:[#allocation10_spill] sm:$0xff] %v3479_v39  ;;  %v3562_v58 = vld [vmem:[%s6895_s1 + $0x190] sm:$0xff]  ;;  %v3586_v3 = vld [vmem:[%s6895_s1 + $0x1a8] sm:$0xff] }
  0x15   :  { %7118 = vst [vmem:[#allocation11_spill] sm:$0xff] %v3484_v40 }
  0x16   :  { %7119 = vst [vmem:[#allocation12_spill] sm:$0xff] %v3494_v42 }
  0x17   :  { %7120 = vst [vmem:[#allocation13_spill] sm:$0xff] %v3499_v43 }
  0x18   :  { %7121 = vst [vmem:[#allocation14_spill] sm:$0xff] %v3504_v44 }
  0x19   :  { %7122 = vst [vmem:[#allocation15_spill] sm:$0xff] %v3514_v46 }
  0x1a   :  { %141 = vperm.xlu2 %2768, %v3310_v10   ;;  %7123 = vst [vmem:[#allocation16_spill] sm:$0xff] %v3519_v47 }
  0x1b   :  { %136 = vperm.xlu1 %2767, %v3315_v11   ;;  %131 = vperm.xlu0 %2766, %v3320_v12   ;;  %7124 = vst [vmem:[#allocation17_spill] sm:$0xff] %v3524_v48 }
  0x1c   :  { %7125 = vst [vmem:[#allocation18_spill] sm:$0xff] %v3538_v52 }
  0x1d   :  { %7126 = vst [vmem:[#allocation19_spill] sm:$0xff] %v3543_v53 }
  0x1e   :  { %7127 = vst [vmem:[#allocation20_spill] sm:$0xff] %v3548_v54 }
  0x1f   :  { %7128 = vst [vmem:[#allocation21_spill] sm:$0xff] %v3562_v58 }
  0x20   :  { %7129 = vst [vmem:[#allocation22_spill] sm:$0xff] %v3567_v59 }
  0x21   :  { %7130 = vst [vmem:[#allocation23_spill] sm:$0xff] %v3572_v60 }
  0x22   :  { %156 = vperm.xlu2 %2768, %v3328_v13   ;;  %7131 = vst [vmem:[#allocation24_spill] sm:$0xff] %v3586_v3 }
  0x23   :  { %151 = vperm.xlu1 %2767, %v3333_v14   ;;  %146 = vperm.xlu0 %2766, %v3338_v15  }
  0x2a   :  { %171 = vperm.xlu2 %2768, %v3346_v16  }
  0x2b   :  { %166 = vperm.xlu1 %2767, %v3351_v17   ;;  %161 = vperm.xlu0 %2766, %v3356_v18  }
  0x32   :  { %186 = vperm.xlu2 %2768, %v3364_v19  }
  0x33   :  { %181 = vperm.xlu1 %2767, %v3369_v20   ;;  %176 = vperm.xlu0 %2766, %v3374_v21  }
  0x3a   :  { %201 = vperm.xlu2 %2768, %v3382_v22  }
  0x3b   :  { %196 = vperm.xlu1 %2767, %v3387_v23   ;;  %191 = vperm.xlu0 %2766, %v3392_v24  }
  0x42   :  { %216 = vperm.xlu2 %2768, %v3400_v25  }
  0x43   :  { %211 = vperm.xlu1 %2767, %v3405_v26   ;;  %206 = vperm.xlu0 %2766, %v3410_v27  }
  0x4a   :  { %231 = vperm.xlu2 %2768, %v3418_v28  }
  0x4b   :  { %226 = vperm.xlu1 %2767, %v3423_v29   ;;  %221 = vperm.xlu0 %2766, %v3428_v30  }
  0x52   :  { %246 = vperm.xlu2 %2768, %v3436_v31   ;;  %v3733_v31 = vld [vmem:[%s6894_s0 + $0x8] sm:$0xff] }
  0x53   :  { %241 = vperm.xlu1 %2767, %v3441_v32   ;;  %236 = vperm.xlu0 %2766, %v3446_v33  }
  0x5a   :  { %261 = vperm.xlu2 %2768, %v3454_v34   ;;  %v3682_v34 = vld [vmem:[%s6895_s1 + $0x1f8] sm:$0xff] }
  0x5b   :  { %256 = vperm.xlu1 %2767, %v3459_v35   ;;  %251 = vperm.xlu0 %2766, %v3464_v36   ;;  %7143 = vst [vmem:[#allocation36_spill] sm:$0xff] %v3682_v34 }
  0x5c   :  { %v3469_v37 = vpop.permute.xlu2 %106 }
  0x62   :  { %276 = vperm.xlu2 %2768, %v3474_v38   ;;  %v3658_v38 = vld [vmem:[%s6895_s1 + $0x1f0] sm:$0xff] }
  0x63   :  { %271 = vperm.xlu1 %2767, %v3479_v39   ;;  %266 = vperm.xlu0 %2766, %v3484_v40   ;;  %7140 = vst [vmem:[#allocation33_spill] sm:$0xff] %v3658_v38  ;;  %v6931_v40 = vmov 1  }
  0x64   :  { %v3489_v41 = vpop.permute.xlu2 %111 }
  0x6a   :  { %291 = vperm.xlu2 %2768, %v3494_v42   ;;  %v3634_v42 = vld [vmem:[%s6895_s1 + $0x1d8] sm:$0xff] }
  0x6b   :  { %286 = vperm.xlu1 %2767, %v3499_v43   ;;  %281 = vperm.xlu0 %2766, %v3504_v44   ;;  %7137 = vst [vmem:[#allocation30_spill] sm:$0xff] %v3634_v42  ;;  %v3663_v44 = vld [vmem:[%s6895_s1 + $0x1e8] sm:$0xff] }
  0x6c   :  { %v3509_v45 = vpop.permute.xlu2 %126  ;;  %7141 = vst [vmem:[#allocation34_spill] sm:$0xff] %v3663_v44 }
  0x72   :  { %306 = vperm.xlu2 %2768, %v3514_v46   ;;  %v3610_v46 = vld [vmem:[%s6895_s1 + $0x1c0] sm:$0xff] }
  0x73   :  { %301 = vperm.xlu1 %2767, %v3519_v47   ;;  %296 = vperm.xlu0 %2766, %v3524_v48   ;;  %7134 = vst [vmem:[#allocation27_spill] sm:$0xff] %v3610_v46  ;;  %v3639_v48 = vld [vmem:[%s6895_s1 + $0x1d0] sm:$0xff] }
  0x74   :  { %v3529_v49 = vpop.permute.xlu2 %141  ;;  %7138 = vst [vmem:[#allocation31_spill] sm:$0xff] %v3639_v48 }
  0x75   :  { %v3531_v50 = vpop.permute.xlu1 %96  ;;  %v3533_v51 = vpop.permute.xlu0 %86 }
  0x7a   :  { %321 = vperm.xlu2 %2768, %v3538_v52   ;;  %v3591_v52 = vld [vmem:[%s6895_s1 + $0x1a0] sm:$0xff] }
  0x7b   :  { %316 = vperm.xlu1 %2767, %v3543_v53   ;;  %311 = vperm.xlu0 %2766, %v3548_v54   ;;  %7132 = vst [vmem:[#allocation25_spill] sm:$0xff] %v3591_v52  ;;  %v3615_v54 = vld [vmem:[%s6895_s1 + $0x1b8] sm:$0xff] }
  0x7c   :  { %v3553_v55 = vpop.permute.xlu2 %156  ;;  %7135 = vst [vmem:[#allocation28_spill] sm:$0xff] %v3615_v54 }
  0x7d   :  { %v3555_v56 = vpop.permute.xlu1 %101  ;;  %v3557_v57 = vpop.permute.xlu0 %91 }
  0x82   :  { %336 = vperm.xlu2 %2768, %v3562_v58   ;;  %v3596_v58 = vld [vmem:[%s6895_s1 + $0x198] sm:$0xff] }
  0x83   :  { %331 = vperm.xlu1 %2767, %v3567_v59   ;;  %326 = vperm.xlu0 %2766, %v3572_v60   ;;  %7133 = vst [vmem:[#allocation26_spill] sm:$0xff] %v3596_v58 }
  0x84   :  { %v3577_v61 = vpop.permute.xlu2 %171 }
  0x85   :  { %v3579_v62 = vpop.permute.xlu1 %121  ;;  %v3581_v63 = vpop.permute.xlu0 %116 }
  0x8a   :  { %351 = vperm.xlu2 %2768, %v3586_v3   ;;  %v3620_v3 = vld [vmem:[%s6895_s1 + $0x1b0] sm:$0xff] }
  0x8b   :  { %346 = vperm.xlu1 %2767, %v3591_v52   ;;  %341 = vperm.xlu0 %2766, %v3596_v58   ;;  %7136 = vst [vmem:[#allocation29_spill] sm:$0xff] %v3620_v3 }
  0x8c   :  { %v3601_v59 = vpop.permute.xlu2 %186 }
  0x8d   :  { %v3603_v60 = vpop.permute.xlu1 %136  ;;  %v3605_v53 = vpop.permute.xlu0 %131 }
  0x92   :  { %366 = vperm.xlu2 %2768, %v3610_v46   ;;  %v3644_v46 = vld [vmem:[%s6895_s1 + $0x1c8] sm:$0xff] }
  0x93   :  { %361 = vperm.xlu1 %2767, %v3615_v54   ;;  %356 = vperm.xlu0 %2766, %v3620_v3   ;;  %7139 = vst [vmem:[#allocation32_spill] sm:$0xff] %v3644_v46 }
  0x94   :  { %v3625_v52 = vpop.permute.xlu2 %201 }
  0x95   :  { %v3627_v58 = vpop.permute.xlu1 %151  ;;  %v3629_v47 = vpop.permute.xlu0 %146 }
  0x9a   :  { %381 = vperm.xlu2 %2768, %v3634_v42   ;;  %v3668_v42 = vld [vmem:[%s6895_s1 + $0x1e0] sm:$0xff] }
  0x9b   :  { %376 = vperm.xlu1 %2767, %v3639_v48   ;;  %371 = vperm.xlu0 %2766, %v3644_v46   ;;  %7142 = vst [vmem:[#allocation35_spill] sm:$0xff] %v3668_v42 }
  0x9c   :  { %v3649_v54 = vpop.permute.xlu2 %216 }
  0x9d   :  { %v3651_v3 = vpop.permute.xlu1 %166  ;;  %v3653_v43 = vpop.permute.xlu0 %161 }
  0xa2   :  { %396 = vperm.xlu2 %2768, %v3658_v38  }
  0xa3   :  { %391 = vperm.xlu1 %2767, %v3663_v44   ;;  %386 = vperm.xlu0 %2766, %v3668_v42  }
  0xa4   :  { %v3673_v48 = vpop.permute.xlu2 %231 }
  0xa5   :  { %v3675_v46 = vpop.permute.xlu1 %181  ;;  %v3677_v39 = vpop.permute.xlu0 %176 }
  0xaa   :  { %2770 = vset.pattern.permute.xlu2 %v6931_v40 }
  0xab   :  { %2769 = vset.pattern.permute.xlu1 %v6931_v40  ;;  %401 = vperm.xlu0 %2766, %v3682_v34  }
  0xac   :  { %882 = vperm.xlu2 %2770, %v3284_v6   ;;  %878 = vperm.xlu1 %2769, %v3263_v2   ;;  %v3689_v38 = vpop.permute.xlu2 %246 }
  0xad   :  { %v3691_v44 = vpop.permute.xlu1 %196  ;;  %v3693_v42 = vpop.permute.xlu0 %191 }
  0xb3   :  { %2771 = vset.pattern.permute.xlu0 %v6931_v40 }
  0xb4   :  { %894 = vperm.xlu2 %2770, %v3253_v0   ;;  %890 = vperm.xlu1 %2769, %v3279_v5   ;;  %v3698_v35 = vpop.permute.xlu2 %261 }
  0xb5   :  { %886 = vperm.xlu0 %2771, %v3258_v1   ;;  %v3701_v34 = vpop.permute.xlu1 %211  ;;  %v3703_v6 = vpop.permute.xlu0 %206  ;;  %v3717_v1 = vld [vmem:[%s6894_s0] sm:$0xff]  ;;  %s2746_s0 = sshll.u32 %s6898_s4, 4  ;;  %s2747_s0 = int_to_ptr.hbm [resolvable:$true] %s2746_s0 }
  0xb6   :  { %v408_v36 = vmul.f32 %v3469_v37, %v3717_v1  ;;  %v409_v37 = vmul.f32 %v3489_v41, %v3733_v31 }
  0xbc   :  { %902 = vperm.xlu2 %2770, %v3302_v9   ;;  %898 = vperm.xlu1 %2769, %v3274_v4   ;;  %v3707_v2 = vpop.permute.xlu2 %276  ;;  %v406_v9 = vmul.f32 %v3531_v50, %v3717_v1 }
  0xbd   :  { %906 = vperm.xlu0 %2771, %v3297_v8   ;;  %v3710_v40 = vpop.permute.xlu1 %226  ;;  %v3712_v0 = vpop.permute.xlu0 %221 }
  0xbe   :  { %2787 = vtanh.f32 %v406_v9 }
  0xc4   :  { %914 = vperm.xlu2 %2770, %v3320_v12   ;;  %910 = vperm.xlu1 %2769, %v3292_v7   ;;  %v3721_v5 = vpop.permute.xlu2 %291  ;;  %v404_v12 = vmul.f32 %v3533_v51, %v3717_v1  ;;  %v407_v7 = vmul.f32 %v3555_v56, %v3733_v31 }
  0xc5   :  { %918 = vperm.xlu0 %2771, %v3315_v11   ;;  %v3724_v4 = vpop.permute.xlu1 %241  ;;  %v3726_v8 = vpop.permute.xlu0 %236  ;;  %v405_v11 = vmul.f32 %v3557_v57, %v3733_v31  ;;  %v410_v57 = vmul.f32 %v3581_v63, %v3717_v1  ;;  %v412_v63 = vmul.f32 %v3509_v45, %v3717_v1 }
  0xc6   :  { %2789 = vtanh.f32 %v404_v12 }
  0xc7   :  { %2791 = vtanh.f32 %v407_v7 }
  0xc8   :  { %2793 = vtanh.f32 %v405_v11 }
  0xc9   :  { %2795 = vtanh.f32 %v408_v36  ;;  %v414_v36 = vmul.f32 %v3603_v60, %v3717_v1  ;;  %v416_v60 = vmul.f32 %v3629_v47, %v3717_v1  ;;  %v419_v47 = vmul.f32 %v3653_v43, %v3733_v31 }
  0xca   :  { %2797 = vtanh.f32 %v410_v57 }
  0xcb   :  { %2799 = vtanh.f32 %v409_v37 }
  0xcc   :  { %926 = vperm.xlu2 %2770, %v3338_v15   ;;  %922 = vperm.xlu1 %2769, %v3310_v10   ;;  %v3745_v50 = vpop.permute.xlu2 %306  ;;  %v411_v10 = vmul.f32 %v3579_v62, %v3733_v31  ;;  %v3758_v15 = vpop.eup %2787 }
  0xcd   :  { %930 = vperm.xlu0 %2771, %v3333_v14   ;;  %v3748_v51 = vpop.permute.xlu1 %256  ;;  %v3750_v56 = vpop.permute.xlu0 %251  ;;  %7144 = vst [vmem:[#allocation37_spill] sm:$0xff] %v3758_v15  ;;  %v413_v14 = vmul.f32 %v3605_v53, %v3733_v31 }
  0xce   :  { %v3760_v9 = vpop.eup %2789  ;;  %2801 = vtanh.f32 %v411_v10 }
  0xcf   :  { %v3764_v12 = vpop.eup %2791  ;;  %v532_v53 = vadd.f32 %v3760_v9, %v3758_v15  ;;  %2803 = vtanh.f32 %v413_v14 }
  0xd0   :  { %v3768_v7 = vpop.eup %2793  ;;  %2805 = vtanh.f32 %v412_v63 }
  0xd1   :  { %7145 = vst [vmem:[#allocation38_spill] sm:$0xff] %v3768_v7  ;;  %v3783_v11 = vpop.eup %2795  ;;  %2807 = vtanh.f32 %v414_v36 }
  0xd2   :  { %v3791_v57 = vpop.eup %2797  ;;  %v533_v10 = vadd.f32 %v3783_v11, %v532_v53  ;;  %2809 = vtanh.f32 %v416_v60 }
  0xd3   :  { %7146 = vst [vmem:[#allocation39_spill] sm:$0xff] %v3791_v57  ;;  %v3795_v37 = vpop.eup %2799 }
  0xd4   :  { %938 = vperm.xlu2 %2770, %v3356_v18   ;;  %934 = vperm.xlu1 %2769, %v3328_v13   ;;  %v3774_v41 = vpop.permute.xlu2 %321  ;;  %v415_v13 = vmul.f32 %v3529_v49, %v3733_v31  ;;  %v563_v18 = vadd.f32 %v3768_v7, %v3764_v12  ;;  %7147 = vst [vmem:[#allocation40_spill] sm:$0xff] %v3795_v37  ;;  %v3798_v14 = vpop.eup %2801 }
  0xd5   :  { %942 = vperm.xlu0 %2771, %v3351_v17   ;;  %v3779_v62 = vpop.permute.xlu1 %271  ;;  %v3781_v45 = vpop.permute.xlu0 %266  ;;  %v417_v17 = vmul.f32 %v3627_v58, %v3733_v31  ;;  %7148 = vst [vmem:[#allocation41_spill] sm:$0xff] %v3798_v14  ;;  %v418_v49 = vmul.f32 %v3553_v55, %v3717_v1  ;;  %v534_v36 = vadd.f32 %v3791_v57, %v533_v10 }
  0xd6   :  { %2811 = vtanh.f32 %v415_v13  ;;  %v564_v63 = vadd.f32 %v3795_v37, %v563_v18  ;;  %v3806_v7 = vpop.eup %2803  ;;  %v420_v58 = vmul.f32 %v3651_v3, %v3717_v1  ;;  %v422_v3 = vmul.f32 %v3677_v39, %v3717_v1 }
  0xd7   :  { %2813 = vtanh.f32 %v417_v17  ;;  %v3814_v43 = vpop.eup %2805  ;;  %v425_v39 = vmul.f32 %v3693_v42, %v3733_v31 }
  0xd8   :  { %v565_v55 = vadd.f32 %v3798_v14, %v564_v63  ;;  %v3822_v18 = vpop.eup %2807  ;;  %2815 = vtanh.f32 %v419_v47 }
  0xd9   :  { %2817 = vtanh.f32 %v418_v49  ;;  %v3830_v10 = vpop.eup %2809 }
  0xda   :  { %v566_v17 = vadd.f32 %v3806_v7, %v565_v55  ;;  %2819 = vtanh.f32 %v420_v58 }
  0xdb   :  { %2821 = vtanh.f32 %v422_v3 }
  0xdc   :  { %950 = vperm.xlu2 %2770, %v3374_v21   ;;  %946 = vperm.xlu1 %2769, %v3346_v16   ;;  %v3812_v53 = vpop.permute.xlu2 %336  ;;  %v421_v16 = vmul.f32 %v3577_v61, %v3733_v31  ;;  %v535_v21 = vadd.f32 %v3814_v43, %v534_v36  ;;  %v3834_v63 = vpop.eup %2811  ;;  %v424_v61 = vmul.f32 %v3601_v59, %v3717_v1 }
  0xdd   :  { %954 = vperm.xlu0 %2771, %v3369_v20   ;;  %v3818_v60 = vpop.permute.xlu1 %286  ;;  %v3820_v13 = vpop.permute.xlu0 %281  ;;  %v423_v20 = vmul.f32 %v3675_v46, %v3733_v31  ;;  %v567_v49 = vadd.f32 %v3834_v63, %v566_v17  ;;  %v426_v46 = vmul.f32 %v3691_v44, %v3717_v1 }
  0xde   :  { %v536_v47 = vadd.f32 %v3822_v18, %v535_v21  ;;  %v3837_v57 = vpop.eup %2813  ;;  %2823 = vtanh.f32 %v421_v16 }
  0xdf   :  { %v3845_v58 = vpop.eup %2815  ;;  %2825 = vtanh.f32 %v423_v20  ;;  %v568_v59 = vadd.f32 %v3837_v57, %v567_v49 }
  0xe0   :  { %v537_v36 = vadd.f32 %v3830_v10, %v536_v47  ;;  %v3853_v42 = vpop.eup %2817  ;;  %2827 = vtanh.f32 %v425_v39 }
  0xe1   :  { %v3861_v21 = vpop.eup %2819  ;;  %2829 = vtanh.f32 %v424_v61  ;;  %v569_v17 = vadd.f32 %v3845_v58, %v568_v59 }
  0xe2   :  { %v538_v44 = vadd.f32 %v3853_v42, %v537_v36  ;;  %v3869_v20 = vpop.eup %2821  ;;  %2831 = vtanh.f32 %v426_v46 }
  0xe4   :  { %962 = vperm.xlu2 %2770, %v3392_v24   ;;  %958 = vperm.xlu1 %2769, %v3364_v19   ;;  %v3851_v55 = vpop.permute.xlu2 %351  ;;  %v428_v24 = vmul.f32 %v3703_v6, %v3717_v1  ;;  %v427_v19 = vmul.f32 %v3625_v52, %v3733_v31  ;;  %v3873_v47 = vpop.eup %2823  ;;  %v539_v39 = vadd.f32 %v3861_v21, %v538_v44 }
  0xe5   :  { %966 = vperm.xlu0 %2771, %v3387_v23   ;;  %v3857_v3 = vpop.permute.xlu1 %301  ;;  %v3859_v16 = vpop.permute.xlu0 %296  ;;  %v429_v23 = vmul.f32 %v3701_v34, %v3733_v31  ;;  %v431_v52 = vmul.f32 %v3712_v0, %v3733_v31  ;;  %v430_v6 = vmul.f32 %v3649_v54, %v3717_v1  ;;  %v570_v61 = vadd.f32 %v3873_v47, %v569_v17 }
  0xe6   :  { %v3876_v49 = vpop.eup %2825  ;;  %2833 = vtanh.f32 %v428_v24  ;;  %v540_v36 = vadd.f32 %v3869_v20, %v539_v39  ;;  %v432_v34 = vmul.f32 %v3710_v40, %v3717_v1 }
  0xe7   :  { %2835 = vtanh.f32 %v427_v19  ;;  %v3884_v46 = vpop.eup %2827  ;;  %v571_v54 = vadd.f32 %v3876_v49, %v570_v61 }
  0xe8   :  { %2837 = vtanh.f32 %v429_v23  ;;  %v3892_v0 = vpop.eup %2829 }
  0xe9   :  { %v3900_v44 = vpop.eup %2831  ;;  %2839 = vtanh.f32 %v431_v52  ;;  %v541_v40 = vadd.f32 %v3892_v0, %v540_v36  ;;  %v572_v17 = vadd.f32 %v3884_v46, %v571_v54 }
  0xea   :  { %2841 = vtanh.f32 %v430_v6 }
  0xeb   :  { %2843 = vtanh.f32 %v432_v34  ;;  %v542_v52 = vadd.f32 %v3900_v44, %v541_v40 }
  0xec   :  { %974 = vperm.xlu2 %2770, %v3410_v27   ;;  %970 = vperm.xlu1 %2769, %v3382_v22   ;;  %v3890_v59 = vpop.permute.xlu2 %366  ;;  %v434_v27 = vmul.f32 %v3726_v8, %v3717_v1  ;;  %v433_v22 = vmul.f32 %v3673_v48, %v3733_v31  ;;  %v3908_v23 = vpop.eup %2833  ;;  %v437_v48 = vmul.f32 %v3750_v56, %v3733_v31 }
  0xed   :  { %978 = vperm.xlu0 %2771, %v3405_v26   ;;  %v3896_v24 = vpop.permute.xlu1 %316  ;;  %v3898_v19 = vpop.permute.xlu0 %311  ;;  %v435_v26 = vmul.f32 %v3724_v4, %v3733_v31  ;;  %v436_v8 = vmul.f32 %v3689_v38, %v3717_v1  ;;  %v543_v36 = vadd.f32 %v3908_v23, %v542_v52  ;;  %v438_v4 = vmul.f32 %v3748_v51, %v3717_v1 }
  0xee   :  { %v3912_v39 = vpop.eup %2835  ;;  %2845 = vtanh.f32 %v434_v27  ;;  %v440_v51 = vmul.f32 %v3781_v45, %v3717_v1  ;;  %v442_v45 = vmul.f32 %v3707_v2, %v3717_v1 }
  0xef   :  { %v3915_v61 = vpop.eup %2837  ;;  %2847 = vtanh.f32 %v433_v22  ;;  %v573_v6 = vadd.f32 %v3912_v39, %v572_v17 }
  0xf0   :  { %v3923_v34 = vpop.eup %2839  ;;  %2849 = vtanh.f32 %v435_v26 }
  0xf1   :  { %v3931_v56 = vpop.eup %2841  ;;  %v574_v38 = vadd.f32 %v3915_v61, %v573_v6  ;;  %2851 = vtanh.f32 %v437_v48 }
  0xf2   :  { %v3937_v40 = vpop.eup %2843  ;;  %2853 = vtanh.f32 %v436_v8 }
  0xf3   :  { %v575_v17 = vadd.f32 %v3923_v34, %v574_v38  ;;  %2855 = vtanh.f32 %v438_v4 }
  0xf4   :  { %986 = vperm.xlu2 %2770, %v3428_v30   ;;  %982 = vperm.xlu1 %2769, %v3400_v25   ;;  %v3929_v54 = vpop.permute.xlu2 %381  ;;  %v439_v25 = vmul.f32 %v3698_v35, %v3733_v31  ;;  %v544_v30 = vadd.f32 %v3931_v56, %v543_v36  ;;  %v3945_v26 = vpop.eup %2845  ;;  %2857 = vtanh.f32 %v440_v51  ;;  %v443_v35 = vmul.f32 %v3820_v13, %v3733_v31 }
  0xf5   :  { %990 = vperm.xlu0 %2771, %v3423_v29   ;;  %v3935_v27 = vpop.permute.xlu1 %331  ;;  %v327_v22 = vpop.permute.xlu0 %326  ;;  %v441_v29 = vmul.f32 %v3779_v62, %v3733_v31  ;;  %v444_v62 = vmul.f32 %v3818_v60, %v3717_v1  ;;  %v446_v60 = vmul.f32 %v3859_v16, %v3717_v1  ;;  %v448_v16 = vmul.f32 %v3745_v50, %v3717_v1 }
  0xf6   :  { %v3949_v52 = vpop.eup %2847  ;;  %v545_v48 = vadd.f32 %v3937_v40, %v544_v30  ;;  %2859 = vtanh.f32 %v439_v25 }
  0xf7   :  { %7149 = vst [vmem:[#allocation42_spill] sm:$0xff] %v3949_v52  ;;  %v3952_v6 = vpop.eup %2849  ;;  %v576_v8 = vadd.f32 %v3949_v52, %v575_v17  ;;  %2861 = vtanh.f32 %v441_v29 }
  0xf8   :  { %7150 = vst [vmem:[#allocation43_spill] sm:$0xff] %v3952_v6  ;;  %v546_v36 = vadd.f32 %v3945_v26, %v545_v48  ;;  %v3960_v4 = vpop.eup %2851  ;;  %2863 = vtanh.f32 %v443_v35 }
  0xf9   :  { %v3968_v13 = vpop.eup %2853  ;;  %v577_v2 = vadd.f32 %v3952_v6, %v576_v8  ;;  %2865 = vtanh.f32 %v442_v45 }
  0xfa   :  { %v3972_v30 = vpop.eup %2855  ;;  %2867 = vtanh.f32 %v444_v62 }
  0xfb   :  { %7151 = vst [vmem:[#allocation44_spill] sm:$0xff] %v3972_v30  ;;  %v578_v17 = vadd.f32 %v3960_v4, %v577_v2  ;;  %v3980_v29 = vpop.eup %2857  ;;  %2869 = vtanh.f32 %v446_v60  ;;  %v7155_v2 = vld [vmem:[#allocation8_spill] sm:$0xff]  ;;  %v7156_v60 = vld [vmem:[#allocation5_spill] sm:$0xff] }
  0xfc   :  { %998 = vperm.xlu2 %2770, %v3446_v33   ;;  %994 = vperm.xlu1 %2769, %v3418_v28   ;;  %v3966_v38 = vpop.permute.xlu2 %396  ;;  %v445_v28 = vmul.f32 %v3721_v5, %v3733_v31  ;;  %v547_v33 = vadd.f32 %v3968_v13, %v546_v36  ;;  %7152 = vst [vmem:[#allocation45_spill] sm:$0xff] %v3980_v29  ;;  %v3984_v48 = vpop.eup %2859 }
  0xfd   :  { %1002 = vperm.xlu0 %2771, %v3441_v32   ;;  %v347_v51 = vpop.permute.xlu1 %346  ;;  %v342_v25 = vpop.permute.xlu0 %341  ;;  %v447_v32 = vmul.f32 %v3857_v3, %v3733_v31  ;;  %7153 = vst [vmem:[#allocation46_spill] sm:$0xff] %v3984_v48  ;;  %v449_v5 = vmul.f32 %v3898_v19, %v3733_v31  ;;  %v579_v45 = vadd.f32 %v3984_v48, %v578_v17 }
  0xfe   :  { %v548_v35 = vadd.f32 %v3972_v30, %v547_v33  ;;  %v3987_v8 = vpop.eup %2861  ;;  %2871 = vtanh.f32 %v445_v28  ;;  %v450_v3 = vmul.f32 %v3896_v24, %v3717_v1  ;;  %v7158_v28 = vld [vmem:[#allocation7_spill] sm:$0xff]  ;;  %v451_v24 = vmul.f32 %v3774_v41, %v3733_v31 }
  0xff   :  { %7154 = vst [vmem:[#allocation47_spill] sm:$0xff] %v3987_v8  ;;  %v3995_v62 = vpop.eup %2863  ;;  %2873 = vtanh.f32 %v447_v32  ;;  %v580_v19 = vadd.f32 %v3987_v8, %v579_v45  ;;  %v452_v32 = vmul.f32 %v327_v22, %v3717_v1  ;;  %v454_v41 = vmul.f32 %v3812_v53, %v3717_v1 }
 0x100   :  { %v549_v36 = vadd.f32 %v3980_v29, %v548_v35  ;;  %v4001_v33 = vpop.eup %2865  ;;  %2875 = vtanh.f32 %v449_v5 }
 0x101   :  { %7157 = vst [vmem:[#allocation8_spill] sm:$0xff] %v4001_v33  ;;  %v4005_v48 = vpop.eup %2867  ;;  %2877 = vtanh.f32 %v448_v16  ;;  %v455_v16 = vmul.f32 %v342_v25, %v3733_v31 }
 0x102   :  { %7159 = vst [vmem:[#allocation5_spill] sm:$0xff] %v4005_v48  ;;  %v4014_v45 = vpop.eup %2869  ;;  %2879 = vtanh.f32 %v450_v3 }
 0x103   :  { %7161 = vst [vmem:[#allocation48_spill] sm:$0xff] %v4014_v45  ;;  %2881 = vtanh.f32 %v452_v32 }
 0x104   :  { %1010 = vperm.xlu2 %2770, %v7155_v2   ;;  %1006 = vperm.xlu1 %2769, %v7156_v60   ;;  %v550_v2 = vadd.f32 %v4001_v33, %v549_v36  ;;  %v581_v60 = vadd.f32 %v3995_v62, %v580_v19  ;;  %v4018_v29 = vpop.eup %2871  ;;  %2883 = vtanh.f32 %v451_v24  ;;  %v7168_v24 = vld [vmem:[#allocation10_spill] sm:$0xff] }
 0x105   :  { %1014 = vperm.xlu0 %2771, %v7158_v28   ;;  %v362_v50 = vpop.permute.xlu1 %361  ;;  %v357_v17 = vpop.permute.xlu0 %356  ;;  %v453_v28 = vmul.f32 %v3935_v27, %v3733_v31  ;;  %7162 = vst [vmem:[#allocation49_spill] sm:$0xff] %v4018_v29  ;;  %v456_v27 = vmul.f32 %v347_v51, %v3717_v1  ;;  %v457_v51 = vmul.f32 %v3851_v55, %v3733_v31 }
 0x106   :  { %v4008_v35 = vpop.permute.xlu2 %882  ;;  %v551_v22 = vadd.f32 %v4005_v48, %v550_v2  ;;  %v4021_v5 = vpop.eup %2873  ;;  %v582_v36 = vadd.f32 %v4018_v29, %v581_v60  ;;  %v7166_v2 = vld [vmem:[#allocation6_spill] sm:$0xff]  ;;  %v460_v55 = vmul.f32 %v3890_v59, %v3717_v1 }
 0x107   :  { %7160 = vst [vmem:[#allocation7_spill] sm:$0xff] %v4008_v35  ;;  %v4028_v19 = vpop.eup %2875  ;;  %2885 = vtanh.f32 %v453_v28  ;;  %v7165_v35 = vld [vmem:[#allocation11_spill] sm:$0xff] }
 0x108   :  { %7163 = vst [vmem:[#allocation50_spill] sm:$0xff] %v4021_v5  ;;  %v552_v3 = vadd.f32 %v4014_v45, %v551_v22  ;;  %v4033_v32 = vpop.eup %2877  ;;  %v583_v25 = vadd.f32 %v4021_v5, %v582_v36  ;;  %2887 = vtanh.f32 %v455_v16  ;;  %v458_v22 = vmul.f32 %v357_v17, %v3717_v1 }
 0x109   :  { %7164 = vst [vmem:[#allocation51_spill] sm:$0xff] %v4028_v19  ;;  %v4037_v60 = vpop.eup %2879  ;;  %2889 = vtanh.f32 %v454_v41 }
 0x10a   :  { %7167 = vst [vmem:[#allocation11_spill] sm:$0xff] %v4033_v32  ;;  %v4046_v36 = vpop.eup %2881  ;;  %2891 = vtanh.f32 %v456_v27 }
 0x10b   :  { %7169 = vst [vmem:[#allocation6_spill] sm:$0xff] %v4037_v60  ;;  %v4049_v45 = vpop.eup %2883  ;;  %2893 = vtanh.f32 %v458_v22 }
 0x10c   :  { %1022 = vperm.xlu2 %2770, %v7165_v35   ;;  %1018 = vperm.xlu1 %2769, %v7166_v2   ;;  %v553_v35 = vadd.f32 %v4033_v32, %v552_v3  ;;  %v584_v2 = vadd.f32 %v4028_v19, %v583_v25  ;;  %7171 = vst [vmem:[#allocation52_spill] sm:$0xff] %v4046_v36  ;;  %2895 = vtanh.f32 %v457_v51  ;;  %v7178_v51 = vld [vmem:[#allocation13_spill] sm:$0xff] }
 0x10d   :  { %1026 = vperm.xlu0 %2771, %v7168_v24   ;;  %v377_v53 = vpop.permute.xlu1 %376  ;;  %v372_v48 = vpop.permute.xlu0 %371  ;;  %v459_v24 = vmul.f32 %v362_v50, %v3733_v31  ;;  %7172 = vst [vmem:[#allocation53_spill] sm:$0xff] %v4049_v45 }
 0x10e   :  { %v4040_v28 = vpop.permute.xlu2 %894  ;;  %v554_v16 = vadd.f32 %v4037_v60, %v553_v35  ;;  %v4052_v17 = vpop.eup %2885  ;;  %v461_v41 = vmul.f32 %v372_v48, %v3733_v31  ;;  %v585_v3 = vadd.f32 %v4049_v45, %v584_v2  ;;  %v462_v50 = vmul.f32 %v377_v53, %v3717_v1  ;;  %v7176_v35 = vld [vmem:[#allocation9_spill] sm:$0xff] }
 0x10f   :  { %7170 = vst [vmem:[#allocation10_spill] sm:$0xff] %v4040_v28  ;;  %v4059_v27 = vpop.eup %2887  ;;  %2897 = vtanh.f32 %v459_v24  ;;  %v7175_v28 = vld [vmem:[#allocation14_spill] sm:$0xff]  ;;  %v463_v53 = vmul.f32 %v3929_v54, %v3733_v31  ;;  %v466_v54 = vmul.f32 %v3966_v38, %v3717_v1 }
 0x110   :  { %7173 = vst [vmem:[#allocation54_spill] sm:$0xff] %v4052_v17  ;;  %v555_v25 = vadd.f32 %v4046_v36, %v554_v16  ;;  %v4064_v22 = vpop.eup %2889  ;;  %v586_v48 = vadd.f32 %v4052_v17, %v585_v3  ;;  %2899 = vtanh.f32 %v461_v41 }
 0x111   :  { %7174 = vst [vmem:[#allocation55_spill] sm:$0xff] %v4059_v27  ;;  %v4068_v2 = vpop.eup %2891  ;;  %2901 = vtanh.f32 %v460_v55 }
 0x112   :  { %7177 = vst [vmem:[#allocation14_spill] sm:$0xff] %v4064_v22  ;;  %v4077_v3 = vpop.eup %2893  ;;  %2903 = vtanh.f32 %v462_v50  ;;  %v7185_v50 = vld [vmem:[#allocation17_spill] sm:$0xff] }
 0x113   :  { %7179 = vst [vmem:[#allocation9_spill] sm:$0xff] %v4068_v2  ;;  %v4080_v36 = vpop.eup %2895 }
 0x114   :  { %1034 = vperm.xlu2 %2770, %v7175_v28   ;;  %1030 = vperm.xlu1 %2769, %v7176_v35   ;;  %v556_v28 = vadd.f32 %v4064_v22, %v555_v25  ;;  %v587_v35 = vadd.f32 %v4059_v27, %v586_v48  ;;  %7181 = vst [vmem:[#allocation56_spill] sm:$0xff] %v4077_v3  ;;  %v7204_v22 = vld [vmem:[#allocation18_spill] sm:$0xff] }
 0x115   :  { %1038 = vperm.xlu0 %2771, %v7178_v51   ;;  %v392_v59 = vpop.permute.xlu1 %391  ;;  %v387_v60 = vpop.permute.xlu0 %386  ;;  %7182 = vst [vmem:[#allocation57_spill] sm:$0xff] %v4080_v36 }
 0x116   :  { %v464_v16 = vmul.f32 %v387_v60, %v3717_v1  ;;  %v4071_v24 = vpop.permute.xlu2 %902  ;;  %v465_v51 = vmul.f32 %v392_v59, %v3733_v31  ;;  %v557_v41 = vadd.f32 %v4068_v2, %v556_v28  ;;  %v4083_v60 = vpop.eup %2897  ;;  %v588_v55 = vadd.f32 %v4080_v36, %v587_v35  ;;  %v7186_v59 = vld [vmem:[#allocation12_spill] sm:$0xff]  ;;  %v7203_v36 = vld [vmem:[#allocation23_spill] sm:$0xff] }
 0x117   :  { %7180 = vst [vmem:[#allocation13_spill] sm:$0xff] %v4071_v24  ;;  %v4089_v48 = vpop.eup %2899 }
 0x118   :  { %7183 = vst [vmem:[#allocation58_spill] sm:$0xff] %v4083_v60  ;;  %2905 = vtanh.f32 %v464_v16  ;;  %v558_v25 = vadd.f32 %v4077_v3, %v557_v41  ;;  %v4093_v24 = vpop.eup %2901  ;;  %v589_v28 = vadd.f32 %v4083_v60, %v588_v55  ;;  %v7188_v16 = vld [vmem:[#allocation16_spill] sm:$0xff] }
 0x119   :  { %2907 = vtanh.f32 %v463_v53  ;;  %7184 = vst [vmem:[#allocation59_spill] sm:$0xff] %v4089_v48  ;;  %v4097_v2 = vpop.eup %2903 }
 0x11a   :  { %2909 = vtanh.f32 %v465_v51  ;;  %7187 = vst [vmem:[#allocation17_spill] sm:$0xff] %v4093_v24  ;;  %v559_v51 = vadd.f32 %v4093_v24, %v558_v25  ;;  %v590_v41 = vadd.f32 %v4089_v48, %v589_v28 }
 0x11b   :  { %7189 = vst [vmem:[#allocation12_spill] sm:$0xff] %v4097_v2  ;;  %2911 = vtanh.f32 %v466_v54  ;;  %v7196_v54 = vld [vmem:[#allocation15_spill] sm:$0xff] }
 0x11c   :  { %1046 = vperm.xlu2 %2770, %v7185_v50   ;;  %1042 = vperm.xlu1 %2769, %v7186_v59   ;;  %v560_v59 = vadd.f32 %v4097_v2, %v559_v51 }
 0x11d   :  { %1050 = vperm.xlu0 %2771, %v7188_v16   ;;  %v402_v53 = vpop.permute.xlu0 %401 }
 0x11e   :  { %v467_v1 = vmul.f32 %v402_v53, %v3733_v31  ;;  %v4100_v38 = vpop.permute.xlu2 %914  ;;  %v4102_v35 = vpop.permute.xlu1 %878 }
 0x11f   :  { %7190 = vst [vmem:[#allocation16_spill] sm:$0xff] %v4100_v38  ;;  %v4106_v50 = vpop.eup %2905  ;;  %v7195_v38 = vld [vmem:[#allocation20_spill] sm:$0xff] }
 0x120   :  { %7191 = vst [vmem:[#allocation60_spill] sm:$0xff] %v4102_v35  ;;  %2913 = vtanh.f32 %v467_v1  ;;  %v4108_v55 = vpop.eup %2907  ;;  %v561_v53 = vadd.f32 %v4106_v50, %v560_v59  ;;  %v7198_v35 = vld [vmem:[#allocation19_spill] sm:$0xff] }
 0x121   :  { %7192 = vst [vmem:[#allocation61_spill] sm:$0xff] %v4106_v50  ;;  %v4111_v16 = vpop.eup %2909  ;;  %v591_v31 = vadd.f32 %v4108_v55, %v590_v41 }
 0x122   :  { %7193 = vst [vmem:[#allocation62_spill] sm:$0xff] %v4108_v55  ;;  %v4117_v25 = vpop.eup %2911 }
 0x123   :  { %7194 = vst [vmem:[#allocation63_spill] sm:$0xff] %v4111_v16  ;;  %v592_v28 = vadd.f32 %v4111_v16, %v591_v31  ;;  %v562_v41 = vadd.f32 %v4117_v25, %v561_v53  ;;  %v7205_v31 = vld [vmem:[#allocation22_spill] sm:$0xff] }
 0x124   :  { %1058 = vperm.xlu2 %2770, %v7195_v38   ;;  %1054 = vperm.xlu1 %2769, %v7196_v54   ;;  %7197 = vst [vmem:[#allocation20_spill] sm:$0xff] %v4117_v25  ;;  %v7209_v25 = vld [vmem:[#allocation26_spill] sm:$0xff] }
 0x125   :  { %1062 = vperm.xlu0 %2771, %v7198_v35  }
 0x126   :  { %v4121_v1 = vpop.eup %2913  ;;  %v4123_v24 = vpop.permute.xlu2 %926 }
 0x127   :  { %7199 = vst [vmem:[#allocation15_spill] sm:$0xff] %v4121_v1  ;;  %v4125_v51 = vpop.permute.xlu1 %890  ;;  %v593_v59 = vadd.f32 %v4121_v1, %v592_v28  ;;  %v4129_v55 = vpop.permute.xlu0 %886  ;;  %v7210_v28 = vld [vmem:[#allocation21_spill] sm:$0xff] }
 0x128   :  { %7200 = vst [vmem:[#allocation19_spill] sm:$0xff] %v4123_v24 }
 0x129   :  { %7201 = vst [vmem:[#allocation64_spill] sm:$0xff] %v4125_v51  ;;  %v594_v38 = vadd.f32 %v593_v59, %v562_v41  ;;  %v7211_v41 = vld [vmem:[#allocation25_spill] sm:$0xff] }
 0x12a   :  { %7202 = vst [vmem:[#allocation65_spill] sm:$0xff] %v4129_v55  ;;  %v607_v55 = vmul.f32 %v3795_v37, %v3795_v37  ;;  %v615_v37 = vmul.f32 %v3837_v57, %v3837_v57 }
 0x12b   :  { %v595_v54 = vrot.slane %v594_v38, 4 }
 0x12c   :  { %1070 = vperm.xlu2 %2770, %v7203_v36   ;;  %1066 = vperm.xlu1 %2769, %v7204_v22  }
 0x12d   :  { %1074 = vperm.xlu0 %2771, %v7205_v31   ;;  %v596_v35 = vadd.f32 %v595_v54, %v594_v38  ;;  %v7215_v54 = vld [vmem:[#allocation29_spill] sm:$0xff] }
 0x12e   :  { %v4134_v17 = vpop.permute.xlu2 %938 }
 0x12f   :  { %7206 = vst [vmem:[#allocation23_spill] sm:$0xff] %v4134_v17  ;;  %v4136_v24 = vpop.permute.xlu1 %898  ;;  %v4138_v51 = vpop.permute.xlu0 %906  ;;  %v597_v53 = vrot.slane %v596_v35, 2 }
 0x130   :  { %7207 = vst [vmem:[#allocation18_spill] sm:$0xff] %v4136_v24  ;;  %v7216_v24 = vld [vmem:[#allocation24_spill] sm:$0xff] }
 0x131   :  { %7208 = vst [vmem:[#allocation22_spill] sm:$0xff] %v4138_v51  ;;  %v598_v59 = vadd.f32 %v597_v53, %v596_v35  ;;  %v7217_v51 = vld [vmem:[#allocation28_spill] sm:$0xff] }
 0x132   :  { %v7221_v53 = vld [vmem:[#allocation32_spill] sm:$0xff] }
 0x133   :  { %v599_v38 = vrot.slane %v598_v59, 1 }
 0x134   :  { %1082 = vperm.xlu2 %2770, %v7209_v25   ;;  %1078 = vperm.xlu1 %2769, %v7210_v28  }
 0x135   :  { %1086 = vperm.xlu0 %2771, %v7211_v41   ;;  %v600_v17 = vadd.f32 %v599_v38, %v598_v59  ;;  %v7228_v38 = vld [vmem:[#allocation30_spill] sm:$0xff] }
 0x136   :  { %v4143_v36 = vpop.permute.xlu2 %950 }
 0x137   :  { %7212 = vst [vmem:[#allocation26_spill] sm:$0xff] %v4143_v36  ;;  %v4145_v22 = vpop.permute.xlu1 %910  ;;  %v4147_v31 = vpop.permute.xlu0 %918  ;;  %v4158_v35 = vmul.f32 0.001953125, %v600_v17  ;;  %v7229_v17 = vld [vmem:[#allocation34_spill] sm:$0xff] }
 0x138   :  { %7213 = vst [vmem:[#allocation21_spill] sm:$0xff] %v4145_v22  ;;  %v7222_v22 = vld [vmem:[#allocation27_spill] sm:$0xff] }
 0x139   :  { %7214 = vst [vmem:[#allocation25_spill] sm:$0xff] %v4147_v31  ;;  %v7223_v31 = vld [vmem:[#allocation31_spill] sm:$0xff] }
 0x13c   :  { %1094 = vperm.xlu2 %2770, %v7215_v54   ;;  %1090 = vperm.xlu1 %2769, %v7216_v24  }
 0x13d   :  { %1098 = vperm.xlu0 %2771, %v7217_v51   ;;  %v6965_v51 = vmov 2  }
 0x13e   :  { %v4152_v25 = vpop.permute.xlu2 %962 }
 0x13f   :  { %7218 = vst [vmem:[#allocation29_spill] sm:$0xff] %v4152_v25  ;;  %v4154_v28 = vpop.permute.xlu1 %922  ;;  %v4156_v41 = vpop.permute.xlu0 %930  ;;  %v606_v25 = vmul.f32 %v3783_v11, %v3783_v11 }
 0x140   :  { %7219 = vst [vmem:[#allocation24_spill] sm:$0xff] %v4154_v28  ;;  %v4238_v28 = vld [vmem:[%s6895_s1 + $0x28] sm:$0xff] }
 0x141   :  { %7220 = vst [vmem:[#allocation28_spill] sm:$0xff] %v4156_v41  ;;  %v7233_v41 = vld [vmem:[#allocation36_spill] sm:$0xff] }
 0x142   :  { %7244 = vst [vmem:[#allocation71_spill] sm:$0xff] %v4238_v28 }
 0x144   :  { %1106 = vperm.xlu2 %2770, %v7221_v53   ;;  %1102 = vperm.xlu1 %2769, %v7222_v22   ;;  %v7234_v53 = vld [vmem:[#allocation33_spill] sm:$0xff] }
 0x145   :  { %1110 = vperm.xlu0 %2771, %v7223_v31  }
 0x146   :  { %v4163_v54 = vpop.permute.xlu2 %974 }
 0x147   :  { %7224 = vst [vmem:[#allocation32_spill] sm:$0xff] %v4163_v54  ;;  %v4165_v24 = vpop.permute.xlu1 %934  ;;  %v4169_v59 = vpop.permute.xlu0 %942 }
 0x148   :  { %7225 = vst [vmem:[#allocation27_spill] sm:$0xff] %v4165_v24  ;;  %v7227_v24 = vld [vmem:[#allocation35_spill] sm:$0xff] }
 0x149   :  { %7226 = vst [vmem:[#allocation31_spill] sm:$0xff] %v4169_v59 }
 0x14c   :  { %1118 = vperm.xlu2 %2770, %v7227_v24   ;;  %1114 = vperm.xlu1 %2769, %v7228_v38   ;;  %v4204_v38 = vld [vmem:[%s6895_s1] sm:$0xff] }
 0x14d   :  { %1122 = vperm.xlu0 %2771, %v7229_v17   ;;  %7237 = vst [vmem:[#allocation66_spill] sm:$0xff] %v4204_v38 }
 0x14e   :  { %v4188_v54 = vpop.permute.xlu2 %986 }
 0x14f   :  { %7230 = vst [vmem:[#allocation35_spill] sm:$0xff] %v4188_v54  ;;  %v4190_v22 = vpop.permute.xlu1 %946  ;;  %v4192_v31 = vpop.permute.xlu0 %954 }
 0x150   :  { %7231 = vst [vmem:[#allocation30_spill] sm:$0xff] %v4190_v22 }
 0x151   :  { %7232 = vst [vmem:[#allocation34_spill] sm:$0xff] %v4192_v31 }
 0x154   :  { %1130 = vperm.xlu2 %2770, %v7233_v41   ;;  %1126 = vperm.xlu1 %2769, %v7234_v53   ;;  %v4214_v41 = vld [vmem:[%s6895_s1 + $0x10] sm:$0xff]  ;;  %v604_v53 = vmul.f32 %v3758_v15, %v3758_v15 }
 0x155   :  { %2772 = vset.pattern.permute.xlu0 %v6965_v51  ;;  %7239 = vst [vmem:[#allocation68_spill] sm:$0xff] %v4214_v41 }
 0x156   :  { %v4197_v59 = vpop.permute.xlu2 %998  ;;  %1198 = vperm.xlu0 %2772, %v4204_v38  }
 0x157   :  { %7235 = vst [vmem:[#allocation36_spill] sm:$0xff] %v4197_v59  ;;  %v4199_v24 = vpop.permute.xlu1 %958  ;;  %v4207_v17 = vpop.permute.xlu0 %966  ;;  %v7240_v59 = vld [vmem:[#allocation38_spill] sm:$0xff] }
 0x158   :  { %7236 = vst [vmem:[#allocation33_spill] sm:$0xff] %v4199_v24  ;;  %v602_v24 = vmul.f32 %v3760_v9, %v3760_v9  ;;  %v603_v31 = vmul.f32 %v7240_v59, %v7240_v59 }
 0x159   :  { %7238 = vst [vmem:[#allocation67_spill] sm:$0xff] %v4207_v17  ;;  %v605_v17 = vmul.f32 %v3764_v12, %v3764_v12 }
 0x15a   :  { %v666_v36 = vadd.f32 %v604_v53, %v602_v24  ;;  %v4262_v24 = vld [vmem:[%s6895_s1 + $0x18] sm:$0xff] }
 0x15b   :  { %v697_v38 = vadd.f32 %v605_v17, %v603_v31  ;;  %v611_v31 = vmul.f32 %v3806_v7, %v3806_v7  ;;  %7248 = vst [vmem:[#allocation73_spill] sm:$0xff] %v4262_v24 }
 0x15c   :  { %2774 = vset.pattern.permute.xlu2 %v6965_v51  ;;  %2773 = vset.pattern.permute.xlu1 %v6965_v51  ;;  %v4228_v51 = vld [vmem:[%s6895_s1 + $0x8] sm:$0xff]  ;;  %v667_v15 = vadd.f32 %v666_v36, %v606_v25 }
 0x15d   :  { %1206 = vperm.xlu2 %2774, %v4214_v41   ;;  %7241 = vst [vmem:[#allocation38_spill] sm:$0xff] %v4228_v51  ;;  %1202 = vperm.xlu1 %2773, %v4228_v51  }
 0x15e   :  { %v4231_v22 = vpop.permute.xlu2 %1010  ;;  %1218 = vperm.xlu0 %2772, %v4238_v28   ;;  %v4254_v28 = vld [vmem:[%s6895_s1 + $0x20] sm:$0xff] }
 0x15f   :  { %7242 = vst [vmem:[#allocation69_spill] sm:$0xff] %v4231_v22  ;;  %v4233_v54 = vpop.permute.xlu1 %970  ;;  %v4241_v41 = vpop.permute.xlu0 %978  ;;  %v7246_v22 = vld [vmem:[#allocation39_spill] sm:$0xff] }
 0x160   :  { %7243 = vst [vmem:[#allocation70_spill] sm:$0xff] %v4233_v54  ;;  %v609_v54 = vmul.f32 %v3798_v14, %v3798_v14  ;;  %v608_v51 = vmul.f32 %v7246_v22, %v7246_v22 }
 0x161   :  { %7245 = vst [vmem:[#allocation72_spill] sm:$0xff] %v4241_v41  ;;  %v698_v41 = vadd.f32 %v697_v38, %v607_v55  ;;  %v610_v38 = vmul.f32 %v3814_v43, %v3814_v43 }
 0x162   :  { %7247 = vst [vmem:[#allocation39_spill] sm:$0xff] %v4254_v28  ;;  %v668_v25 = vadd.f32 %v667_v15, %v608_v51  ;;  %v4290_v15 = vld [vmem:[%s6895_s1 + $0x38] sm:$0xff] }
 0x163   :  { %v699_v36 = vadd.f32 %v698_v41, %v609_v54  ;;  %7253 = vst [vmem:[#allocation78_spill] sm:$0xff] %v4290_v15  ;;  %v617_v41 = vmul.f32 %v3845_v58, %v3845_v58 }
 0x164   :  { %v669_v14 = vadd.f32 %v668_v25, %v610_v38  ;;  %v4308_v38 = vld [vmem:[%s6895_s1 + $0x58] sm:$0xff] }
 0x165   :  { %1214 = vperm.xlu2 %2774, %v4254_v28   ;;  %1210 = vperm.xlu1 %2773, %v4262_v24   ;;  %v4272_v28 = vld [vmem:[%s6895_s1 + $0x40] sm:$0xff]  ;;  %v612_v24 = vmul.f32 %v3822_v18, %v3822_v18  ;;  %7257 = vst [vmem:[#allocation82_spill] sm:$0xff] %v4308_v38 }
 0x166   :  { %v4265_v17 = vpop.permute.xlu2 %1022  ;;  %7251 = vst [vmem:[#allocation76_spill] sm:$0xff] %v4272_v28  ;;  %1230 = vperm.xlu0 %2772, %v4272_v28   ;;  %v614_v28 = vmul.f32 %v3830_v10, %v3830_v10 }
 0x167   :  { %7249 = vst [vmem:[#allocation74_spill] sm:$0xff] %v4265_v17  ;;  %v4267_v53 = vpop.permute.xlu1 %982  ;;  %v4275_v55 = vpop.permute.xlu0 %990  ;;  %v700_v17 = vadd.f32 %v699_v36, %v611_v31  ;;  %v670_v54 = vadd.f32 %v669_v14, %v612_v24  ;;  %v4298_v31 = vld [vmem:[%s6895_s1 + $0x30] sm:$0xff] }
 0x168   :  { %7250 = vst [vmem:[#allocation75_spill] sm:$0xff] %v4267_v53  ;;  %v613_v53 = vmul.f32 %v3834_v63, %v3834_v63 }
 0x169   :  { %7252 = vst [vmem:[#allocation77_spill] sm:$0xff] %v4275_v55  ;;  %v618_v55 = vmul.f32 %v3861_v21, %v3861_v21 }
 0x16a   :  { %v701_v51 = vadd.f32 %v700_v17, %v613_v53  ;;  %7254 = vst [vmem:[#allocation79_spill] sm:$0xff] %v4298_v31  ;;  %v671_v17 = vadd.f32 %v670_v54, %v614_v28  ;;  %v616_v53 = vmul.f32 %v3853_v42, %v3853_v42 }
 0x16c   :  { %v702_v24 = vadd.f32 %v701_v51, %v615_v37  ;;  %v4326_v37 = vld [vmem:[%s6895_s1 + $0x50] sm:$0xff]  ;;  %v623_v51 = vmul.f32 %v3884_v46, %v3884_v46 }
 0x16d   :  { %1226 = vperm.xlu2 %2774, %v4290_v15   ;;  %1222 = vperm.xlu1 %2773, %v4298_v31   ;;  %v672_v15 = vadd.f32 %v671_v17, %v616_v53  ;;  %v621_v31 = vmul.f32 %v3876_v49, %v3876_v49  ;;  %7259 = vst [vmem:[#allocation84_spill] sm:$0xff] %v4326_v37  ;;  %v4344_v53 = vld [vmem:[%s6895_s1 + $0x70] sm:$0xff] }
 0x16e   :  { %v4301_v36 = vpop.permute.xlu2 %1034  ;;  %1242 = vperm.xlu0 %2772, %v4308_v38   ;;  %v620_v38 = vmul.f32 %v3869_v20, %v3869_v20  ;;  %7263 = vst [vmem:[#allocation88_spill] sm:$0xff] %v4344_v53 }
 0x16f   :  { %7255 = vst [vmem:[#allocation80_spill] sm:$0xff] %v4301_v36  ;;  %v4303_v25 = vpop.permute.xlu1 %994  ;;  %v4311_v14 = vpop.permute.xlu0 %1002  ;;  %v703_v36 = vadd.f32 %v702_v24, %v617_v41  ;;  %v673_v28 = vadd.f32 %v672_v15, %v618_v55  ;;  %v4334_v41 = vld [vmem:[%s6895_s1 + $0x48] sm:$0xff] }
 0x170   :  { %7256 = vst [vmem:[#allocation81_spill] sm:$0xff] %v4303_v25  ;;  %v619_v25 = vmul.f32 %v3873_v47, %v3873_v47 }
 0x171   :  { %7258 = vst [vmem:[#allocation83_spill] sm:$0xff] %v4311_v14  ;;  %v624_v14 = vmul.f32 %v3900_v44, %v3900_v44 }
 0x172   :  { %v704_v54 = vadd.f32 %v703_v36, %v619_v25  ;;  %7260 = vst [vmem:[#allocation85_spill] sm:$0xff] %v4334_v41  ;;  %v674_v36 = vadd.f32 %v673_v28, %v620_v38  ;;  %v622_v25 = vmul.f32 %v3892_v0, %v3892_v0 }
 0x174   :  { %v705_v15 = vadd.f32 %v704_v54, %v621_v31  ;;  %v4362_v31 = vld [vmem:[%s6895_s1 + $0x68] sm:$0xff]  ;;  %v629_v54 = vmul.f32 %v3923_v34, %v3923_v34 }
 0x175   :  { %1238 = vperm.xlu2 %2774, %v4326_v37   ;;  %1234 = vperm.xlu1 %2773, %v4334_v41   ;;  %v675_v37 = vadd.f32 %v674_v36, %v622_v25  ;;  %v627_v41 = vmul.f32 %v3915_v61, %v3915_v61  ;;  %7265 = vst [vmem:[#allocation90_spill] sm:$0xff] %v4362_v31  ;;  %v3068_v25 = vld [vmem:[%s6895_s1 + $0x88] sm:$0xff] }
 0x176   :  { %v4337_v24 = vpop.permute.xlu2 %1046  ;;  %1254 = vperm.xlu0 %2772, %v4344_v53   ;;  %v626_v53 = vmul.f32 %v3908_v23, %v3908_v23 }
 0x177   :  { %7261 = vst [vmem:[#allocation86_spill] sm:$0xff] %v4337_v24  ;;  %v4339_v17 = vpop.permute.xlu1 %1006  ;;  %v4347_v55 = vpop.permute.xlu0 %1014  ;;  %v706_v24 = vadd.f32 %v705_v15, %v623_v51  ;;  %v676_v38 = vadd.f32 %v675_v37, %v624_v14  ;;  %v4370_v51 = vld [vmem:[%s6895_s1 + $0x60] sm:$0xff] }
 0x178   :  { %7262 = vst [vmem:[#allocation87_spill] sm:$0xff] %v4339_v17  ;;  %v625_v17 = vmul.f32 %v3912_v39, %v3912_v39 }
 0x179   :  { %7264 = vst [vmem:[#allocation89_spill] sm:$0xff] %v4347_v55  ;;  %v630_v55 = vmul.f32 %v3937_v40, %v3937_v40 }
 0x17a   :  { %v707_v28 = vadd.f32 %v706_v24, %v625_v17  ;;  %7266 = vst [vmem:[#allocation91_spill] sm:$0xff] %v4370_v51  ;;  %v677_v24 = vadd.f32 %v676_v38, %v626_v53  ;;  %v628_v17 = vmul.f32 %v3931_v56, %v3931_v56 }
 0x17c   :  { %v708_v37 = vadd.f32 %v707_v28, %v627_v41  ;;  %v3069_v41 = vld [vmem:[%s6895_s1 + $0x80] sm:$0xff]  ;;  %v635_v28 = vmul.f32 %v3960_v4, %v3960_v4 }
 0x17d   :  { %1250 = vperm.xlu2 %2774, %v4362_v31   ;;  %1246 = vperm.xlu1 %2773, %v4370_v51   ;;  %v633_v51 = vmul.f32 %v3952_v6, %v3952_v6  ;;  %v639_v6 = vmul.f32 %v3987_v8, %v3987_v8  ;;  %v645_v8 = vmul.f32 %v4021_v5, %v4021_v5  ;;  %v7287_v5 = vld [vmem:[#allocation54_spill] sm:$0xff] }
 0x17e   :  { %v4373_v15 = vpop.permute.xlu2 %1058  ;;  %1266 = vperm.xlu0 %2772, %v3068_v25   ;;  %v709_v31 = vadd.f32 %v708_v37, %v629_v54  ;;  %v632_v25 = vmul.f32 %v3945_v26, %v3945_v26  ;;  %v4400_v54 = vld [vmem:[%s6895_s1 + $0x78] sm:$0xff] }
 0x17f   :  { %7267 = vst [vmem:[#allocation92_spill] sm:$0xff] %v4373_v15  ;;  %v4375_v36 = vpop.permute.xlu1 %1018  ;;  %v4380_v14 = vpop.permute.xlu0 %1026  ;;  %v631_v15 = vmul.f32 %v3949_v52, %v3949_v52  ;;  %v7275_v52 = vld [vmem:[#allocation45_spill] sm:$0xff] }
 0x180   :  { %7268 = vst [vmem:[#allocation93_spill] sm:$0xff] %v4375_v36  ;;  %v678_v36 = vadd.f32 %v677_v24, %v628_v17  ;;  %v3071_v17 = vld [vmem:[%s6895_s1 + $0xa0] sm:$0xff] }
 0x181   :  { %7269 = vst [vmem:[#allocation94_spill] sm:$0xff] %v4380_v14  ;;  %v710_v38 = vadd.f32 %v709_v31, %v631_v15 }
 0x182   :  { %v679_v53 = vadd.f32 %v678_v36, %v630_v55  ;;  %7270 = vst [vmem:[#allocation95_spill] sm:$0xff] %v4400_v54  ;;  %v634_v36 = vmul.f32 %v3968_v13, %v3968_v13 }
 0x183   :  { %v711_v31 = vadd.f32 %v710_v38, %v633_v51  ;;  %v3072_v51 = vld [vmem:[%s6895_s1 + $0x98] sm:$0xff]  ;;  %v641_v38 = vmul.f32 %v3995_v62, %v3995_v62 }
 0x184   :  { %v680_v15 = vadd.f32 %v679_v53, %v632_v25 }
 0x185   :  { %1262 = vperm.xlu2 %2774, %v3069_v41   ;;  %1258 = vperm.xlu1 %2773, %v4400_v54   ;;  %v636_v41 = vmul.f32 %v3972_v30, %v3972_v30  ;;  %v712_v14 = vadd.f32 %v711_v31, %v635_v28  ;;  %v7274_v54 = vld [vmem:[#allocation46_spill] sm:$0xff]  ;;  %v4430_v28 = vld [vmem:[%s6895_s1 + $0x90] sm:$0xff] }
 0x186   :  { %v4403_v37 = vpop.permute.xlu2 %1070  ;;  %1278 = vperm.xlu0 %2772, %v3071_v17   ;;  %v638_v17 = vmul.f32 %v7275_v52, %v7275_v52  ;;  %7276 = vst [vmem:[#allocation45_spill] sm:$0xff] %v4430_v28 }
 0x187   :  { %7271 = vst [vmem:[#allocation96_spill] sm:$0xff] %v4403_v37  ;;  %v4405_v24 = vpop.permute.xlu1 %1030  ;;  %v4410_v55 = vpop.permute.xlu0 %1038  ;;  %v637_v37 = vmul.f32 %v7274_v54, %v7274_v54  ;;  %v7281_v54 = vld [vmem:[#allocation48_spill] sm:$0xff] }
 0x188   :  { %7272 = vst [vmem:[#allocation97_spill] sm:$0xff] %v4405_v24  ;;  %v681_v24 = vadd.f32 %v680_v15, %v634_v36  ;;  %v3074_v36 = vld [vmem:[%s6895_s1 + $0xb8] sm:$0xff] }
 0x189   :  { %7273 = vst [vmem:[#allocation98_spill] sm:$0xff] %v4410_v55  ;;  %v713_v53 = vadd.f32 %v712_v14, %v637_v37 }
 0x18a   :  { %v682_v25 = vadd.f32 %v681_v24, %v636_v41  ;;  %v640_v41 = vmul.f32 %v4001_v33, %v4001_v33  ;;  %v7339_v33 = vld [vmem:[#allocation60_spill] sm:$0xff] }
 0x18b   :  { %v714_v37 = vadd.f32 %v713_v53, %v639_v6  ;;  %v3075_v6 = vld [vmem:[%s6895_s1 + $0xb0] sm:$0xff]  ;;  %v647_v53 = vmul.f32 %v4028_v19, %v4028_v19  ;;  %v7333_v19 = vld [vmem:[#allocation38_spill] sm:$0xff] }
 0x18c   :  { %v683_v24 = vadd.f32 %v682_v25, %v638_v17 }
 0x18d   :  { %1274 = vperm.xlu2 %2774, %v3072_v51   ;;  %1270 = vperm.xlu1 %2773, %v4430_v28   ;;  %v7280_v51 = vld [vmem:[#allocation5_spill] sm:$0xff]  ;;  %v715_v28 = vadd.f32 %v714_v37, %v641_v38  ;;  %v4460_v38 = vld [vmem:[%s6895_s1 + $0xa8] sm:$0xff] }
 0x18e   :  { %v4433_v31 = vpop.permute.xlu2 %1082  ;;  %1290 = vperm.xlu0 %2772, %v3074_v36   ;;  %v642_v55 = vmul.f32 %v7280_v51, %v7280_v51  ;;  %v644_v36 = vmul.f32 %v7281_v54, %v7281_v54  ;;  %7282 = vst [vmem:[#allocation102_spill] sm:$0xff] %v4460_v38  ;;  %v7288_v51 = vld [vmem:[#allocation52_spill] sm:$0xff]  ;;  %v7015_v54 = vmov 3  }
 0x18f   :  { %7277 = vst [vmem:[#allocation99_spill] sm:$0xff] %v4433_v31  ;;  %v4435_v15 = vpop.permute.xlu1 %1042  ;;  %v4440_v14 = vpop.permute.xlu0 %1050  ;;  %v643_v31 = vmul.f32 %v4018_v29, %v4018_v29  ;;  %v651_v29 = vmul.f32 %v7287_v5, %v7287_v5  ;;  %v7295_v5 = vld [vmem:[#allocation57_spill] sm:$0xff] }
 0x190   :  { %7278 = vst [vmem:[#allocation100_spill] sm:$0xff] %v4435_v15  ;;  %v684_v15 = vadd.f32 %v683_v24, %v640_v41  ;;  %v3077_v41 = vld [vmem:[%s6895_s1 + $0xd0] sm:$0xff] }
 0x191   :  { %7279 = vst [vmem:[#allocation101_spill] sm:$0xff] %v4440_v14  ;;  %v716_v25 = vadd.f32 %v715_v28, %v643_v31 }
 0x192   :  { %v685_v17 = vadd.f32 %v684_v15, %v642_v55  ;;  %v646_v15 = vmul.f32 %v4033_v32, %v4033_v32  ;;  %v7346_v32 = vld [vmem:[#allocation10_spill] sm:$0xff] }
 0x193   :  { %v717_v28 = vadd.f32 %v716_v25, %v645_v8  ;;  %v3078_v8 = vld [vmem:[%s6895_s1 + $0xc8] sm:$0xff]  ;;  %v653_v25 = vmul.f32 %v4059_v27, %v4059_v27  ;;  %v7294_v27 = vld [vmem:[#allocation9_spill] sm:$0xff] }
 0x194   :  { %v686_v31 = vadd.f32 %v685_v17, %v644_v36 }
 0x195   :  { %1286 = vperm.xlu2 %2774, %v3075_v6   ;;  %1282 = vperm.xlu1 %2773, %v4460_v38   ;;  %v7286_v6 = vld [vmem:[#allocation6_spill] sm:$0xff]  ;;  %v718_v38 = vadd.f32 %v717_v28, %v647_v53  ;;  %v4490_v53 = vld [vmem:[%s6895_s1 + $0xc0] sm:$0xff] }
 0x196   :  { %v4463_v37 = vpop.permute.xlu2 %1094  ;;  %1302 = vperm.xlu0 %2772, %v3077_v41   ;;  %v648_v14 = vmul.f32 %v7286_v6, %v7286_v6  ;;  %v650_v41 = vmul.f32 %v7288_v51, %v7288_v51  ;;  %7289 = vst [vmem:[#allocation6_spill] sm:$0xff] %v4490_v53 }
 0x197   :  { %7283 = vst [vmem:[#allocation103_spill] sm:$0xff] %v4463_v37  ;;  %v4465_v24 = vpop.permute.xlu1 %1054  ;;  %v4470_v55 = vpop.permute.xlu0 %1062  ;;  %v649_v37 = vmul.f32 %v4049_v45, %v4049_v45  ;;  %v657_v45 = vmul.f32 %v4083_v60, %v4083_v60 }
 0x198   :  { %7284 = vst [vmem:[#allocation104_spill] sm:$0xff] %v4465_v24  ;;  %v687_v24 = vadd.f32 %v686_v31, %v646_v15  ;;  %v3080_v15 = vld [vmem:[%s6895_s1 + $0xe8] sm:$0xff] }
 0x199   :  { %7285 = vst [vmem:[#allocation105_spill] sm:$0xff] %v4470_v55  ;;  %v719_v17 = vadd.f32 %v718_v38, %v649_v37  ;;  %v654_v55 = vmul.f32 %v7294_v27, %v7294_v27 }
 0x19a   :  { %v688_v36 = vadd.f32 %v687_v24, %v648_v14  ;;  %v7293_v24 = vld [vmem:[#allocation14_spill] sm:$0xff] }
 0x19b   :  { %v720_v38 = vadd.f32 %v719_v17, %v651_v29  ;;  %v3081_v29 = vld [vmem:[%s6895_s1 + $0xe0] sm:$0xff]  ;;  %v659_v17 = vmul.f32 %v4089_v48, %v4089_v48  ;;  %v660_v48 = vmul.f32 %v4097_v2, %v4097_v2 }
 0x19c   :  { %v689_v37 = vadd.f32 %v688_v36, %v650_v41 }
 0x19d   :  { %1298 = vperm.xlu2 %2774, %v3078_v8   ;;  %1294 = vperm.xlu1 %2773, %v4490_v53   ;;  %v652_v8 = vmul.f32 %v7293_v24, %v7293_v24  ;;  %v721_v53 = vadd.f32 %v720_v38, %v653_v25  ;;  %v4520_v25 = vld [vmem:[%s6895_s1 + $0xd8] sm:$0xff] }
 0x19e   :  { %v4493_v28 = vpop.permute.xlu2 %1106  ;;  %1314 = vperm.xlu0 %2772, %v3080_v15   ;;  %v656_v15 = vmul.f32 %v4077_v3, %v4077_v3  ;;  %7296 = vst [vmem:[#allocation14_spill] sm:$0xff] %v4520_v25 }
 0x19f   :  { %7290 = vst [vmem:[#allocation106_spill] sm:$0xff] %v4493_v28  ;;  %v4495_v31 = vpop.permute.xlu1 %1066  ;;  %v4500_v14 = vpop.permute.xlu0 %1074  ;;  %v655_v28 = vmul.f32 %v7295_v5, %v7295_v5 }
 0x1a0   :  { %7291 = vst [vmem:[#allocation107_spill] sm:$0xff] %v4495_v31  ;;  %v690_v31 = vadd.f32 %v689_v37, %v652_v8  ;;  %v3083_v8 = vld [vmem:[%s6895_s1 + $0x100] sm:$0xff] }
 0x1a1   :  { %7292 = vst [vmem:[#allocation108_spill] sm:$0xff] %v4500_v14  ;;  %v722_v36 = vadd.f32 %v721_v53, %v655_v28  ;;  %v7301_v14 = vld [vmem:[#allocation62_spill] sm:$0xff] }
 0x1a2   :  { %v691_v41 = vadd.f32 %v690_v31, %v654_v55  ;;  %v7300_v31 = vld [vmem:[#allocation17_spill] sm:$0xff] }
 0x1a3   :  { %v723_v53 = vadd.f32 %v722_v36, %v657_v45  ;;  %v3084_v45 = vld [vmem:[%s6895_s1 + $0xf8] sm:$0xff]  ;;  %v665_v36 = vmul.f32 %v4121_v1, %v4121_v1 }
 0x1a4   :  { %v692_v28 = vadd.f32 %v691_v41, %v656_v15 }
 0x1a5   :  { %1310 = vperm.xlu2 %2774, %v3081_v29   ;;  %1306 = vperm.xlu1 %2773, %v4520_v25   ;;  %v658_v29 = vmul.f32 %v7300_v31, %v7300_v31  ;;  %v724_v3 = vadd.f32 %v723_v53, %v659_v17  ;;  %v663_v25 = vmul.f32 %v4111_v16, %v4111_v16  ;;  %v3085_v17 = vld [vmem:[%s6895_s1 + $0xf0] sm:$0xff] }
 0x1a6   :  { %v4523_v38 = vpop.permute.xlu2 %1118  ;;  %1326 = vperm.xlu0 %2772, %v3083_v8   ;;  %v662_v8 = vmul.f32 %v4106_v50, %v4106_v50 }
 0x1a7   :  { %7297 = vst [vmem:[#allocation109_spill] sm:$0xff] %v4523_v38  ;;  %v4525_v37 = vpop.permute.xlu1 %1078  ;;  %v4530_v55 = vpop.permute.xlu0 %1086  ;;  %v661_v38 = vmul.f32 %v7301_v14, %v7301_v14 }
 0x1a8   :  { %7298 = vst [vmem:[#allocation110_spill] sm:$0xff] %v4525_v37  ;;  %v693_v37 = vadd.f32 %v692_v28, %v658_v29  ;;  %v3086_v28 = vld [vmem:[%s6895_s1 + $0x118] sm:$0xff] }
 0x1a9   :  { %7299 = vst [vmem:[#allocation111_spill] sm:$0xff] %v4530_v55  ;;  %v725_v41 = vadd.f32 %v724_v3, %v661_v38  ;;  %v7305_v38 = vld [vmem:[#allocation20_spill] sm:$0xff] }
 0x1aa   :  { %v694_v15 = vadd.f32 %v693_v37, %v660_v48  ;;  %v664_v37 = vmul.f32 %v7305_v38, %v7305_v38 }
 0x1ab   :  { %v726_v3 = vadd.f32 %v725_v41, %v663_v25  ;;  %v3089_v25 = vld [vmem:[%s6895_s1 + $0x130] sm:$0xff] }
 0x1ac   :  { %v695_v48 = vadd.f32 %v694_v15, %v662_v8 }
 0x1ad   :  { %1322 = vperm.xlu2 %2774, %v3084_v45   ;;  %1318 = vperm.xlu1 %2773, %v3085_v17   ;;  %v727_v1 = vadd.f32 %v726_v3, %v665_v36  ;;  %v3087_v17 = vld [vmem:[%s6895_s1 + $0x110] sm:$0xff]  ;;  %v3091_v3 = vld [vmem:[%s6895_s1 + $0x120] sm:$0xff] }
 0x1ae   :  { %v4550_v53 = vpop.permute.xlu2 %1130  ;;  %1338 = vperm.xlu0 %2772, %v3086_v28   ;;  %v696_v50 = vadd.f32 %v695_v48, %v664_v37  ;;  %v3088_v28 = vld [vmem:[%s6895_s1 + $0x108] sm:$0xff] }
 0x1af   :  { %7302 = vst [vmem:[#allocation17_spill] sm:$0xff] %v4550_v53  ;;  %v4555_v29 = vpop.permute.xlu1 %1090  ;;  %v4557_v45 = vpop.permute.xlu0 %1098  ;;  %v3092_v48 = vld [vmem:[%s6895_s1 + $0x148] sm:$0xff] }
 0x1b0   :  { %7303 = vst [vmem:[#allocation112_spill] sm:$0xff] %v4555_v29  ;;  %v728_v53 = vadd.f32 %v727_v1, %v696_v50  ;;  %v3090_v50 = vld [vmem:[%s6895_s1 + $0x128] sm:$0xff] }
 0x1b1   :  { %7304 = vst [vmem:[#allocation113_spill] sm:$0xff] %v4557_v45 }
 0x1b2   :  { %v729_v36 = vrot.slane %v728_v53, 4 }
 0x1b4   :  { %v730_v1 = vadd.f32 %v729_v36, %v728_v53  ;;  %v3093_v53 = vld [vmem:[%s6895_s1 + $0x140] sm:$0xff] }
 0x1b5   :  { %1334 = vperm.xlu2 %2774, %v3087_v17   ;;  %1330 = vperm.xlu1 %2773, %v3088_v28  }
 0x1b6   :  { %1350 = vperm.xlu0 %2772, %v3089_v25   ;;  %v731_v25 = vrot.slane %v730_v1, 2 }
 0x1b7   :  { %v4570_v8 = vpop.permute.xlu1 %1102  ;;  %v4572_v15 = vpop.permute.xlu0 %1110 }
 0x1b8   :  { %7306 = vst [vmem:[#allocation114_spill] sm:$0xff] %v4570_v8  ;;  %v4574_v41 = vpop.permute.xlu2 %1206  ;;  %v732_v36 = vadd.f32 %v731_v25, %v730_v1  ;;  %v3096_v1 = vld [vmem:[%s6895_s1 + $0x158] sm:$0xff] }
 0x1b9   :  { %7307 = vst [vmem:[#allocation115_spill] sm:$0xff] %v4572_v15 }
 0x1ba   :  { %v733_v14 = vrot.slane %v732_v36, 1 }
 0x1bc   :  { %v734_v25 = vadd.f32 %v733_v14, %v732_v36  ;;  %v736_v14 = vmul.f32 %v4158_v35, %v4158_v35  ;;  %v3099_v36 = vld [vmem:[%s6895_s1 + $0x170] sm:$0xff] }
 0x1bd   :  { %1346 = vperm.xlu2 %2774, %v3090_v50   ;;  %1342 = vperm.xlu1 %2773, %v3091_v3   ;;  %v3094_v50 = vld [vmem:[%s6895_s1 + $0x138] sm:$0xff]  ;;  %v3095_v3 = vld [vmem:[%s6895_s1 + $0x160] sm:$0xff] }
 0x1be   :  { %1362 = vperm.xlu0 %2772, %v3092_v48   ;;  %v735_v8 = vmul.f32 0.001953125, %v734_v25 }
 0x1bf   :  { %v4585_v37 = vpop.permute.xlu1 %1114  ;;  %v4587_v17 = vpop.permute.xlu0 %1122 }
 0x1c0   :  { %7308 = vst [vmem:[#allocation116_spill] sm:$0xff] %v4585_v37  ;;  %v4589_v28 = vpop.permute.xlu2 %1214 }
 0x1c1   :  { %7309 = vst [vmem:[#allocation117_spill] sm:$0xff] %v4587_v17 }
 0x1c5   :  { %1358 = vperm.xlu2 %2774, %v3093_v53   ;;  %1354 = vperm.xlu1 %2773, %v3094_v50   ;;  %v3097_v53 = vld [vmem:[%s6895_s1 + $0x150] sm:$0xff]  ;;  %v3098_v50 = vld [vmem:[%s6895_s1 + $0x178] sm:$0xff] }
 0x1c6   :  { %1374 = vperm.xlu0 %2772, %v3095_v3  }
 0x1c7   :  { %v4600_v48 = vpop.permute.xlu1 %1126 }
 0x1c8   :  { %7310 = vst [vmem:[#allocation118_spill] sm:$0xff] %v4600_v48  ;;  %v4602_v38 = vpop.permute.xlu2 %1226  ;;  %v4604_v37 = vpop.permute.xlu0 %1198 }
 0x1c9   :  { %7311 = vst [vmem:[#allocation119_spill] sm:$0xff] %v4602_v38 }
 0x1cd   :  { %1370 = vperm.xlu2 %2774, %v3096_v1   ;;  %1366 = vperm.xlu1 %2773, %v3097_v53   ;;  %v737_v1 = vsub.f32 %v735_v8, %v736_v14  ;;  %v3100_v53 = vld [vmem:[%s6895_s1 + $0x168] sm:$0xff]  ;;  %v3103_v14 = vld [vmem:[%s6895_s1 + $0x180] sm:$0xff] }
 0x1ce   :  { %1386 = vperm.xlu0 %2772, %v3098_v50   ;;  %v3101_v50 = vld [vmem:[%s6895_s1 + $0x190] sm:$0xff]  ;;  %v3102_v8 = vld [vmem:[%s6895_s1 + $0x188] sm:$0xff] }
 0x1cf   :  { %v4617_v48 = vpop.permute.xlu1 %1202  ;;  %v4638_v15 = vadd.f32 1e-05, %v737_v1 }
 0x1d0   :  { %v4615_v3 = vpop.permute.xlu2 %1238  ;;  %v4619_v17 = vpop.permute.xlu0 %1218 }
 0x1d1   :  { %7312 = vst [vmem:[#allocation120_spill] sm:$0xff] %v4615_v3  ;;  %2915 = vrsqrt.f32 %v4638_v15  ;;  %vm745_vm1 = vweird.f32 %v4638_v15 }
 0x1d5   :  { %1382 = vperm.xlu2 %2774, %v3099_v36   ;;  %1378 = vperm.xlu1 %2773, %v3100_v53   ;;  %v3104_v36 = vld [vmem:[%s6895_s1 + $0x1a8] sm:$0xff] }
 0x1d6   :  { %1398 = vperm.xlu0 %2772, %v3101_v50  }
 0x1d7   :  { %v4634_v55 = vpop.permute.xlu1 %1210  ;;  %v2916_v29 = vpop.eup %2915 }
 0x1d8   :  { %v4632_v25 = vpop.permute.xlu2 %1250  ;;  %v4636_v16 = vpop.permute.xlu0 %1230  ;;  %v740_v2 = vmul.f32 %v2916_v29, %v4638_v15  ;;  %vm746_vm0 = vweird.f32 %v2916_v29 }
 0x1d9   :  { %7313 = vst [vmem:[#allocation121_spill] sm:$0xff] %v4632_v25  ;;  %vm747_vm2 = vmor %vm745_vm1, %vm746_vm0 }
 0x1da   :  { %7314 = vst [vmem:[#allocation122_spill] sm:$0xff] %v4636_v16  ;;  %v741_v25 = vmul.f32 %v2916_v29, %v740_v2 }
 0x1dd   :  { %1394 = vperm.xlu2 %2774, %v3102_v8   ;;  %1390 = vperm.xlu1 %2773, %v3103_v14   ;;  %v3105_v8 = vld [vmem:[%s6895_s1 + $0x1a0] sm:$0xff]  ;;  %v3106_v14 = vld [vmem:[%s6895_s1 + $0x198] sm:$0xff] }
 0x1de   :  { %1410 = vperm.xlu0 %2772, %v3104_v36   ;;  %v3107_v36 = vld [vmem:[%s6895_s1 + $0x1c0] sm:$0xff] }
 0x1df   :  { %v4652_v1 = vpop.permute.xlu1 %1222 }
 0x1e0   :  { %v4650_v53 = vpop.permute.xlu2 %1262  ;;  %v4654_v50 = vpop.permute.xlu0 %1242 }
 0x1e1   :  { %7315 = vst [vmem:[#allocation123_spill] sm:$0xff] %v4650_v53 }
 0x1e2   :  { %7316 = vst [vmem:[#allocation124_spill] sm:$0xff] %v4654_v50  ;;  %v742_v50 = vmul.f32 0.5, %v741_v25 }
 0x1e4   :  { %v743_v3 = vsub.f32 1.5, %v742_v50  ;;  %v3112_v50 = vld [vmem:[%s6895_s1 + $0x1c8] sm:$0xff] }
 0x1e5   :  { %1406 = vperm.xlu2 %2774, %v3105_v8   ;;  %1402 = vperm.xlu1 %2773, %v3106_v14   ;;  %v3108_v8 = vld [vmem:[%s6895_s1 + $0x1b8] sm:$0xff]  ;;  %v3109_v14 = vld [vmem:[%s6895_s1 + $0x1b0] sm:$0xff] }
 0x1e6   :  { %1422 = vperm.xlu0 %2772, %v3107_v36   ;;  %v3110_v36 = vld [vmem:[%s6895_s1 + $0x1d8] sm:$0xff]  ;;  %v744_v38 = vmul.f32 %v2916_v29, %v743_v3  ;;  %v3114_v3 = vld [vmem:[%s6895_s1 + $0x1e8] sm:$0xff] }
 0x1e7   :  { %v4668_v60 = vpop.permute.xlu1 %1234 }
 0x1e8   :  { %v4666_v45 = vpop.permute.xlu2 %1274  ;;  %7318 = vst [vmem:[#allocation126_spill] sm:$0xff] %v4668_v60  ;;  %v4670_v53 = vpop.permute.xlu0 %1254  ;;  %v7323_v60 = vld [vmem:[#allocation37_spill] sm:$0xff] }
 0x1e9   :  { %7317 = vst [vmem:[#allocation125_spill] sm:$0xff] %v4666_v45  ;;  %v751_v25 = vsub.f32 %v7323_v60, %v4158_v35 }
 0x1ea   :  { %7319 = vst [vmem:[#allocation127_spill] sm:$0xff] %v4670_v53 }
 0x1ed   :  { %1418 = vperm.xlu2 %2774, %v3108_v8   ;;  %1414 = vperm.xlu1 %2773, %v3109_v14   ;;  %v3111_v8 = vld [vmem:[%s6895_s1 + $0x1d0] sm:$0xff]  ;;  %v3115_v14 = vld [vmem:[%s6895_s1 + $0x1e0] sm:$0xff] }
 0x1ee   :  { %1434 = vperm.xlu0 %2772, %v3110_v36   ;;  %v749_v36 = vsub.f32 %v3760_v9, %v4158_v35  ;;  %v3113_v9 = vld [vmem:[%s6895_s1 + $0x1f0] sm:$0xff] }
 0x1ef   :  { %v4683_v53 = vpop.permute.xlu1 %1246 }
 0x1f0   :  { %v4681_v45 = vpop.permute.xlu2 %1286  ;;  %7321 = vst [vmem:[#allocation129_spill] sm:$0xff] %v4683_v53  ;;  %v4685_v2 = vpop.permute.xlu0 %1266  ;;  %v7325_v53 = vld [vmem:[#allocation41_spill] sm:$0xff] }
 0x1f1   :  { %7320 = vst [vmem:[#allocation128_spill] sm:$0xff] %v4681_v45  ;;  %v4752_v45 = vsel %vm747_vm2, %v2916_v29, %v744_v38  ;;  %v7335_v29 = vsub.f32 %v3783_v11, %v4158_v35  ;;  %v7340_v11 = vsub.f32 %v3764_v12, %v4158_v35 }
 0x1f2   :  { %7322 = vst [vmem:[#allocation130_spill] sm:$0xff] %v4685_v2  ;;  %v7324_v2 = vld [vmem:[#allocation40_spill] sm:$0xff]  ;;  %v813_v15 = vmul.f32 %v749_v36, %v4752_v45  ;;  %v815_v38 = vmul.f32 %v751_v25, %v4752_v45  ;;  %v7341_v36 = vsub.f32 %v7246_v22, %v4158_v35 }
 0x1f3   :  { %v817_v25 = vmul.f32 %v7335_v29, %v4752_v45  ;;  %v816_v29 = vmul.f32 %v7340_v11, %v4752_v45  ;;  %v7348_v11 = vmov 3  }
 0x1f5   :  { %1430 = vperm.xlu2 %2774, %v3111_v8   ;;  %1426 = vperm.xlu1 %2773, %v3112_v50   ;;  %v7328_v50 = vld [vmem:[#allocation42_spill] sm:$0xff] }
 0x1f6   :  { %1446 = vperm.xlu0 %2772, %v3113_v9   ;;  %v1133_v9 = vmul.f32 %v7339_v33, %v813_v15  ;;  %v7344_v15 = vld [vmem:[#allocation65_spill] sm:$0xff]  ;;  %v7347_v33 = vsub.f32 %v3830_v10, %v4158_v35 }
 0x1f7   :  { %v4732_v60 = vpop.permute.xlu1 %1258  ;;  %v1135_v12 = vmul.f32 %v7344_v15, %v815_v38  ;;  %v7352_v10 = vld [vmem:[#allocation13_spill] sm:$0xff] }
 0x1f8   :  { %v4730_v8 = vpop.permute.xlu2 %1298  ;;  %v4741_v16 = vpop.permute.xlu0 %1278  ;;  %v1453_v22 = vadd.f32 %v4604_v37, %v1133_v9  ;;  %v825_v38 = vmul.f32 %v7347_v33, %v4752_v45  ;;  %v7350_v37 = vld [vmem:[#allocation64_spill] sm:$0xff]  ;;  %v7353_v33 = vsub.f32 %v3845_v58, %v4158_v35 }
 0x1f9   :  { %7326 = vst [vmem:[#allocation37_spill] sm:$0xff] %v4730_v8  ;;  %v7349_v8 = vld [vmem:[#allocation7_spill] sm:$0xff]  ;;  %v1136_v9 = vmul.f32 %v7350_v37, %v816_v29  ;;  %v1455_v5 = vadd.f32 %v4574_v41, %v1135_v12  ;;  %v7355_v29 = vsub.f32 %v7325_v53, %v4158_v35  ;;  %v7360_v53 = vsub.f32 %v3814_v43, %v4158_v35 }
 0x1fa   :  { %7327 = vst [vmem:[#allocation40_spill] sm:$0xff] %v4741_v16  ;;  %2917 = vtanh.f32 %v1453_v22 }
 0x1fb   :  { %v820_v12 = vmul.f32 %v7355_v29, %v4752_v45  ;;  %v1456_v58 = vadd.f32 %v4634_v55, %v1136_v9  ;;  %v7361_v55 = vsub.f32 %v3822_v18, %v4158_v35  ;;  %2919 = vtanh.f32 %v1455_v5  ;;  %v7366_v18 = vld [vmem:[#allocation22_spill] sm:$0xff] }
 0x1fd   :  { %1442 = vperm.xlu2 %2774, %v3114_v3   ;;  %1438 = vperm.xlu1 %2773, %v3115_v14   ;;  %v819_v14 = vmul.f32 %v7341_v36, %v4752_v45  ;;  %v7345_v36 = vsub.f32 %v3806_v7, %v4158_v35  ;;  %v3116_v7 = vld [vmem:[%s6895_s1 + $0x1f8] sm:$0xff]  ;;  %v823_v9 = vmul.f32 %v7361_v55, %v4752_v45 }
 0x1fe   :  { %2776 = vset.pattern.permute.xlu0 %v7015_v54  ;;  %v7336_v54 = vld [vmem:[#allocation49_spill] sm:$0xff] }
 0x1ff   :  { %1931 = vperm.xlu0 %2776, %v7333_v19   ;;  %v4806_v3 = vpop.permute.xlu1 %1270  ;;  %v7338_v19 = vsub.f32 %v7240_v59, %v4158_v35  ;;  %v7343_v59 = vld [vmem:[#allocation54_spill] sm:$0xff]  ;;  %v822_v51 = vmul.f32 %v7345_v36, %v4752_v45  ;;  %v828_v36 = vmul.f32 %v7353_v33, %v4752_v45 }
 0x200   :  { %v4804_v16 = vpop.permute.xlu2 %1310  ;;  %v4818_v30 = vpop.permute.xlu0 %1290 }
 0x201   :  { %7334 = vst [vmem:[#allocation41_spill] sm:$0xff] %v4804_v16  ;;  %v814_v16 = vmul.f32 %v7338_v19, %v4752_v45  ;;  %v1137_v19 = vmul.f32 %v7346_v32, %v817_v25  ;;  %v7351_v32 = vld [vmem:[#allocation66_spill] sm:$0xff]  ;;  %v1139_v25 = vmul.f32 %v7352_v10, %v819_v14  ;;  %v7356_v14 = vsub.f32 %v3869_v20, %v4158_v35  ;;  %v7359_v10 = vld [vmem:[#allocation19_spill] sm:$0xff] }
 0x202   :  { %v1145_v33 = vmul.f32 %v7359_v10, %v825_v38  ;;  %v1140_v10 = vmul.f32 %v7366_v18, %v820_v12  ;;  %v4933_v12 = vpop.eup %2917 }
 0x203   :  { %v1134_v27 = vmul.f32 %v7349_v8, %v814_v16  ;;  %v7354_v16 = vsub.f32 %v7324_v2, %v4158_v35  ;;  %v1457_v41 = vadd.f32 %v4589_v28, %v1137_v19  ;;  %v831_v37 = vmul.f32 %v7356_v14, %v4752_v45  ;;  %v7358_v28 = vld [vmem:[#allocation16_spill] sm:$0xff]  ;;  %v7363_v14 = vld [vmem:[#allocation23_spill] sm:$0xff] }
 0x204   :  { %v1142_v19 = vmul.f32 %v7358_v28, %v822_v51  ;;  %v7362_v51 = vsub.f32 %v3884_v46, %v4158_v35  ;;  %v1459_v38 = vadd.f32 %v4652_v1, %v1139_v25  ;;  %v4909_v43 = vmul.f32 %v7363_v14, %v828_v36  ;;  %v7369_v1 = vld [vmem:[#allocation21_spill] sm:$0xff] }
 0x205   :  { %2775 = vset.pattern.permute.xlu2 %v7348_v11  ;;  %1450 = vperm.xlu1 %2773, %v3116_v7   ;;  %v818_v8 = vmul.f32 %v7354_v16, %v4752_v45  ;;  %v7357_v7 = vld [vmem:[#allocation79_spill] sm:$0xff]  ;;  %v821_v16 = vmul.f32 %v7360_v53, %v4752_v45  ;;  %v1454_v20 = vadd.f32 %v4617_v48, %v1134_v27  ;;  %2921 = vtanh.f32 %v1457_v41  ;;  %v7367_v53 = vld [vmem:[#allocation26_spill] sm:$0xff]  ;;  %v7376_v14 = vld [vmem:[#allocation29_spill] sm:$0xff] }
 0x206   :  { %1927 = vperm.xlu2 %2775, %v7351_v32   ;;  %v834_v29 = vmul.f32 %v7362_v51, %v4752_v45  ;;  %v7365_v48 = vsub.f32 %v3834_v63, %v4158_v35  ;;  %v4918_v55 = vmul.f32 %v7367_v53, %v831_v37  ;;  %v7368_v46 = vsub.f32 %v3837_v57, %v4158_v35 }
 0x207   :  { %1951 = vperm.xlu0 %2776, %v7357_v7   ;;  %v4888_v2 = vpop.permute.xlu1 %1282  ;;  %v7364_v7 = vld [vmem:[#allocation18_spill] sm:$0xff]  ;;  %2923 = vtanh.f32 %v1456_v58  ;;  %v1141_v25 = vmul.f32 %v7369_v1, %v821_v16  ;;  %v7370_v36 = vsub.f32 %v3908_v23, %v4158_v35  ;;  %v7372_v57 = vsub.f32 %v3861_v21, %v4158_v35 }
 0x208   :  { %v4886_v32 = vpop.permute.xlu2 %1322  ;;  %v4897_v22 = vpop.permute.xlu0 %1302  ;;  %v1138_v27 = vmul.f32 %v7364_v7, %v818_v8  ;;  %v824_v28 = vmul.f32 %v7365_v48, %v4752_v45  ;;  %v826_v5 = vmul.f32 %v7368_v46, %v4752_v45  ;;  %v7371_v8 = vsub.f32 %v3853_v42, %v4158_v35  ;;  %v7374_v42 = vld [vmem:[#allocation73_spill] sm:$0xff] }
 0x209   :  { %v837_v63 = vmul.f32 %v7370_v36, %v4752_v45  ;;  %2925 = vtanh.f32 %v1454_v20  ;;  %v829_v37 = vmul.f32 %v7372_v57, %v4752_v45  ;;  %v7373_v58 = vsub.f32 %v3923_v34, %v4158_v35  ;;  %v7375_v20 = vld [vmem:[#allocation25_spill] sm:$0xff] }
 0x20a   :  { %v827_v41 = vmul.f32 %v7371_v8, %v4752_v45  ;;  %v1458_v23 = vadd.f32 %v4619_v17, %v1138_v27  ;;  %2927 = vtanh.f32 %v1459_v38  ;;  %v1143_v51 = vmul.f32 %v7375_v20, %v823_v9  ;;  %v7379_v38 = vld [vmem:[#allocation68_spill] sm:$0xff]  ;;  %v7385_v36 = vld [vmem:[#allocation85_spill] sm:$0xff]  ;;  %v7389_v20 = vld [vmem:[#allocation119_spill] sm:$0xff] }
 0x20b   :  { %v840_v16 = vmul.f32 %v7373_v58, %v4752_v45  ;;  %v4948_v7 = vmul.f32 %v7376_v14, %v834_v29  ;;  %v7377_v21 = vsub.f32 %v3873_v47, %v4158_v35  ;;  %v7378_v34 = vsub.f32 %v3876_v49, %v4158_v35  ;;  %v7381_v27 = vld [vmem:[#allocation24_spill] sm:$0xff]  ;;  %v7384_v47 = vld [vmem:[#allocation122_spill] sm:$0xff] }
 0x20c   :  { %v1144_v18 = vmul.f32 %v7381_v27, %v824_v28  ;;  %v7382_v9 = vld [vmem:[#allocation28_spill] sm:$0xff]  ;;  %v7383_v29 = vsub.f32 %v3945_v26, %v4158_v35  ;;  %v1461_v1 = vadd.f32 %v7384_v47, %v1141_v25  ;;  %v7388_v28 = vld [vmem:[#allocation27_spill] sm:$0xff]  ;;  %v1460_v14 = vadd.f32 %v7389_v20, %v1140_v10  ;;  %v7396_v10 = vld [vmem:[#allocation34_spill] sm:$0xff] }
 0x20d   :  { %2777 = vset.pattern.permute.xlu1 %v7348_v11  ;;  %v830_v48 = vmul.f32 %v7377_v21, %v4752_v45  ;;  %v832_v17 = vmul.f32 %v7378_v34, %v4752_v45  ;;  %v4959_v11 = vpop.eup %2919  ;;  %v1146_v53 = vmul.f32 %v7382_v9, %v826_v5  ;;  %v7387_v58 = vld [vmem:[#allocation32_spill] sm:$0xff]  ;;  %v1147_v5 = vmul.f32 %v7388_v28, %v827_v41  ;;  %v7391_v34 = vld [vmem:[#allocation31_spill] sm:$0xff]  ;;  %v7395_v41 = vld [vmem:[#allocation30_spill] sm:$0xff] }
 0x20e   :  { %1939 = vperm.xlu2 %2775, %v7374_v42   ;;  %1935 = vperm.xlu1 %2777, %v7379_v38   ;;  %7380 = vst [vmem:[#allocation42_spill] sm:$0xff] %v4959_v11  ;;  %v843_v46 = vmul.f32 %v7383_v29, %v4752_v45  ;;  %v4973_v57 = vpop.eup %2921  ;;  %v4976_v42 = vmul.f32 %v7387_v58, %v837_v63  ;;  %v7392_v27 = vld [vmem:[#allocation35_spill] sm:$0xff]  ;;  %2929 = vtanh.f32 %v1458_v23  ;;  %v7393_v29 = vld [vmem:[#allocation126_spill] sm:$0xff]  ;;  %v7397_v20 = vld [vmem:[#allocation120_spill] sm:$0xff] }
 0x20f   :  { %1963 = vperm.xlu0 %2776, %v7385_v36   ;;  %v4971_v49 = vpop.permute.xlu1 %1294  ;;  %7386 = vst [vmem:[#allocation38_spill] sm:$0xff] %v4973_v57  ;;  %v1651_v26 = vmul.f32 %v4933_v12, %v4933_v12  ;;  %v4984_v25 = vpop.eup %2923  ;;  %v1149_v38 = vmul.f32 %v7391_v34, %v829_v37  ;;  %v4988_v9 = vmul.f32 %v7392_v27, %v840_v16  ;;  %v7399_v16 = vld [vmem:[#allocation36_spill] sm:$0xff]  ;;  %2931 = vtanh.f32 %v1461_v1  ;;  %v7400_v23 = vld [vmem:[#allocation129_spill] sm:$0xff] }
 0x210   :  { %v4969_v8 = vpop.permute.xlu2 %1334  ;;  %v4982_v21 = vpop.permute.xlu0 %1314  ;;  %7390 = vst [vmem:[#allocation49_spill] sm:$0xff] %v4984_v25  ;;  %v1462_v63 = vadd.f32 %v7393_v29, %v1142_v19  ;;  %v4994_v36 = vmul.f32 %v7395_v41, %v830_v48  ;;  %v4997_v58 = vmul.f32 %v7396_v10, %v832_v17  ;;  %v1653_v28 = vmul.f32 %v4959_v11, %v4959_v11 }
 0x211   :  { %v4991_v47 = vpop.eup %2925  ;;  %v1463_v15 = vadd.f32 %v7397_v20, %v1143_v51  ;;  %v5005_v34 = vmul.f32 %v7399_v16, %v843_v46  ;;  %v1581_v19 = vadd.f32 %v4959_v11, %v4933_v12  ;;  %v1465_v48 = vadd.f32 %v7400_v23, %v1145_v33  ;;  %v7407_v16 = vld [vmem:[#allocation124_spill] sm:$0xff] }
 0x212   :  { %7394 = vst [vmem:[#allocation60_spill] sm:$0xff] %v4991_v47  ;;  %v5002_v37 = vpop.eup %2927  ;;  %v7401_v17 = vsub.f32 %v3892_v0, %v4158_v35  ;;  %2933 = vtanh.f32 %v1460_v14  ;;  %v1715_v29 = vadd.f32 %v1653_v28, %v1651_v26  ;;  %v1654_v51 = vmul.f32 %v4984_v25, %v4984_v25  ;;  %v7405_v14 = vld [vmem:[#allocation71_spill] sm:$0xff] }
 0x213   :  { %7398 = vst [vmem:[#allocation54_spill] sm:$0xff] %v5002_v37  ;;  %v7402_v46 = vsub.f32 %v3900_v44, %v4158_v35  ;;  %v7403_v1 = vsub.f32 %v3960_v4, %v4158_v35  ;;  %v7404_v0 = vsub.f32 %v3912_v39, %v4158_v35  ;;  %2935 = vtanh.f32 %v1462_v63  ;;  %v7406_v4 = vld [vmem:[#allocation39_spill] sm:$0xff] }
 0x214   :  { %v833_v27 = vmul.f32 %v7401_v17, %v4752_v45  ;;  %v1655_v26 = vmul.f32 %v4973_v57, %v4973_v57  ;;  %2937 = vtanh.f32 %v1463_v15  ;;  %v1652_v44 = vmul.f32 %v4991_v47, %v4991_v47  ;;  %v5036_v20 = vpop.eup %2929  ;;  %v7408_v17 = vld [vmem:[#allocation91_spill] sm:$0xff] }
 0x215   :  { %v835_v41 = vmul.f32 %v7402_v46, %v4752_v45  ;;  %v846_v33 = vmul.f32 %v7403_v1, %v4752_v45  ;;  %v836_v10 = vmul.f32 %v7404_v0, %v4752_v45  ;;  %v1657_v28 = vmul.f32 %v5002_v37, %v5002_v37 }
 0x216   :  { %1947 = vperm.xlu2 %2775, %v7405_v14   ;;  %1943 = vperm.xlu1 %2777, %v7406_v4   ;;  %v1612_v39 = vadd.f32 %v4991_v47, %v4984_v25  ;;  %v1582_v63 = vadd.f32 %v4973_v57, %v1581_v19  ;;  %v1464_v23 = vadd.f32 %v7407_v16, %v1144_v18  ;;  %2939 = vtanh.f32 %v1465_v48  ;;  %v5059_v16 = vpop.eup %2931  ;;  %v7414_v25 = vld [vmem:[#allocation127_spill] sm:$0xff] }
 0x217   :  { %1975 = vperm.xlu0 %2776, %v7408_v17   ;;  %v5045_v46 = vpop.permute.xlu1 %1306  ;;  %v7409_v1 = vsub.f32 %v3915_v61, %v4158_v35  ;;  %v7410_v14 = vsub.f32 %v7275_v52, %v4158_v35  ;;  %v1746_v19 = vadd.f32 %v1654_v51, %v1652_v44  ;;  %v1716_v18 = vadd.f32 %v1715_v29, %v1655_v26  ;;  %v7412_v17 = vld [vmem:[#allocation33_spill] sm:$0xff]  ;;  %v7416_v51 = vld [vmem:[#allocation67_spill] sm:$0xff] }
 0x218   :  { %v5043_v15 = vpop.permute.xlu2 %1346  ;;  %v5057_v48 = vpop.permute.xlu0 %1326  ;;  %7411 = vst [vmem:[#allocation65_spill] sm:$0xff] %v5059_v16  ;;  %v1153_v57 = vmul.f32 %v7412_v17, %v833_v27  ;;  %v7413_v11 = vsub.f32 %v3931_v56, %v4158_v35  ;;  %v1467_v52 = vadd.f32 %v7414_v25, %v1147_v5  ;;  %v5073_v29 = vmul.f32 %v7416_v51, %v835_v41  ;;  %v7417_v44 = vld [vmem:[#allocation121_spill] sm:$0xff] }
 0x219   :  { %v838_v0 = vmul.f32 %v7409_v1, %v4752_v45  ;;  %v5055_v4 = vmul.f32 %v7410_v14, %v4752_v45  ;;  %v1583_v1 = vadd.f32 %v5002_v37, %v1582_v63  ;;  %v5070_v14 = vpop.eup %2933  ;;  %v1656_v26 = vmul.f32 %v5036_v20, %v5036_v20  ;;  %v7419_v56 = vld [vmem:[#allocation69_spill] sm:$0xff] }
 0x21a   :  { %v5066_v61 = vmul.f32 %v7413_v11, %v4752_v45  ;;  %7415 = vst [vmem:[#allocation10_spill] sm:$0xff] %v5070_v14  ;;  %v1466_v27 = vadd.f32 %v7417_v44, %v1146_v53  ;;  %v1717_v17 = vadd.f32 %v1716_v18, %v1657_v28  ;;  %v5078_v47 = vpop.eup %2935  ;;  %v5081_v11 = vmul.f32 %v7419_v56, %v846_v33  ;;  %v7422_v33 = vld [vmem:[#allocation123_spill] sm:$0xff]  ;;  %v7426_v56 = vld [vmem:[#allocation78_spill] sm:$0xff] }
 0x21b   :  { %7418 = vst [vmem:[#allocation7_spill] sm:$0xff] %v5078_v47  ;;  %v1613_v63 = vadd.f32 %v5036_v20, %v1612_v39  ;;  %2941 = vtanh.f32 %v1464_v23  ;;  %v1468_v5 = vadd.f32 %v4732_v60, %v4909_v43  ;;  %v5086_v25 = vpop.eup %2937  ;;  %v7421_v41 = vsub.f32 %v3937_v40, %v4158_v35  ;;  %v7424_v39 = vld [vmem:[#allocation70_spill] sm:$0xff]  ;;  %v7425_v40 = vld [vmem:[#allocation76_spill] sm:$0xff] }
 0x21c   :  { %7420 = vst [vmem:[#allocation64_spill] sm:$0xff] %v5086_v25  ;;  %v1747_v53 = vadd.f32 %v1746_v19, %v1656_v26  ;;  %v1659_v28 = vmul.f32 %v5059_v16, %v5059_v16  ;;  %v1469_v18 = vadd.f32 %v7422_v33, %v1149_v38  ;;  %v5097_v44 = vpop.eup %2939  ;;  %v5100_v23 = vmul.f32 %v7424_v39, %v836_v10  ;;  %v7427_v10 = vld [vmem:[#allocation72_spill] sm:$0xff] }
 0x21d   :  { %v5092_v51 = vmul.f32 %v7421_v41, %v4752_v45  ;;  %7423 = vst [vmem:[#allocation66_spill] sm:$0xff] %v5097_v44  ;;  %v1584_v60 = vadd.f32 %v5059_v16, %v1583_v1  ;;  %2943 = vtanh.f32 %v1467_v52  ;;  %v1471_v43 = vadd.f32 %v4806_v3, %v4918_v55  ;;  %v7429_v52 = vld [vmem:[#allocation95_spill] sm:$0xff] }
 0x21e   :  { %1959 = vperm.xlu2 %2775, %v7425_v40   ;;  %v1658_v19 = vmul.f32 %v5070_v14, %v5070_v14  ;;  %2945 = vtanh.f32 %v1466_v27  ;;  %v1718_v26 = vadd.f32 %v1717_v17, %v1659_v28  ;;  %v1660_v38 = vmul.f32 %v5078_v47, %v5078_v47  ;;  %1955 = vperm.xlu1 %2777, %v7426_v56   ;;  %v7431_v40 = vld [vmem:[#allocation130_spill] sm:$0xff] }
 0x21f   :  { %v5112_v41 = vmul.f32 %v7427_v10, %v838_v0  ;;  %v7428_v1 = vsub.f32 %v3995_v62, %v4158_v35  ;;  %v1614_v55 = vadd.f32 %v5070_v14, %v1613_v63  ;;  %2947 = vtanh.f32 %v1468_v5  ;;  %1987 = vperm.xlu0 %2776, %v7429_v52   ;;  %v5124_v17 = vpop.permute.xlu1 %1318 }
 0x220   :  { %v5122_v27 = vpop.permute.xlu2 %1358  ;;  %v1661_v28 = vmul.f32 %v5086_v25, %v5086_v25  ;;  %2949 = vtanh.f32 %v1469_v18  ;;  %v1748_v0 = vadd.f32 %v1747_v53, %v1658_v19  ;;  %v1663_v33 = vmul.f32 %v5097_v44, %v5097_v44  ;;  %v5130_v62 = vpop.permute.xlu0 %1338  ;;  %v7433_v19 = vld [vmem:[#allocation43_spill] sm:$0xff] }
 0x221   :  { %v5118_v3 = vmul.f32 %v7428_v1, %v4752_v45  ;;  %v5132_v39 = vpop.eup %2941  ;;  %v1615_v63 = vadd.f32 %v5078_v47, %v1614_v55  ;;  %v1585_v5 = vadd.f32 %v5086_v25, %v1584_v60  ;;  %v1470_v56 = vadd.f32 %v7431_v40, %v4994_v36  ;;  %v7436_v60 = vld [vmem:[#allocation48_spill] sm:$0xff] }
 0x222   :  { %7430 = vst [vmem:[#allocation13_spill] sm:$0xff] %v5132_v39  ;;  %2951 = vtanh.f32 %v1471_v43  ;;  %v7432_v18 = vsub.f32 %v7328_v50, %v4158_v35  ;;  %v7434_v10 = vsub.f32 %v7433_v19, %v4158_v35  ;;  %v1749_v52 = vadd.f32 %v1748_v0, %v1660_v38  ;;  %v7439_v19 = vld [vmem:[#allocation40_spill] sm:$0xff] }
 0x223   :  { %v1719_v55 = vadd.f32 %v1718_v26, %v1661_v28  ;;  %v5150_v14 = vpop.eup %2943  ;;  %v7437_v36 = vsub.f32 %v7436_v60, %v4158_v35  ;;  %v7438_v50 = vsub.f32 %v3968_v13, %v4158_v35  ;;  %v7441_v26 = vld [vmem:[#allocation44_spill] sm:$0xff]  ;;  %v1662_v60 = vmul.f32 %v5132_v39, %v5132_v39 }
 0x224   :  { %v5142_v53 = vmul.f32 %v7432_v18, %v4752_v45  ;;  %v5148_v1 = vmul.f32 %v7434_v10, %v4752_v45  ;;  %7435 = vst [vmem:[#allocation79_spill] sm:$0xff] %v5150_v14  ;;  %v1586_v18 = vadd.f32 %v5097_v44, %v1585_v5  ;;  %v1473_v10 = vadd.f32 %v7439_v19, %v1153_v57  ;;  %v5166_v38 = vpop.eup %2945  ;;  %v7445_v5 = vld [vmem:[#allocation51_spill] sm:$0xff] }
 0x225   :  { %v5156_v43 = vmul.f32 %v7437_v36, %v4752_v45  ;;  %v5162_v40 = vmul.f32 %v7438_v50, %v4752_v45  ;;  %7440 = vst [vmem:[#allocation16_spill] sm:$0xff] %v5166_v38  ;;  %v7442_v28 = vsub.f32 %v7441_v26, %v4158_v35  ;;  %v7443_v36 = vld [vmem:[#allocation125_spill] sm:$0xff]  ;;  %v1720_v50 = vadd.f32 %v1719_v55, %v1663_v33  ;;  %v5178_v25 = vpop.eup %2947 }
 0x226   :  { %v1472_v13 = vadd.f32 %v7443_v36, %v4997_v58  ;;  %7444 = vst [vmem:[#allocation19_spill] sm:$0xff] %v5178_v25  ;;  %v7446_v57 = vsub.f32 %v7445_v5, %v4158_v35  ;;  %v1616_v44 = vadd.f32 %v5132_v39, %v1615_v63  ;;  %2953 = vtanh.f32 %v1470_v56  ;;  %v5190_v47 = vpop.eup %2949  ;;  %v7449_v58 = vld [vmem:[#allocation46_spill] sm:$0xff]  ;;  %v7451_v63 = vld [vmem:[#allocation128_spill] sm:$0xff] }
 0x227   :  { %v5172_v0 = vmul.f32 %v7442_v28, %v4752_v45  ;;  %v1474_v26 = vadd.f32 %v4888_v2, %v4948_v7  ;;  %v7447_v28 = vld [vmem:[#allocation82_spill] sm:$0xff]  ;;  %7448 = vst [vmem:[#allocation23_spill] sm:$0xff] %v5190_v47  ;;  %v7450_v33 = vsub.f32 %v7449_v58, %v4158_v35  ;;  %v1750_v36 = vadd.f32 %v1749_v52, %v1662_v60  ;;  %v7454_v7 = vld [vmem:[#allocation47_spill] sm:$0xff]  ;;  %v7456_v60 = vld [vmem:[#allocation45_spill] sm:$0xff] }
 0x228   :  { %v5184_v19 = vmul.f32 %v7446_v57, %v4752_v45  ;;  %1971 = vperm.xlu2 %2775, %v7447_v28   ;;  %v1665_v5 = vmul.f32 %v5150_v14, %v5150_v14  ;;  %v1475_v56 = vadd.f32 %v7451_v63, %v5073_v29  ;;  %v7452_v57 = vld [vmem:[#allocation84_spill] sm:$0xff]  ;;  %v5203_v2 = vpop.eup %2951  ;;  %v7455_v28 = vsub.f32 %v7454_v7, %v4158_v35  ;;  %v5217_v29 = vpop.permute.xlu1 %1330 }
 0x229   :  { %v5196_v55 = vmul.f32 %v7450_v33, %v4752_v45  ;;  %1967 = vperm.xlu1 %2777, %v7452_v57   ;;  %7453 = vst [vmem:[#allocation18_spill] sm:$0xff] %v5203_v2  ;;  %v1587_v58 = vadd.f32 %v5150_v14, %v1586_v18  ;;  %2955 = vtanh.f32 %v1473_v10  ;;  %v1477_v52 = vadd.f32 %v4971_v49, %v4976_v42  ;;  %v5215_v33 = vpop.permute.xlu2 %1370  ;;  %v7457_v18 = vld [vmem:[#allocation75_spill] sm:$0xff]  ;;  %v7458_v49 = vld [vmem:[#allocation52_spill] sm:$0xff] }
 0x22a   :  { %v5209_v39 = vmul.f32 %v7455_v28, %v4752_v45  ;;  %1999 = vperm.xlu0 %2776, %v7456_v60   ;;  %v1664_v63 = vmul.f32 %v5166_v38, %v5166_v38  ;;  %2957 = vtanh.f32 %v1472_v13  ;;  %v1721_v57 = vadd.f32 %v1720_v50, %v1665_v5  ;;  %v5223_v28 = vpop.permute.xlu0 %1350 }
 0x22b   :  { %v1666_v7 = vmul.f32 %v5178_v25, %v5178_v25  ;;  %v1159_v10 = vmul.f32 %v7457_v18, %v5066_v61  ;;  %v7459_v42 = vsub.f32 %v7458_v49, %v4158_v35  ;;  %v1617_v14 = vadd.f32 %v5166_v38, %v1616_v44  ;;  %v7461_v44 = vld [vmem:[#allocation8_spill] sm:$0xff] }
 0x22c   :  { %2959 = vtanh.f32 %v1474_v26  ;;  %v1667_v13 = vmul.f32 %v5190_v47, %v5190_v47  ;;  %v1751_v50 = vadd.f32 %v1750_v36, %v1664_v63  ;;  %v1669_v5 = vmul.f32 %v5203_v2, %v5203_v2  ;;  %v5238_v37 = vpop.eup %2953  ;;  %v7463_v36 = vld [vmem:[#allocation5_spill] sm:$0xff] }
 0x22d   :  { %v5231_v60 = vmul.f32 %v7459_v42, %v4752_v45  ;;  %2961 = vtanh.f32 %v1475_v56  ;;  %7460 = vst [vmem:[#allocation22_spill] sm:$0xff] %v5238_v37  ;;  %v1618_v61 = vadd.f32 %v5178_v25, %v1617_v14  ;;  %v1588_v18 = vadd.f32 %v5190_v47, %v1587_v58  ;;  %v7466_v58 = vld [vmem:[#allocation50_spill] sm:$0xff] }
 0x22e   :  { %v1476_v49 = vadd.f32 %v4818_v30, %v5100_v23  ;;  %2963 = vtanh.f32 %v1477_v52  ;;  %v7462_v26 = vsub.f32 %v7461_v44, %v4158_v35  ;;  %v7464_v56 = vsub.f32 %v7463_v36, %v4158_v35 }
 0x22f   :  { %v1752_v38 = vadd.f32 %v1751_v50, %v1666_v7  ;;  %v1722_v14 = vadd.f32 %v1721_v57, %v1667_v13  ;;  %v5256_v25 = vpop.eup %2955  ;;  %v7465_v30 = vsub.f32 %v7336_v54, %v4158_v35  ;;  %v7467_v52 = vsub.f32 %v7466_v58, %v4158_v35  ;;  %v7468_v7 = vld [vmem:[#allocation88_spill] sm:$0xff]  ;;  %v7470_v13 = vld [vmem:[#allocation77_spill] sm:$0xff] }
 0x230   :  { %v5248_v42 = vmul.f32 %v7462_v26, %v4752_v45  ;;  %v5254_v63 = vmul.f32 %v7464_v56, %v4752_v45  ;;  %v1589_v26 = vadd.f32 %v5203_v2, %v1588_v18  ;;  %v1479_v36 = vadd.f32 %v4897_v22, %v1159_v10  ;;  %1983 = vperm.xlu2 %2775, %v7468_v7   ;;  %v5273_v57 = vpop.eup %2957  ;;  %v7471_v56 = vld [vmem:[#allocation37_spill] sm:$0xff]  ;;  %v7474_v22 = vld [vmem:[#allocation11_spill] sm:$0xff] }
 0x231   :  { %v5262_v23 = vmul.f32 %v7465_v30, %v4752_v45  ;;  %v5268_v44 = vmul.f32 %v7467_v52, %v4752_v45  ;;  %7469 = vst [vmem:[#allocation26_spill] sm:$0xff] %v5273_v57  ;;  %v1161_v50 = vmul.f32 %v7470_v13, %v5092_v51  ;;  %v1668_v54 = vmul.f32 %v5238_v37, %v5238_v37  ;;  %v7472_v52 = vld [vmem:[#allocation90_spill] sm:$0xff] }
 0x232   :  { %v1478_v30 = vadd.f32 %v7471_v56, %v5112_v41  ;;  %v1723_v58 = vadd.f32 %v1722_v14, %v1669_v5  ;;  %1979 = vperm.xlu1 %2777, %v7472_v52   ;;  %v5282_v47 = vpop.eup %2959  ;;  %v7475_v10 = vsub.f32 %v7474_v22, %v4158_v35  ;;  %v1619_v7 = vadd.f32 %v5238_v37, %v1618_v61  ;;  %v7476_v13 = vld [vmem:[#allocation102_spill] sm:$0xff]  ;;  %v5294_v41 = vpop.permute.xlu2 %1382 }
 0x233   :  { %7473 = vst [vmem:[#allocation21_spill] sm:$0xff] %v5282_v47  ;;  %2965 = vtanh.f32 %v1476_v49  ;;  %v1480_v51 = vadd.f32 %v5045_v46, %v4988_v9  ;;  %2011 = vperm.xlu0 %2776, %v7476_v13   ;;  %v5296_v5 = vpop.permute.xlu1 %1342  ;;  %v5298_v14 = vpop.eup %2961  ;;  %v7478_v56 = vsub.f32 %v7286_v6, %v4158_v35  ;;  %v1753_v22 = vadd.f32 %v1752_v38, %v1668_v54  ;;  %v7479_v49 = vld [vmem:[#allocation41_spill] sm:$0xff] }
 0x234   :  { %v5288_v18 = vmul.f32 %v7475_v10, %v4752_v45  ;;  %7477 = vst [vmem:[#allocation73_spill] sm:$0xff] %v5298_v14  ;;  %v1671_v61 = vmul.f32 %v5256_v25, %v5256_v25  ;;  %v1481_v9 = vadd.f32 %v7479_v49, %v1161_v50  ;;  %v5309_v46 = vpop.permute.xlu0 %1362  ;;  %v5311_v10 = vpop.eup %2963  ;;  %v7481_v13 = vld [vmem:[#allocation53_spill] sm:$0xff]  ;;  %v1590_v6 = vadd.f32 %v5256_v25, %v1589_v26 }
 0x235   :  { %v5304_v52 = vmul.f32 %v7478_v56, %v4752_v45  ;;  %7480 = vst [vmem:[#allocation25_spill] sm:$0xff] %v5311_v10  ;;  %v7482_v2 = vsub.f32 %v7481_v13, %v4158_v35  ;;  %2967 = vtanh.f32 %v1479_v36  ;;  %v1483_v38 = vadd.f32 %v5124_v17, %v5005_v34  ;;  %v7483_v49 = vld [vmem:[#allocation81_spill] sm:$0xff] }
 0x236   :  { %v1670_v54 = vmul.f32 %v5273_v57, %v5273_v57  ;;  %2969 = vtanh.f32 %v1478_v30  ;;  %v1724_v50 = vadd.f32 %v1723_v58, %v1671_v61  ;;  %v1672_v56 = vmul.f32 %v5282_v47, %v5282_v47 }
 0x237   :  { %v5317_v37 = vmul.f32 %v7482_v2, %v4752_v45  ;;  %v1162_v16 = vmul.f32 %v7483_v49, %v5142_v53  ;;  %v7484_v2 = vld [vmem:[#allocation87_spill] sm:$0xff]  ;;  %v1620_v26 = vadd.f32 %v5273_v57, %v1619_v7  ;;  %2971 = vtanh.f32 %v1480_v51 }
 0x238   :  { %v1165_v13 = vmul.f32 %v7484_v2, %v5162_v40  ;;  %v1673_v34 = vmul.f32 %v5298_v14, %v5298_v14  ;;  %2973 = vtanh.f32 %v1481_v9  ;;  %v1754_v17 = vadd.f32 %v1753_v22, %v1670_v54  ;;  %v3117_v40 = vld [vmem:[%s6895_s1 + $0x88] sm:$0xff]  ;;  %v7486_v7 = vld [vmem:[#allocation83_spill] sm:$0xff] }
 0x239   :  { %v1675_v36 = vmul.f32 %v5311_v10, %v5311_v10  ;;  %v5335_v30 = vpop.eup %2965  ;;  %v1621_v58 = vadd.f32 %v5282_v47, %v1620_v26  ;;  %v1591_v53 = vadd.f32 %v5298_v14, %v1590_v6  ;;  %v1482_v61 = vadd.f32 %v4982_v21, %v1162_v16  ;;  %1995 = vperm.xlu2 %2775, %v3117_v40   ;;  %v3118_v21 = vld [vmem:[%s6895_s1 + $0x80] sm:$0xff]  ;;  %v7489_v6 = vld [vmem:[#allocation89_spill] sm:$0xff] }
 0x23a   :  { %7485 = vst [vmem:[#allocation29_spill] sm:$0xff] %v5335_v30  ;;  %2975 = vtanh.f32 %v1483_v38  ;;  %v1164_v51 = vmul.f32 %v7486_v7, %v5148_v1  ;;  %v7487_v22 = vsub.f32 %v7343_v59, %v4158_v35  ;;  %v1755_v54 = vadd.f32 %v1754_v17, %v1672_v56  ;;  %1991 = vperm.xlu1 %2777, %v3118_v21   ;;  %v7491_v56 = vld [vmem:[#allocation6_spill] sm:$0xff]  ;;  %v5367_v26 = vpop.permute.xlu2 %1394 }
 0x23b   :  { %v1725_v49 = vadd.f32 %v1724_v50, %v1673_v34  ;;  %v5354_v16 = vpop.eup %2967  ;;  %v1167_v38 = vmul.f32 %v7489_v6, %v5172_v0  ;;  %v7490_v1 = vsub.f32 %v7293_v24, %v4158_v35  ;;  %v1592_v59 = vadd.f32 %v5311_v10, %v1591_v53  ;;  %2023 = vperm.xlu0 %2776, %v7491_v56   ;;  %v5369_v34 = vpop.permute.xlu1 %1354  ;;  %v7493_v0 = vld [vmem:[#allocation57_spill] sm:$0xff]  ;;  %v7496_v21 = vld [vmem:[#allocation74_spill] sm:$0xff] }
 0x23c   :  { %v5349_v9 = vmul.f32 %v7487_v22, %v4752_v45  ;;  %7488 = vst [vmem:[#allocation68_spill] sm:$0xff] %v5354_v16  ;;  %v1485_v50 = vadd.f32 %v5057_v48, %v1165_v13  ;;  %v5371_v17 = vpop.eup %2969  ;;  %v7494_v40 = vsub.f32 %v7493_v0, %v4158_v35  ;;  %v1674_v24 = vmul.f32 %v5335_v30, %v5335_v30  ;;  %v5382_v13 = vpop.permute.xlu0 %1374 }
 0x23d   :  { %v5362_v2 = vmul.f32 %v7490_v1, %v4752_v45  ;;  %7492 = vst [vmem:[#allocation24_spill] sm:$0xff] %v5371_v17  ;;  %v1484_v53 = vadd.f32 %v4886_v32, %v1164_v51  ;;  %v1726_v48 = vadd.f32 %v1725_v49, %v1675_v36  ;;  %v5384_v22 = vpop.eup %2971  ;;  %v1169_v6 = vmul.f32 %v7496_v21, %v5055_v4  ;;  %v7501_v21 = vld [vmem:[#allocation97_spill] sm:$0xff] }
 0x23e   :  { %v5377_v7 = vmul.f32 %v7494_v40, %v4752_v45  ;;  %7495 = vst [vmem:[#allocation28_spill] sm:$0xff] %v5384_v22  ;;  %v1622_v1 = vadd.f32 %v5335_v30, %v1621_v58  ;;  %v1487_v56 = vadd.f32 %v4969_v8, %v1167_v38  ;;  %2977 = vtanh.f32 %v1482_v61  ;;  %v5390_v0 = vpop.eup %2973  ;;  %v7497_v40 = vld [vmem:[#allocation58_spill] sm:$0xff]  ;;  %v7499_v8 = vld [vmem:[#allocation80_spill] sm:$0xff] }
 0x23f   :  { %v7498_v14 = vsub.f32 %v7497_v40, %v4158_v35  ;;  %v1756_v36 = vadd.f32 %v1755_v54, %v1674_v24  ;;  %v1677_v51 = vmul.f32 %v5354_v16, %v5354_v16  ;;  %v1486_v4 = vadd.f32 %v5217_v29, %v5081_v11  ;;  %v7500_v11 = vld [vmem:[#allocation93_spill] sm:$0xff] }
 0x240   :  { %v5402_v49 = vpop.eup %2975  ;;  %v1172_v58 = vmul.f32 %v7499_v8, %v5118_v3  ;;  %v1593_v61 = vadd.f32 %v5354_v16, %v1592_v59  ;;  %2979 = vtanh.f32 %v1485_v50  ;;  %v1489_v38 = vadd.f32 %v5296_v5, %v1169_v6  ;;  %v3119_v5 = vld [vmem:[%s6895_s1 + $0xa0] sm:$0xff]  ;;  %v7505_v8 = vld [vmem:[#allocation94_spill] sm:$0xff] }
 0x241   :  { %v5396_v32 = vmul.f32 %v7498_v14, %v4752_v45  ;;  %v1676_v14 = vmul.f32 %v5371_v17, %v5371_v17  ;;  %2981 = vtanh.f32 %v1484_v53  ;;  %v1727_v54 = vadd.f32 %v1726_v48, %v1677_v51  ;;  %2007 = vperm.xlu2 %2775, %v3119_v5   ;;  %v7503_v48 = vld [vmem:[#allocation107_spill] sm:$0xff] }
 0x242   :  { %v1678_v24 = vmul.f32 %v5384_v22, %v5384_v22  ;;  %v1168_v29 = vmul.f32 %v7500_v11, %v5196_v55  ;;  %v1171_v40 = vmul.f32 %v7501_v21, %v5248_v42  ;;  %2983 = vtanh.f32 %v1487_v56  ;;  %v3120_v55 = vld [vmem:[%s6895_s1 + $0x98] sm:$0xff]  ;;  %v5434_v51 = vpop.permute.xlu2 %1406 }
 0x243   :  { %v1623_v3 = vadd.f32 %v5371_v17, %v1622_v1  ;;  %v1679_v59 = vmul.f32 %v5390_v0, %v5390_v0  ;;  %v1757_v50 = vadd.f32 %v1756_v36, %v1676_v14  ;;  %v1681_v53 = vmul.f32 %v5402_v49, %v5402_v49  ;;  %2003 = vperm.xlu1 %2777, %v3120_v55   ;;  %v7504_v36 = vld [vmem:[#allocation14_spill] sm:$0xff] }
 0x244   :  { %2985 = vtanh.f32 %v1486_v4  ;;  %v5427_v42 = vpop.eup %2977  ;;  %v1180_v6 = vmul.f32 %v7503_v48, %v5317_v37  ;;  %v1594_v56 = vadd.f32 %v5390_v0, %v1593_v61  ;;  %2035 = vperm.xlu0 %2776, %v7504_v36   ;;  %v1367_v4 = vpop.permute.xlu1 %1366  ;;  %v1170_v14 = vmul.f32 %v7505_v8, %v5209_v39  ;;  %v7506_v37 = vld [vmem:[#allocation98_spill] sm:$0xff] }
 0x245   :  { %7502 = vst [vmem:[#allocation122_spill] sm:$0xff] %v5427_v42  ;;  %v1624_v1 = vadd.f32 %v5384_v22, %v1623_v3  ;;  %2987 = vtanh.f32 %v1489_v38  ;;  %v1758_v11 = vadd.f32 %v1757_v50, %v1678_v24  ;;  %v1728_v21 = vadd.f32 %v1727_v54, %v1679_v59  ;;  %v1387_v55 = vpop.permute.xlu0 %1386  ;;  %v7507_v39 = vld [vmem:[#allocation86_spill] sm:$0xff] }
 0x246   :  { %v1488_v5 = vadd.f32 %v5130_v62, %v1168_v29  ;;  %v5439_v17 = vpop.eup %2979  ;;  %v1173_v3 = vmul.f32 %v7506_v37, %v5254_v63  ;;  %v1595_v61 = vadd.f32 %v5402_v49, %v1594_v56  ;;  %v1491_v38 = vadd.f32 %v5223_v28, %v1171_v40  ;;  %v7508_v63 = vld [vmem:[#allocation100_spill] sm:$0xff]  ;;  %v3123_v37 = vld [vmem:[%s6895_s1 + $0xf0] sm:$0xff] }
 0x247   :  { %v5445_v48 = vadd.f32 %v1387_v55, %v1180_v6  ;;  %v5447_v36 = vpop.eup %2981  ;;  %v1175_v24 = vmul.f32 %v7507_v39, %v5156_v43  ;;  %v1680_v62 = vmul.f32 %v5427_v42, %v5427_v42  ;;  %v1490_v54 = vadd.f32 %v5043_v15, %v1170_v14  ;;  %v7509_v28 = vld [vmem:[#allocation104_spill] sm:$0xff] }
 0x248   :  { %v1729_v29 = vadd.f32 %v1728_v21, %v1681_v53  ;;  %v5454_v59 = vpop.eup %2983  ;;  %v1174_v50 = vmul.f32 %v7508_v63, %v5262_v23  ;;  %v1177_v40 = vmul.f32 %v7509_v28, %v5288_v18  ;;  %v1625_v6 = vadd.f32 %v5427_v42, %v1624_v1  ;;  %v7510_v23 = vld [vmem:[#allocation110_spill] sm:$0xff]  ;;  %v7624_v42 = vld [vmem:[#allocation24_spill] sm:$0xff] }
 0x249   :  { %v1493_v56 = vadd.f32 %v5122_v27, %v1173_v3  ;;  %v1759_v43 = vadd.f32 %v1758_v11, %v1680_v62  ;;  %v1683_v55 = vmul.f32 %v5439_v17, %v5439_v17  ;;  %2989 = vtanh.f32 %v1488_v5  ;;  %v3121_v27 = vld [vmem:[%s6895_s1 + $0xb8] sm:$0xff]  ;;  %v7511_v11 = vld [vmem:[#allocation113_spill] sm:$0xff] }
 0x24a   :  { %v5462_v8 = vpop.eup %2985  ;;  %v1492_v15 = vadd.f32 %v5369_v34, %v1172_v58  ;;  %v1183_v14 = vmul.f32 %v7510_v23, %v5362_v2  ;;  %v1596_v18 = vadd.f32 %v5439_v17, %v1595_v61  ;;  %2991 = vtanh.f32 %v1491_v38  ;;  %2019 = vperm.xlu2 %2775, %v3121_v27   ;;  %v5482_v2 = vld [vmem:[%s6895_s1 + $0xb0] sm:$0xff]  ;;  %v1419_v3 = vpop.permute.xlu2 %1418 }
 0x24b   :  { %v5467_v53 = vpop.eup %2987  ;;  %v1495_v1 = vadd.f32 %v1367_v4, %v1175_v24  ;;  %v1188_v21 = vmul.f32 %v7511_v11, %v5396_v32  ;;  %v1682_v34 = vmul.f32 %v5447_v36, %v5447_v36  ;;  %2993 = vtanh.f32 %v1490_v54  ;;  %7512 = vst [vmem:[#allocation85_spill] sm:$0xff] %v5482_v2  ;;  %2015 = vperm.xlu1 %2777, %v5482_v2  }
 0x24c   :  { %v1730_v58 = vadd.f32 %v1729_v29, %v1683_v55  ;;  %v1685_v4 = vmul.f32 %v5454_v59, %v5454_v59  ;;  %2995 = vtanh.f32 %v1493_v56  ;;  %v1626_v5 = vadd.f32 %v5447_v36, %v1625_v6  ;;  %2047 = vperm.xlu0 %2776, %v3123_v37   ;;  %v1379_v61 = vpop.permute.xlu1 %1378  ;;  %v7513_v6 = vld [vmem:[#allocation101_spill] sm:$0xff] }
 0x24d   :  { %v1684_v32 = vmul.f32 %v5462_v8, %v5462_v8  ;;  %v1760_v38 = vadd.f32 %v1759_v43, %v1682_v34  ;;  %v1687_v39 = vmul.f32 %v5467_v53, %v5467_v53  ;;  %2997 = vtanh.f32 %v1492_v15  ;;  %v1399_v62 = vpop.permute.xlu0 %1398  ;;  %v7514_v43 = vld [vmem:[#allocation12_spill] sm:$0xff] }
 0x24e   :  { %v5495_v24 = vadd.f32 %v1419_v3, %v1188_v21  ;;  %v1627_v54 = vadd.f32 %v5462_v8, %v1626_v5  ;;  %v1597_v29 = vadd.f32 %v5454_v59, %v1596_v18  ;;  %2999 = vtanh.f32 %v1495_v1  ;;  %v7516_v18 = vld [vmem:[#allocation105_spill] sm:$0xff]  ;;  %v7518_v3 = vld [vmem:[#allocation96_spill] sm:$0xff] }
 0x24f   :  { %v5499_v63 = vadd.f32 %v1399_v62, %v1183_v14  ;;  %v5501_v28 = vpop.eup %2989  ;;  %v1176_v56 = vmul.f32 %v7513_v6, %v5268_v44  ;;  %v7515_v55 = vsub.f32 %v7514_v43, %v4158_v35  ;;  %v1731_v23 = vadd.f32 %v1730_v58, %v1685_v4  ;;  %v7517_v44 = vld [vmem:[#allocation92_spill] sm:$0xff] }
 0x250   :  { %v1494_v27 = vadd.f32 %v5309_v46, %v1174_v50  ;;  %v5510_v11 = vpop.eup %2991  ;;  %v1179_v1 = vmul.f32 %v7516_v18, %v5304_v52  ;;  %v1761_v14 = vadd.f32 %v1760_v38, %v1684_v32  ;;  %v1598_v21 = vadd.f32 %v5467_v53, %v1597_v29  ;;  %v7519_v52 = vld [vmem:[#allocation112_spill] sm:$0xff] }
 0x251   :  { %v871_v15 = vmul.f32 %v7515_v55, %v4752_v45  ;;  %v1497_v34 = vadd.f32 %v5382_v13, %v1177_v40  ;;  %v5516_v5 = vpop.eup %2993  ;;  %v1178_v37 = vmul.f32 %v7517_v44, %v5184_v19  ;;  %v1181_v58 = vmul.f32 %v7518_v3, %v5231_v60  ;;  %v3124_v19 = vld [vmem:[%s6895_s1 + $0xd0] sm:$0xff]  ;;  %v3126_v43 = vld [vmem:[%s6895_s1 + $0x108] sm:$0xff] }
 0x252   :  { %v1496_v46 = vadd.f32 %v5215_v33, %v1176_v56  ;;  %v1732_v50 = vadd.f32 %v1731_v23, %v1687_v39  ;;  %v5523_v4 = vpop.eup %2995  ;;  %v1186_v32 = vmul.f32 %v7519_v52, %v5377_v7  ;;  %v1686_v38 = vmul.f32 %v5501_v28, %v5501_v28  ;;  %2031 = vperm.xlu2 %2775, %v3124_v19   ;;  %v7520_v33 = vld [vmem:[#allocation115_spill] sm:$0xff] }
 0x253   :  { %v1628_v13 = vadd.f32 %v5501_v28, %v1627_v54  ;;  %v1499_v40 = vadd.f32 %v5294_v41, %v1179_v1  ;;  %v5534_v60 = vpop.eup %2997  ;;  %v1191_v39 = vmul.f32 %v7520_v33, %v871_v15  ;;  %v1689_v62 = vmul.f32 %v5510_v11, %v5510_v11  ;;  %v3125_v54 = vld [vmem:[%s6895_s1 + $0xc8] sm:$0xff] }
 0x254   :  { %3001 = vtanh.f32 %v1494_v27  ;;  %v1498_v7 = vadd.f32 %v1379_v61, %v1178_v37  ;;  %2027 = vperm.xlu1 %2777, %v3125_v54   ;;  %v5542_v41 = vpop.eup %2999  ;;  %v1688_v29 = vmul.f32 %v5516_v5, %v5516_v5  ;;  %v1762_v6 = vadd.f32 %v1761_v14, %v1686_v38  ;;  %2059 = vperm.xlu0 %2776, %v3126_v43   ;;  %v1431_v61 = vpop.permute.xlu2 %1430  ;;  %v7523_v38 = vld [vmem:[#allocation55_spill] sm:$0xff] }
 0x255   :  { %v1599_v56 = vadd.f32 %v5510_v11, %v1598_v21  ;;  %3003 = vtanh.f32 %v1497_v34  ;;  %v1391_v55 = vpop.permute.xlu1 %1390  ;;  %v1733_v15 = vadd.f32 %v1732_v50, %v1689_v62  ;;  %v5550_v23 = vadd.f32 %v1431_v61, %v1191_v39  ;;  %v1411_v18 = vpop.permute.xlu0 %1410  ;;  %v7521_v34 = vld [vmem:[#allocation9_spill] sm:$0xff]  ;;  %v7526_v39 = vld [vmem:[#allocation63_spill] sm:$0xff] }
 0x256   :  { %3005 = vtanh.f32 %v1496_v46  ;;  %v1501_v27 = vadd.f32 %v1391_v55, %v1181_v58  ;;  %v1629_v1 = vadd.f32 %v5516_v5, %v1628_v13  ;;  %v1690_v14 = vmul.f32 %v5534_v60, %v5534_v60  ;;  %v7529_v43 = vld [vmem:[#allocation111_spill] sm:$0xff] }
 0x257   :  { %3007 = vtanh.f32 %v1499_v40  ;;  %v5555_v21 = vadd.f32 %v1411_v18, %v1186_v32  ;;  %v7522_v44 = vsub.f32 %v7521_v34, %v4158_v35  ;;  %v1691_v3 = vmul.f32 %v5523_v4, %v5523_v4  ;;  %v7532_v34 = vld [vmem:[#allocation114_spill] sm:$0xff] }
 0x258   :  { %v1693_v58 = vmul.f32 %v5542_v41, %v5542_v41  ;;  %3009 = vtanh.f32 %v1498_v7  ;;  %v1630_v46 = vadd.f32 %v5534_v60, %v1629_v1  ;;  %v1763_v50 = vadd.f32 %v1762_v6, %v1688_v29  ;;  %v7528_v6 = vld [vmem:[#allocation108_spill] sm:$0xff] }
 0x259   :  { %v865_v37 = vmul.f32 %v7522_v44, %v4752_v45  ;;  %v1600_v52 = vadd.f32 %v5523_v4, %v1599_v56  ;;  %3011 = vtanh.f32 %v1501_v27  ;;  %v7524_v13 = vsub.f32 %v7523_v38, %v4158_v35 }
 0x25a   :  { %v5567_v32 = vpop.eup %3001  ;;  %v7525_v19 = vsub.f32 %v7300_v31, %v4158_v35  ;;  %v7527_v62 = vsub.f32 %v7526_v39, %v4158_v35  ;;  %v1734_v54 = vadd.f32 %v1733_v15, %v1691_v3  ;;  %v1182_v56 = vmul.f32 %v7528_v6, %v5349_v9  ;;  %v5590_v31 = vld [vmem:[%s6895_s1 + $0xe8] sm:$0xff]  ;;  %v7531_v15 = vld [vmem:[#allocation99_spill] sm:$0xff]  ;;  %v7533_v3 = vld [vmem:[#allocation117_spill] sm:$0xff] }
 0x25b   :  { %v864_v40 = vmul.f32 %v7524_v13, %v4752_v45  ;;  %v5581_v29 = vpop.eup %3003  ;;  %v1185_v61 = vmul.f32 %v7529_v43, %v865_v37  ;;  %v1764_v55 = vadd.f32 %v1763_v50, %v1690_v14  ;;  %v1601_v27 = vadd.f32 %v5542_v41, %v1600_v52  ;;  %7530 = vst [vmem:[#allocation32_spill] sm:$0xff] %v5590_v31  ;;  %v5601_v14 = vld [vmem:[%s6895_s1 + $0xe0] sm:$0xff]  ;;  %v7535_v43 = vld [vmem:[#allocation56_spill] sm:$0xff] }
 0x25c   :  { %v869_v33 = vmul.f32 %v7525_v19, %v4752_v45  ;;  %v874_v7 = vmul.f32 %v7527_v62, %v4752_v45  ;;  %2043 = vperm.xlu2 %2775, %v5590_v31   ;;  %v5593_v18 = vpop.eup %3005  ;;  %v1735_v38 = vadd.f32 %v1734_v54, %v1693_v58  ;;  %7534 = vst [vmem:[#allocation27_spill] sm:$0xff] %v5601_v14  ;;  %v3129_v58 = vld [vmem:[%s6895_s1 + $0x120] sm:$0xff]  ;;  %v1443_v19 = vpop.permute.xlu2 %1442  ;;  %3013 = vtanh.f32 %v5445_v48 }
 0x25d   :  { %v1184_v1 = vmul.f32 %v7531_v15, %v864_v40  ;;  %2039 = vperm.xlu1 %2777, %v5601_v14   ;;  %v5604_v37 = vpop.eup %3007  ;;  %v1692_v50 = vmul.f32 %v5567_v32, %v5567_v32  ;;  %v1502_v52 = vadd.f32 %v5367_v26, %v1182_v56  ;;  %v1631_v13 = vadd.f32 %v5567_v32, %v1630_v46  ;;  %v1423_v46 = vpop.permute.xlu0 %1422 }
 0x25e   :  { %v1189_v44 = vmul.f32 %v7532_v34, %v869_v33  ;;  %v1194_v9 = vmul.f32 %v7533_v3, %v874_v7  ;;  %v1505_v40 = vadd.f32 %v5434_v51, %v1185_v61  ;;  %2071 = vperm.xlu0 %2776, %v3129_v58   ;;  %v1403_v33 = vpop.permute.xlu1 %1402  ;;  %v5614_v39 = vpop.eup %3009  ;;  %v1695_v62 = vmul.f32 %v5581_v29, %v5581_v29  ;;  %v7537_v34 = vld [vmem:[#allocation62_spill] sm:$0xff] }
 0x25f   :  { %v1504_v26 = vadd.f32 %v1403_v33, %v1184_v1  ;;  %v5621_v54 = vpop.eup %3011  ;;  %v1765_v51 = vadd.f32 %v1764_v55, %v1692_v50  ;;  %v1602_v6 = vadd.f32 %v5581_v29, %v1601_v27  ;;  %3015 = vtanh.f32 %v5499_v63 }
 0x260   :  { %v5619_v7 = vadd.f32 %v1443_v19, %v1194_v9  ;;  %v1509_v56 = vadd.f32 %v1423_v46, %v1189_v44  ;;  %v7536_v61 = vsub.f32 %v7535_v43, %v4158_v35  ;;  %v808_v48 = vsub.f32 %v7537_v34, %v4158_v35  ;;  %v7539_v19 = vld [vmem:[#allocation103_spill] sm:$0xff]  ;;  %v7541_v46 = vld [vmem:[#allocation116_spill] sm:$0xff] }
 0x261   :  { %v1736_v3 = vadd.f32 %v1735_v38, %v1695_v62  ;;  %v1694_v1 = vmul.f32 %v5593_v18, %v5593_v18  ;;  %3017 = vtanh.f32 %v1502_v52  ;;  %v1632_v55 = vadd.f32 %v5593_v18, %v1631_v13  ;;  %v5646_v13 = vld [vmem:[%s6895_s1 + $0x100] sm:$0xff] }
 0x262   :  { %v867_v15 = vmul.f32 %v7536_v61, %v4752_v45  ;;  %v1696_v27 = vmul.f32 %v5614_v39, %v5614_v39  ;;  %v872_v63 = vmul.f32 %v808_v48, %v4752_v45  ;;  %v1697_v44 = vmul.f32 %v5604_v37, %v5604_v37  ;;  %7538 = vst [vmem:[#allocation119_spill] sm:$0xff] %v5646_v13  ;;  %v5649_v58 = vpop.eup %3013  ;;  %v5665_v61 = vld [vmem:[%s6895_s1 + $0x138] sm:$0xff] }
 0x263   :  { %v1699_v9 = vmul.f32 %v5621_v54, %v5621_v54  ;;  %3019 = vtanh.f32 %v1504_v26  ;;  %v1633_v38 = vadd.f32 %v5614_v39, %v1632_v55  ;;  %v1766_v50 = vadd.f32 %v1765_v51, %v1694_v1  ;;  %7542 = vst [vmem:[#allocation35_spill] sm:$0xff] %v5665_v61 }
 0x264   :  { %3021 = vtanh.f32 %v1505_v40  ;;  %v1603_v52 = vadd.f32 %v5604_v37, %v1602_v6  ;;  %2055 = vperm.xlu2 %2775, %v5646_v13   ;;  %v1187_v33 = vmul.f32 %v7539_v19, %v867_v15  ;;  %v1737_v62 = vadd.f32 %v1736_v3, %v1697_v44  ;;  %v5655_v40 = vld [vmem:[%s6895_s1 + $0xf8] sm:$0xff]  ;;  %v5668_v34 = vpop.permute.xlu2 %1927 }
 0x265   :  { %7540 = vst [vmem:[#allocation31_spill] sm:$0xff] %v5655_v40  ;;  %2051 = vperm.xlu1 %2777, %v5655_v40   ;;  %v5658_v26 = vpop.eup %3015  ;;  %v1192_v51 = vmul.f32 %v7541_v46, %v872_v63  ;;  %v1767_v6 = vadd.f32 %v1766_v50, %v1696_v27  ;;  %3023 = vtanh.f32 %v5555_v21  ;;  %v1435_v1 = vpop.permute.xlu0 %1434  ;;  %v1698_v27 = vmul.f32 %v5649_v58, %v5649_v58  ;;  %v7546_v21 = vld [vmem:[#allocation20_spill] sm:$0xff]  ;;  %v7547_v46 = vld [vmem:[#allocation59_spill] sm:$0xff] }
 0x266   :  { %v1604_v43 = vadd.f32 %v5621_v54, %v1603_v52  ;;  %2083 = vperm.xlu0 %2776, %v5665_v61   ;;  %v1415_v15 = vpop.permute.xlu1 %1414  ;;  %7543 = vst [vmem:[#allocation126_spill] sm:$0xff] %v5668_v34  ;;  %v1738_v48 = vadd.f32 %v1737_v62, %v1699_v9  ;;  %v1634_v63 = vadd.f32 %v5649_v58, %v1633_v38  ;;  %3025 = vtanh.f32 %v1509_v56 }
 0x267   :  { %v1507_v3 = vadd.f32 %v1415_v15, %v1187_v33  ;;  %v5671_v55 = vpop.eup %3017  ;;  %v1512_v44 = vadd.f32 %v1435_v1, %v1192_v51  ;;  %v1701_v52 = vmul.f32 %v5658_v26, %v5658_v26  ;;  %v811_v19 = vsub.f32 %v7546_v21, %v4158_v35 }
 0x268   :  { %v1768_v33 = vadd.f32 %v1767_v6, %v1698_v27  ;;  %v1605_v62 = vadd.f32 %v5658_v26, %v1604_v43  ;;  %v7548_v38 = vsub.f32 %v7547_v46, %v4158_v35  ;;  %v1700_v1 = vmul.f32 %v5671_v55, %v5671_v55  ;;  %v5698_v6 = vld [vmem:[%s6895_s1 + $0x118] sm:$0xff] }
 0x269   :  { %v5676_v50 = vpop.eup %3019  ;;  %3027 = vtanh.f32 %v1507_v3  ;;  %v1739_v51 = vadd.f32 %v1738_v48, %v1701_v52  ;;  %v875_v15 = vmul.f32 %v811_v19, %v4752_v45  ;;  %v1635_v3 = vadd.f32 %v5671_v55, %v1634_v63  ;;  %7549 = vst [vmem:[#allocation120_spill] sm:$0xff] %v5698_v6  ;;  %v7550_v48 = vld [vmem:[#allocation106_spill] sm:$0xff]  ;;  %v5710_v63 = vld [vmem:[%s6895_s1 + $0x110] sm:$0xff] }
 0x26a   :  { %7544 = vst [vmem:[#allocation30_spill] sm:$0xff] %v5676_v50  ;;  %v5680_v9 = vpop.eup %3021  ;;  %v870_v56 = vmul.f32 %v7548_v38, %v4752_v45  ;;  %v1702_v13 = vmul.f32 %v5676_v50, %v5676_v50  ;;  %3029 = vtanh.f32 %v5495_v24  ;;  %v7552_v19 = vld [vmem:[#allocation118_spill] sm:$0xff]  ;;  %v1769_v61 = vadd.f32 %v1768_v33, %v1700_v1  ;;  %v5721_v24 = vld [vmem:[%s6895_s1 + $0x150] sm:$0xff] }
 0x26b   :  { %7545 = vst [vmem:[#allocation34_spill] sm:$0xff] %v5680_v9  ;;  %v5701_v43 = vpop.eup %3023  ;;  %v1703_v52 = vmul.f32 %v5680_v9, %v5680_v9  ;;  %v1195_v46 = vmul.f32 %v7552_v19, %v875_v15  ;;  %v1636_v38 = vadd.f32 %v5676_v50, %v1635_v3  ;;  %3031 = vtanh.f32 %v1512_v44 }
 0x26c   :  { %2067 = vperm.xlu2 %2775, %v5698_v6   ;;  %v1190_v27 = vmul.f32 %v7550_v48, %v870_v56  ;;  %7551 = vst [vmem:[#allocation36_spill] sm:$0xff] %v5710_v63  ;;  %v5713_v21 = vpop.eup %3025  ;;  %v1606_v56 = vadd.f32 %v5680_v9, %v1605_v62  ;;  %v5724_v6 = vpop.permute.xlu2 %1939  ;;  %v1770_v3 = vadd.f32 %v1769_v61, %v1702_v13  ;;  %v7556_v13 = vld [vmem:[#allocation61_spill] sm:$0xff] }
 0x26d   :  { %2063 = vperm.xlu1 %2777, %v5710_v63   ;;  %7553 = vst [vmem:[#allocation129_spill] sm:$0xff] %v5721_v24  ;;  %v1740_v34 = vadd.f32 %v1739_v51, %v1703_v52  ;;  %v1447_v19 = vpop.permute.xlu0 %1446  ;;  %v1704_v14 = vmul.f32 %v5701_v43, %v5701_v43  ;;  %v1707_v31 = vmul.f32 %v5713_v21, %v5713_v21 }
 0x26e   :  { %2095 = vperm.xlu0 %2776, %v5721_v24   ;;  %v1427_v48 = vpop.permute.xlu1 %1426  ;;  %7554 = vst [vmem:[#allocation71_spill] sm:$0xff] %v5724_v6  ;;  %v1515_v1 = vadd.f32 %v1447_v19, %v1195_v46  ;;  %v1637_v24 = vadd.f32 %v5701_v43, %v1636_v38  ;;  %v7557_v61 = vsub.f32 %v7556_v13, %v4158_v35  ;;  %v5756_v19 = vld [vmem:[%s6895_s1 + $0x128] sm:$0xff]  ;;  %v7615_v6 = vld [vmem:[#allocation18_spill] sm:$0xff] }
 0x26f   :  { %v5726_v63 = vpop.eup %3027  ;;  %v1510_v15 = vadd.f32 %v1427_v48, %v1190_v27  ;;  %v1771_v46 = vadd.f32 %v1770_v3, %v1704_v14  ;;  %v5746_v48 = vld [vmem:[%s6895_s1 + $0x130] sm:$0xff]  ;;  %7560 = vst [vmem:[#allocation91_spill] sm:$0xff] %v5756_v19  ;;  %v5765_v3 = vld [vmem:[%s6895_s1 + $0x168] sm:$0xff] }
 0x270   :  { %v1607_v33 = vadd.f32 %v5726_v63, %v1606_v56  ;;  %v1705_v62 = vmul.f32 %v5726_v63, %v5726_v63  ;;  %v5737_v27 = vpop.eup %3029  ;;  %v873_v52 = vmul.f32 %v7557_v61, %v4752_v45  ;;  %7558 = vst [vmem:[#allocation124_spill] sm:$0xff] %v5746_v48 }
 0x271   :  { %3033 = vtanh.f32 %v1510_v15  ;;  %7555 = vst [vmem:[#allocation39_spill] sm:$0xff] %v5737_v27  ;;  %v5749_v38 = vpop.eup %3031  ;;  %v7559_v15 = vld [vmem:[#allocation109_spill] sm:$0xff]  ;;  %v1638_v14 = vadd.f32 %v5737_v27, %v1637_v24 }
 0x272   :  { %v1608_v44 = vadd.f32 %v5713_v21, %v1607_v33  ;;  %v1741_v51 = vadd.f32 %v1740_v34, %v1705_v62  ;;  %v1193_v34 = vmul.f32 %v7559_v15, %v873_v52  ;;  %3035 = vtanh.f32 %v5550_v23  ;;  %7561 = vst [vmem:[#allocation33_spill] sm:$0xff] %v5765_v3 }
 0x273   :  { %3037 = vtanh.f32 %v1515_v1  ;;  %v1710_v15 = vmul.f32 %v5749_v38, %v5749_v38  ;;  %v5789_v1 = vld [vmem:[%s6895_s1 + $0x148] sm:$0xff] }
 0x274   :  { %v1742_v56 = vadd.f32 %v1741_v51, %v1707_v31  ;;  %2079 = vperm.xlu2 %2775, %v5746_v48   ;;  %v1706_v31 = vmul.f32 %v5737_v27, %v5737_v27  ;;  %v5768_v33 = vpop.permute.xlu2 %1947  ;;  %7567 = vst [vmem:[#allocation69_spill] sm:$0xff] %v5789_v1 }
 0x275   :  { %2075 = vperm.xlu1 %2777, %v5756_v19   ;;  %7562 = vst [vmem:[#allocation127_spill] sm:$0xff] %v5768_v33  ;;  %v5775_v24 = vpop.permute.xlu0 %1931  ;;  %v7642_v9 = vld [vmem:[#allocation71_spill] sm:$0xff] }
 0x276   :  { %2107 = vperm.xlu0 %2776, %v5765_v3   ;;  %v1439_v23 = vpop.permute.xlu1 %1438  ;;  %v1772_v52 = vadd.f32 %v1771_v46, %v1706_v31  ;;  %7563 = vst [vmem:[#allocation67_spill] sm:$0xff] %v5775_v24  ;;  %v7568_v46 = vld [vmem:[#allocation17_spill] sm:$0xff]  ;;  %v5975_v24 = vld [vmem:[%s6895_s1 + $0x1c0] sm:$0xff] }
 0x277   :  { %v5770_v62 = vpop.eup %3033  ;;  %v1513_v51 = vadd.f32 %v1439_v23, %v1193_v34  ;;  %v7565_v34 = vld [vmem:[#allocation15_spill] sm:$0xff]  ;;  %7616 = vst [vmem:[#allocation81_spill] sm:$0xff] %v5975_v24 }
 0x278   :  { %v1639_v13 = vadd.f32 %v5770_v62, %v1638_v14  ;;  %v1708_v61 = vmul.f32 %v5770_v62, %v5770_v62  ;;  %v5780_v3 = vpop.eup %3035  ;;  %v7566_v14 = vsub.f32 %v7565_v34, %v4158_v35 }
 0x279   :  { %3039 = vtanh.f32 %v1513_v51  ;;  %7564 = vst [vmem:[#allocation121_spill] sm:$0xff] %v5780_v3  ;;  %v5797_v51 = vld [vmem:[%s6895_s1 + $0x140] sm:$0xff]  ;;  %v5800_v35 = vpop.eup %3037 }
 0x27a   :  { %v1640_v19 = vadd.f32 %v5749_v38, %v1639_v13  ;;  %v1773_v48 = vadd.f32 %v1772_v52, %v1708_v61  ;;  %v876_v23 = vmul.f32 %v7566_v14, %v4752_v45  ;;  %3041 = vtanh.f32 %v5619_v7  ;;  %7569 = vst [vmem:[#allocation123_spill] sm:$0xff] %v5797_v51  ;;  %v5808_v13 = vld [vmem:[%s6895_s1 + $0x180] sm:$0xff] }
 0x27b   :  { %7570 = vst [vmem:[#allocation70_spill] sm:$0xff] %v5800_v35  ;;  %v1709_v45 = vmul.f32 %v5780_v3, %v5780_v3 }
 0x27c   :  { %v1774_v40 = vadd.f32 %v1773_v48, %v1710_v15  ;;  %2091 = vperm.xlu2 %2775, %v5789_v1   ;;  %v1196_v31 = vmul.f32 %v7568_v46, %v876_v23  ;;  %v1609_v48 = vadd.f32 %v5780_v3, %v1608_v44  ;;  %7571 = vst [vmem:[#allocation76_spill] sm:$0xff] %v5808_v13  ;;  %v5811_v61 = vpop.permute.xlu2 %1959  ;;  %v7636_v3 = vld [vmem:[#allocation42_spill] sm:$0xff] }
 0x27d   :  { %2087 = vperm.xlu1 %2777, %v5797_v51   ;;  %7572 = vst [vmem:[#allocation78_spill] sm:$0xff] %v5811_v61  ;;  %v1743_v23 = vadd.f32 %v1742_v56, %v1709_v45  ;;  %v5818_v44 = vpop.permute.xlu0 %1951  ;;  %v1713_v46 = vmul.f32 %v5800_v35, %v5800_v35  ;;  %v5834_v56 = vld [vmem:[%s6895_s1 + $0x158] sm:$0xff] }
 0x27e   :  { %2119 = vperm.xlu0 %2776, %v5808_v13   ;;  %v1451_v7 = vpop.permute.xlu1 %1450  ;;  %7574 = vst [vmem:[#allocation95_spill] sm:$0xff] %v5818_v44 }
 0x27f   :  { %v5813_v52 = vpop.eup %3039  ;;  %v1516_v15 = vadd.f32 %v1451_v7, %v1196_v31  ;;  %v5828_v31 = vld [vmem:[%s6895_s1 + $0x160] sm:$0xff]  ;;  %7577 = vst [vmem:[#allocation48_spill] sm:$0xff] %v5834_v56 }
 0x280   :  { %7573 = vst [vmem:[#allocation72_spill] sm:$0xff] %v5813_v52  ;;  %v1610_v34 = vadd.f32 %v5813_v52, %v1609_v48  ;;  %v1711_v14 = vmul.f32 %v5813_v52, %v5813_v52  ;;  %v5823_v1 = vpop.eup %3041 }
 0x281   :  { %3043 = vtanh.f32 %v1516_v15  ;;  %7575 = vst [vmem:[#allocation130_spill] sm:$0xff] %v5823_v1  ;;  %v1712_v45 = vmul.f32 %v5823_v1, %v5823_v1  ;;  %v1641_v48 = vadd.f32 %v5823_v1, %v1640_v19  ;;  %v7614_v1 = vld [vmem:[#allocation64_spill] sm:$0xff] }
 0x282   :  { %v1611_v13 = vadd.f32 %v5800_v35, %v1610_v34  ;;  %v1744_v51 = vadd.f32 %v1743_v23, %v1711_v14  ;;  %7576 = vst [vmem:[#allocation43_spill] sm:$0xff] %v5828_v31 }
 0x284   :  { %v1745_v2 = vadd.f32 %v1744_v51, %v1713_v46  ;;  %2103 = vperm.xlu2 %2775, %v5828_v31   ;;  %v5843_v51 = vld [vmem:[%s6895_s1 + $0x198] sm:$0xff]  ;;  %v5846_v7 = vpop.permute.xlu2 %1971  ;;  %v1775_v46 = vadd.f32 %v1774_v40, %v1712_v45 }
 0x285   :  { %2099 = vperm.xlu1 %2777, %v5834_v56   ;;  %7578 = vst [vmem:[#allocation40_spill] sm:$0xff] %v5843_v51  ;;  %v5855_v19 = vpop.permute.xlu0 %1963  ;;  %v7638_v27 = vld [vmem:[#allocation78_spill] sm:$0xff] }
 0x286   :  { %2131 = vperm.xlu0 %2776, %v5843_v51   ;;  %7579 = vst [vmem:[#allocation44_spill] sm:$0xff] %v5846_v7  ;;  %v5850_v34 = vpop.permute.xlu1 %1935  ;;  %v5860_v51 = vld [vmem:[%s6895_s1 + $0x178] sm:$0xff]  ;;  %v7607_v7 = vld [vmem:[#allocation7_spill] sm:$0xff] }
 0x287   :  { %v5848_v15 = vpop.eup %3043  ;;  %7581 = vst [vmem:[#allocation51_spill] sm:$0xff] %v5850_v34  ;;  %v7623_v34 = vld [vmem:[#allocation73_spill] sm:$0xff] }
 0x288   :  { %7580 = vst [vmem:[#allocation125_spill] sm:$0xff] %v5848_v15  ;;  %v1642_v14 = vadd.f32 %v5848_v15, %v1641_v48  ;;  %v1714_v23 = vmul.f32 %v5848_v15, %v5848_v15  ;;  %v5866_v48 = vld [vmem:[%s6895_s1 + $0x170] sm:$0xff] }
 0x289   :  { %7582 = vst [vmem:[#allocation82_spill] sm:$0xff] %v5855_v19 }
 0x28a   :  { %v1643_v56 = vadd.f32 %v1642_v14, %v1611_v13  ;;  %v1776_v31 = vadd.f32 %v1775_v46, %v1714_v23  ;;  %7583 = vst [vmem:[#allocation46_spill] sm:$0xff] %v5860_v51 }
 0x28b   :  { %7584 = vst [vmem:[#allocation128_spill] sm:$0xff] %v5866_v48 }
 0x28c   :  { %v1644_v33 = vrot.slane %v1643_v56, 4  ;;  %v1777_v44 = vadd.f32 %v1776_v31, %v1745_v2  ;;  %2115 = vperm.xlu2 %2775, %v5860_v51   ;;  %v5872_v2 = vld [vmem:[%s6895_s1 + $0x1b0] sm:$0xff]  ;;  %v5875_v13 = vpop.permute.xlu2 %1983 }
 0x28d   :  { %2111 = vperm.xlu1 %2777, %v5866_v48   ;;  %7585 = vst [vmem:[#allocation84_spill] sm:$0xff] %v5872_v2  ;;  %v5879_v46 = vpop.permute.xlu0 %1975 }
 0x28e   :  { %v1645_v40 = vadd.f32 %v1644_v33, %v1643_v56  ;;  %v1778_v45 = vrot.slane %v1777_v44, 4  ;;  %2143 = vperm.xlu0 %2776, %v5872_v2   ;;  %7586 = vst [vmem:[#allocation47_spill] sm:$0xff] %v5875_v13  ;;  %v5877_v31 = vpop.permute.xlu1 %1943  ;;  %v5884_v56 = vld [vmem:[%s6895_s1 + $0x190] sm:$0xff]  ;;  %v5890_v2 = vld [vmem:[%s6895_s1 + $0x188] sm:$0xff]  ;;  %v5997_v13 = vld [vmem:[%s6895_s1 + $0x1f8] sm:$0xff] }
 0x28f   :  { %7587 = vst [vmem:[#allocation45_spill] sm:$0xff] %v5877_v31 }
 0x290   :  { %v1646_v14 = vrot.slane %v1645_v40, 2  ;;  %v1779_v23 = vadd.f32 %v1778_v45, %v1777_v44  ;;  %7588 = vst [vmem:[#allocation75_spill] sm:$0xff] %v5879_v46 }
 0x291   :  { %7589 = vst [vmem:[#allocation52_spill] sm:$0xff] %v5884_v56 }
 0x292   :  { %v1647_v51 = vadd.f32 %v1646_v14, %v1645_v40  ;;  %v1780_v19 = vrot.slane %v1779_v23, 2  ;;  %7590 = vst [vmem:[#allocation8_spill] sm:$0xff] %v5890_v2 }
 0x293   :  { %7619 = vst [vmem:[#allocation83_spill] sm:$0xff] %v5997_v13 }
 0x294   :  { %v1648_v48 = vrot.slane %v1647_v51, 1  ;;  %v1781_v33 = vadd.f32 %v1780_v19, %v1779_v23  ;;  %2127 = vperm.xlu2 %2775, %v5884_v56   ;;  %v5896_v19 = vld [vmem:[%s6895_s1 + $0x1c8] sm:$0xff]  ;;  %v5899_v40 = vpop.permute.xlu2 %1995 }
 0x295   :  { %2123 = vperm.xlu1 %2777, %v5890_v2   ;;  %7591 = vst [vmem:[#allocation5_spill] sm:$0xff] %v5896_v19  ;;  %v5905_v46 = vpop.permute.xlu0 %1987  ;;  %v5912_v2 = vld [vmem:[%s6895_s1 + $0x1a8] sm:$0xff] }
 0x296   :  { %v1649_v44 = vadd.f32 %v1648_v48, %v1647_v51  ;;  %v1782_v45 = vrot.slane %v1781_v33, 1  ;;  %2155 = vperm.xlu0 %2776, %v5896_v19   ;;  %7592 = vst [vmem:[#allocation50_spill] sm:$0xff] %v5899_v40  ;;  %v5901_v14 = vpop.permute.xlu1 %1955  ;;  %v7611_v40 = vld [vmem:[#allocation22_spill] sm:$0xff] }
 0x297   :  { %7593 = vst [vmem:[#allocation88_spill] sm:$0xff] %v5901_v14  ;;  %v7610_v14 = vld [vmem:[#allocation66_spill] sm:$0xff] }
 0x298   :  { %v5903_v23 = vmul.f32 0.001953125, %v1649_v44  ;;  %v1783_v56 = vadd.f32 %v1782_v45, %v1781_v33  ;;  %7594 = vst [vmem:[#allocation77_spill] sm:$0xff] %v5905_v46  ;;  %v5918_v44 = vld [vmem:[%s6895_s1 + $0x1a0] sm:$0xff]  ;;  %v5983_v19 = vld [vmem:[%s6895_s1 + $0x1b8] sm:$0xff] }
 0x299   :  { %7595 = vst [vmem:[#allocation37_spill] sm:$0xff] %v5912_v2 }
 0x29a   :  { %v1784_v31 = vmul.f32 0.001953125, %v1783_v56  ;;  %v1785_v51 = vmul.f32 %v5903_v23, %v5903_v23  ;;  %7596 = vst [vmem:[#allocation90_spill] sm:$0xff] %v5918_v44  ;;  %v7628_v57 = vsub.f32 %v4933_v12, %v5903_v23 }
 0x29b   :  { %7617 = vst [vmem:[#allocation87_spill] sm:$0xff] %v5983_v19 }
 0x29c   :  { %v1786_v48 = vsub.f32 %v1784_v31, %v1785_v51  ;;  %2139 = vperm.xlu2 %2775, %v5912_v2   ;;  %v5926_v31 = vld [vmem:[%s6895_s1 + $0x1e0] sm:$0xff]  ;;  %v5929_v56 = vpop.permute.xlu2 %2007  ;;  %v7601_v2 = vld [vmem:[#allocation49_spill] sm:$0xff]  ;;  %v7612_v51 = vld [vmem:[#allocation10_spill] sm:$0xff] }
 0x29d   :  { %2135 = vperm.xlu1 %2777, %v5918_v44   ;;  %7597 = vst [vmem:[#allocation11_spill] sm:$0xff] %v5926_v31  ;;  %v7600_v44 = vld [vmem:[#allocation60_spill] sm:$0xff]  ;;  %v5940_v46 = vpop.permute.xlu0 %1999 }
 0x29e   :  { %v5921_v33 = vadd.f32 1e-05, %v1786_v48  ;;  %2167 = vperm.xlu0 %2776, %v5926_v31   ;;  %7598 = vst [vmem:[#allocation102_spill] sm:$0xff] %v5929_v56  ;;  %v5931_v45 = vpop.permute.xlu1 %1967  ;;  %v7603_v56 = vld [vmem:[#allocation65_spill] sm:$0xff]  ;;  %v7613_v48 = vld [vmem:[#allocation19_spill] sm:$0xff] }
 0x29f   :  { %7599 = vst [vmem:[#allocation41_spill] sm:$0xff] %v5931_v45  ;;  %v7604_v45 = vld [vmem:[#allocation54_spill] sm:$0xff]  ;;  %v6070_v31 = vld [vmem:[%s6895_s1 + $0x1d0] sm:$0xff] }
 0x2a0   :  { %3045 = vrsqrt.f32 %v5921_v33  ;;  %7602 = vst [vmem:[#allocation53_spill] sm:$0xff] %v5940_v46  ;;  %v7618_v46 = vld [vmem:[#allocation16_spill] sm:$0xff]  ;;  %vm1794_vm3 = vweird.f32 %v5921_v33  ;;  %v7633_v12 = vsub.f32 %v7604_v45, %v5903_v23  ;;  %v6169_v45 = vld [vmem:[%s6895_s1 + $0x1f0] sm:$0xff] }
 0x2a1   :  { %7626 = vst [vmem:[#allocation74_spill] sm:$0xff] %v6070_v31 }
 0x2a2   :  { %7644 = vst [vmem:[#allocation107_spill] sm:$0xff] %v6169_v45 }
 0x2a4   :  { %2151 = vperm.xlu2 %2775, %v5975_v24   ;;  %v6000_v30 = vpop.permute.xlu2 %2019 }
 0x2a5   :  { %2147 = vperm.xlu1 %2777, %v5983_v19   ;;  %7620 = vst [vmem:[#allocation89_spill] sm:$0xff] %v6000_v30  ;;  %v7621_v19 = vld [vmem:[#allocation23_spill] sm:$0xff]  ;;  %v6021_v61 = vpop.permute.xlu0 %2011  ;;  %v7102_v30 = vmov 4  }
 0x2a6   :  { %v5992_v24 = vpop.eup %3045  ;;  %2179 = vperm.xlu0 %2776, %v5997_v13   ;;  %v6013_v13 = vpop.permute.xlu1 %1979 }
 0x2a7   :  { %v1789_v47 = vmul.f32 %v5992_v24, %v5921_v33  ;;  %7622 = vst [vmem:[#allocation6_spill] sm:$0xff] %v6013_v13  ;;  %v6055_v13 = vld [vmem:[%s6895_s1 + $0x1d8] sm:$0xff]  ;;  %vm1795_vm4 = vweird.f32 %v5992_v24 }
 0x2a8   :  { %7625 = vst [vmem:[#allocation57_spill] sm:$0xff] %v6055_v13  ;;  %vm1796_vm5 = vmor %vm1794_vm3, %vm1795_vm4 }
 0x2a9   :  { %v1790_v22 = vmul.f32 %v5992_v24, %v1789_v47  ;;  %v7627_v47 = vsub.f32 %v7603_v56, %v5903_v23  ;;  %v7632_v56 = vsub.f32 %v5036_v20, %v5903_v23  ;;  %v7640_v20 = vld [vmem:[#allocation67_spill] sm:$0xff] }
 0x2ab   :  { %v1791_v50 = vmul.f32 0.5, %v1790_v22  ;;  %v3159_v22 = vld [vmem:[%s6895_s1 + $0x10] sm:$0xff] }
 0x2ac   :  { %2163 = vperm.xlu2 %2775, %v6055_v13   ;;  %v6078_v10 = vpop.permute.xlu2 %2031 }
 0x2ad   :  { %v1792_v16 = vsub.f32 1.5, %v1791_v50  ;;  %2159 = vperm.xlu1 %2777, %v6070_v31  }
 0x2ae   :  { %2780 = vset.pattern.permute.xlu0 %v7102_v30  ;;  %v6092_v30 = vpop.permute.xlu1 %1991 }
 0x2af   :  { %v1793_v13 = vmul.f32 %v5992_v24, %v1792_v16  ;;  %2255 = vperm.xlu0 %2780, %v3159_v22   ;;  %v6104_v16 = vpop.permute.xlu0 %2023  ;;  %v7631_v22 = vsub.f32 %v7601_v2, %v5903_v23  ;;  %v7637_v2 = vsub.f32 %v7636_v3, %v5903_v23  ;;  %v7660_v3 = vsub.f32 %v7610_v14, %v5903_v23 }
 0x2b0   :  { %v7664_v14 = vsub.f32 %v5256_v25, %v5903_v23 }
 0x2b1   :  { %v6115_v31 = vsel %vm1796_vm5, %v5992_v24, %v1793_v13  ;;  %v7630_v13 = vsub.f32 %v7600_v44, %v5903_v23 }
 0x2b2   :  { %v1870_v50 = vmul.f32 %v7627_v47, %v6115_v31  ;;  %v6131_v24 = vmul.f32 %v7628_v57, %v6115_v31  ;;  %v1865_v15 = vmul.f32 %v7631_v22, %v6115_v31  ;;  %v1867_v47 = vmul.f32 %v7632_v56, %v6115_v31 }
 0x2b3   :  { %v1863_v33 = vmul.f32 %v7630_v13, %v6115_v31  ;;  %v1868_v57 = vmul.f32 %v7633_v12, %v6115_v31  ;;  %v1864_v22 = vmul.f32 %v7637_v2, %v6115_v31  ;;  %v7646_v12 = vld [vmem:[#allocation95_spill] sm:$0xff] }
 0x2b4   :  { %7629 = vst [vmem:[#allocation58_spill] sm:$0xff] %v6131_v24  ;;  %v7634_v24 = vld [vmem:[#allocation13_spill] sm:$0xff]  ;;  %v6158_v52 = vmul.f32 %v7638_v27, %v1870_v50  ;;  %v6164_v35 = vmul.f32 %v7642_v9, %v1865_v15  ;;  %2175 = vperm.xlu2 %2775, %v6169_v45   ;;  %v7648_v27 = vld [vmem:[#allocation127_spill] sm:$0xff] }
 0x2b5   :  { %v7635_v44 = vsub.f32 %v7634_v24, %v5903_v23  ;;  %v6161_v56 = vmul.f32 %v7640_v20, %v1863_v33  ;;  %v6178_v50 = vmul.f32 %v7648_v27, %v1867_v47  ;;  %v7650_v33 = vld [vmem:[#allocation44_spill] sm:$0xff]  ;;  %v7652_v9 = vld [vmem:[#allocation51_spill] sm:$0xff] }
 0x2b6   :  { %7639 = vst [vmem:[#allocation80_spill] sm:$0xff] %v6158_v52  ;;  %v6184_v15 = vmul.f32 %v7652_v9, %v1864_v22  ;;  %v6189_v20 = vld [vmem:[%s6895_s1 + $0x1e8] sm:$0xff]  ;;  %v7656_v47 = vld [vmem:[#allocation79_spill] sm:$0xff]  ;;  %v7658_v22 = vld [vmem:[#allocation38_spill] sm:$0xff] }
 0x2b7   :  { %v1873_v13 = vmul.f32 %v7635_v44, %v6115_v31  ;;  %7641 = vst [vmem:[#allocation93_spill] sm:$0xff] %v6161_v56  ;;  %v6175_v44 = vmul.f32 %v7646_v12, %v1868_v57  ;;  %2171 = vperm.xlu1 %2777, %v6189_v20   ;;  %v7655_v57 = vsub.f32 %v7607_v7, %v5903_v23  ;;  %v7665_v52 = vld [vmem:[#allocation82_spill] sm:$0xff]  ;;  %v2036_v25 = vpop.permute.xlu0 %2035 }
 0x2b8   :  { %7643 = vst [vmem:[#allocation97_spill] sm:$0xff] %v6164_v35  ;;  %v1874_v35 = vmul.f32 %v7660_v3, %v6115_v31  ;;  %v7661_v7 = vsub.f32 %v7611_v40, %v5903_v23  ;;  %v1882_v3 = vmul.f32 %v7664_v14, %v6115_v31  ;;  %v3162_v40 = vld [vmem:[%s6895_s1 + $0x38] sm:$0xff] }
 0x2b9   :  { %7647 = vst [vmem:[#allocation14_spill] sm:$0xff] %v6175_v44  ;;  %v6181_v2 = vmul.f32 %v7650_v33, %v1873_v13  ;;  %v1871_v12 = vmul.f32 %v7655_v57, %v6115_v31  ;;  %v7657_v13 = vsub.f32 %v7656_v47, %v5903_v23  ;;  %v7659_v33 = vsub.f32 %v7658_v22, %v5903_v23  ;;  %v7668_v44 = vld [vmem:[#allocation45_spill] sm:$0xff]  ;;  %v7670_v14 = vld [vmem:[#allocation50_spill] sm:$0xff] }
 0x2ba   :  { %7649 = vst [vmem:[#allocation94_spill] sm:$0xff] %v6178_v50  ;;  %v2044_v50 = vpop.permute.xlu2 %2043  ;;  %v1879_v57 = vmul.f32 %v7661_v7, %v6115_v31  ;;  %v7662_v47 = vsub.f32 %v7612_v51, %v5903_v23  ;;  %v7663_v22 = vsub.f32 %v7613_v48, %v5903_v23  ;;  %2275 = vperm.xlu0 %2780, %v3162_v40   ;;  %v2004_v7 = vpop.permute.xlu1 %2003  ;;  %v7667_v51 = vld [vmem:[#allocation47_spill] sm:$0xff]  ;;  %v7673_v40 = vld [vmem:[#allocation77_spill] sm:$0xff] }
 0x2bb   :  { %7651 = vst [vmem:[#allocation98_spill] sm:$0xff] %v6181_v2  ;;  %v1876_v27 = vmul.f32 %v7657_v13, %v6115_v31  ;;  %v1866_v9 = vmul.f32 %v7659_v33, %v6115_v31  ;;  %v6228_v2 = vmul.f32 %v7665_v52, %v1871_v12  ;;  %v7674_v52 = vld [vmem:[#allocation102_spill] sm:$0xff] }
 0x2bc   :  { %7653 = vst [vmem:[#allocation86_spill] sm:$0xff] %v6184_v15  ;;  %v1869_v13 = vmul.f32 %v7662_v47, %v6115_v31  ;;  %v1877_v33 = vmul.f32 %v7663_v22, %v6115_v31  ;;  %v7669_v22 = vld [vmem:[#allocation75_spill] sm:$0xff]  ;;  %v6240_v56 = vmul.f32 %v7670_v14, %v1879_v57  ;;  %v6249_v12 = vmul.f32 %v7674_v52, %v1882_v3  ;;  %v7678_v57 = vld [vmem:[#allocation29_spill] sm:$0xff]  ;;  %v7683_v14 = vld [vmem:[#allocation68_spill] sm:$0xff] }
 0x2bd   :  { %7654 = vst [vmem:[#allocation100_spill] sm:$0xff] %v6189_v20  ;;  %v6231_v47 = vmul.f32 %v7667_v51, %v1876_v27  ;;  %v6234_v48 = vmul.f32 %v7668_v44, %v1866_v9  ;;  %v6237_v15 = vmul.f32 %v7669_v22, %v1874_v35  ;;  %v7671_v20 = vld [vmem:[#allocation88_spill] sm:$0xff]  ;;  %v7676_v44 = vsub.f32 %v7614_v1, %v5903_v23  ;;  %v7681_v51 = vld [vmem:[#allocation21_spill] sm:$0xff] }
 0x2be   :  { %7666 = vst [vmem:[#allocation104_spill] sm:$0xff] %v6228_v2  ;;  %v6243_v45 = vmul.f32 %v7671_v20, %v1869_v13  ;;  %v6246_v24 = vmul.f32 %v7673_v40, %v1877_v33  ;;  %v7677_v35 = vsub.f32 %v7615_v6, %v5903_v23  ;;  %v7679_v20 = vsub.f32 %v7678_v57, %v5903_v23 }
 0x2bf   :  { %7675 = vst [vmem:[#allocation113_spill] sm:$0xff] %v6249_v12  ;;  %v1872_v27 = vmul.f32 %v7676_v44, %v6115_v31  ;;  %v7680_v33 = vsub.f32 %v7618_v46, %v5903_v23  ;;  %v7682_v1 = vsub.f32 %v7681_v51, %v5903_v23  ;;  %v7684_v6 = vsub.f32 %v7683_v14, %v5903_v23  ;;  %v7689_v51 = vld [vmem:[#allocation53_spill] sm:$0xff]  ;;  %v7691_v14 = vld [vmem:[#allocation6_spill] sm:$0xff] }
 0x2c0   :  { %7672 = vst [vmem:[#allocation110_spill] sm:$0xff] %v6243_v45  ;;  %v1880_v9 = vmul.f32 %v7677_v35, %v6115_v31  ;;  %v1885_v13 = vmul.f32 %v7679_v20, %v6115_v31  ;;  %v7685_v52 = vsub.f32 %v7621_v19, %v5903_v23  ;;  %v7686_v35 = vld [vmem:[#allocation25_spill] sm:$0xff]  ;;  %v7692_v2 = vmov 4  }
 0x2c1   :  { %v1875_v3 = vmul.f32 %v7680_v33, %v6115_v31  ;;  %v1883_v22 = vmul.f32 %v7682_v1, %v6115_v31  ;;  %v1888_v40 = vmul.f32 %v7684_v6, %v6115_v31  ;;  %v7687_v46 = vsub.f32 %v7686_v35, %v5903_v23  ;;  %v7688_v20 = vld [vmem:[#allocation41_spill] sm:$0xff]  ;;  %2779 = vset.pattern.permute.xlu2 %v7692_v2  ;;  %v7695_v35 = vld [vmem:[#allocation26_spill] sm:$0xff] }
 0x2c2   :  { %v1878_v44 = vmul.f32 %v7685_v52, %v6115_v31  ;;  %v6284_v33 = vmul.f32 %v7688_v20, %v1872_v27  ;;  %v6287_v1 = vmul.f32 %v7689_v51, %v1880_v9  ;;  %v7690_v12 = vld [vmem:[#allocation89_spill] sm:$0xff]  ;;  %2778 = vset.pattern.permute.xlu1 %v7692_v2  ;;  %v3164_v2 = vld [vmem:[%s6895_s1] sm:$0xff]  ;;  %v2016_v51 = vpop.permute.xlu1 %2015 }
 0x2c3   :  { %v1886_v57 = vmul.f32 %v7687_v46, %v6115_v31  ;;  %v6290_v45 = vmul.f32 %v7690_v12, %v1885_v13  ;;  %v6293_v6 = vmul.f32 %v7691_v14, %v1875_v3  ;;  %v6297_v19 = vmul.f32 %v6021_v61, %v1883_v22  ;;  %v7693_v12 = vld [vmem:[#allocation122_spill] sm:$0xff]  ;;  %2247 = vperm.xlu1 %2778, %v3164_v2   ;;  %v3165_v46 = vld [vmem:[%s6895_s1 + $0x50] sm:$0xff]  ;;  %v2048_v2 = vpop.permute.xlu0 %2047 }
 0x2c4   :  { %v6300_v52 = vmul.f32 %v6078_v10, %v1888_v40  ;;  %v6303_v27 = vmul.f32 %v6092_v30, %v1878_v44  ;;  %v7694_v13 = vsub.f32 %v7693_v12, %v5903_v23  ;;  %v7696_v61 = vsub.f32 %v7695_v35, %v5903_v23  ;;  %v7697_v10 = vld [vmem:[#allocation28_spill] sm:$0xff]  ;;  %v2056_v44 = vpop.permute.xlu2 %2055  ;;  %2287 = vperm.xlu0 %2780, %v3165_v46  }
 0x2c5   :  { %v6306_v9 = vmul.f32 %v6104_v16, %v1886_v57  ;;  %v7698_v30 = vsub.f32 %v7697_v10, %v5903_v23  ;;  %v3163_v16 = vld [vmem:[%s6895_s1 + $0x8] sm:$0xff]  ;;  %v7699_v57 = vsub.f32 %v5439_v17, %v5903_v23  ;;  %v7700_v14 = vsub.f32 %v7623_v34, %v5903_v23 }
 0x2c6   :  { %v1891_v3 = vmul.f32 %v7694_v13, %v6115_v31  ;;  %v1881_v22 = vmul.f32 %v7696_v61, %v6115_v31  ;;  %2251 = vperm.xlu2 %2779, %v3163_v16   ;;  %v7701_v13 = vsub.f32 %v5402_v49, %v5903_v23  ;;  %v7702_v61 = vsub.f32 %v5501_v28, %v5903_v23 }
 0x2c7   :  { %v1889_v40 = vmul.f32 %v7698_v30, %v6115_v31  ;;  %v1894_v20 = vmul.f32 %v7699_v57, %v6115_v31  ;;  %v1884_v12 = vmul.f32 %v7700_v14, %v6115_v31  ;;  %v7703_v34 = vsub.f32 %v7624_v42, %v5903_v23 }
 0x2c8   :  { %v1892_v35 = vmul.f32 %v7701_v13, %v6115_v31  ;;  %v1897_v10 = vmul.f32 %v7702_v61, %v6115_v31  ;;  %v6346_v30 = vmul.f32 %v2044_v50, %v1891_v3  ;;  %v6348_v17 = vmul.f32 %v2004_v7, %v1881_v22 }
 0x2c9   :  { %v6350_v16 = vmul.f32 %v2036_v25, %v1889_v40  ;;  %v1887_v46 = vmul.f32 %v7703_v34, %v6115_v31  ;;  %v6356_v57 = vmul.f32 %v2056_v44, %v1894_v20  ;;  %v6358_v49 = vmul.f32 %v2016_v51, %v1884_v12 }
 0x2ca   :  { %v6360_v14 = vmul.f32 %v2048_v2, %v1892_v35  ;;  %v7705_v28 = vsub.f32 %v5462_v8, %v5903_v23  ;;  %v7706_v7 = vsub.f32 %v5510_v11, %v5903_v23  ;;  %v7707_v42 = vsub.f32 %v5390_v0, %v5903_v23 }
 0x2cb   :  { %7704 = vst [vmem:[#allocation101_spill] sm:$0xff] %v6356_v57  ;;  %v7708_v22 = vsub.f32 %v5467_v53, %v5903_v23  ;;  %v7709_v8 = vsub.f32 %v5567_v32, %v5903_v23  ;;  %v7710_v11 = vsub.f32 %v5447_v36, %v5903_v23  ;;  %v7711_v0 = vsub.f32 %v5534_v60, %v5903_v23 }
 0x2cc   :  { %v1895_v50 = vmul.f32 %v7705_v28, %v6115_v31  ;;  %v1900_v25 = vmul.f32 %v7706_v7, %v6115_v31  ;;  %v1890_v3 = vmul.f32 %v7707_v42, %v6115_v31  ;;  %v7712_v53 = vsub.f32 %v5581_v29, %v5903_v23 }
 0x2cd   :  { %v1898_v40 = vmul.f32 %v7708_v22, %v6115_v31  ;;  %v1903_v44 = vmul.f32 %v7709_v8, %v6115_v31  ;;  %v1893_v20 = vmul.f32 %v7710_v11, %v6115_v31  ;;  %v1901_v51 = vmul.f32 %v7711_v0, %v6115_v31  ;;  %v2068_v8 = vpop.permute.xlu2 %2067 }
 0x2ce   :  { %v6394_v12 = vmul.f32 %v7712_v53, %v6115_v31  ;;  %v7713_v32 = vsub.f32 %v5454_v59, %v5903_v23  ;;  %v7714_v36 = vsub.f32 %v5542_v41, %v5903_v23  ;;  %v7715_v60 = vsub.f32 %v5649_v58, %v5903_v23 }
 0x2cf   :  { %v7716_v29 = vsub.f32 %v5516_v5, %v5903_v23  ;;  %v7717_v59 = vsub.f32 %v5614_v39, %v5903_v23  ;;  %v7718_v41 = vsub.f32 %v5658_v26, %v5903_v23  ;;  %v7719_v58 = vsub.f32 %v5523_v4, %v5903_v23  ;;  %v3166_v26 = vld [vmem:[%s6895_s1 + $0x20] sm:$0xff]  ;;  %v3167_v4 = vld [vmem:[%s6895_s1 + $0x18] sm:$0xff] }
 0x2d0   :  { %v6400_v13 = vmul.f32 %v7713_v32, %v6115_v31  ;;  %v6406_v35 = vmul.f32 %v7714_v36, %v6115_v31  ;;  %v6412_v61 = vmul.f32 %v7715_v60, %v6115_v31  ;;  %v7720_v5 = vsub.f32 %v5621_v54, %v5903_v23  ;;  %2263 = vperm.xlu2 %2779, %v3166_v26   ;;  %v3168_v60 = vld [vmem:[%s6895_s1 + $0x68] sm:$0xff]  ;;  %v2060_v26 = vpop.permute.xlu0 %2059 }
 0x2d1   :  { %v6418_v2 = vmul.f32 %v7716_v29, %v6115_v31  ;;  %v6424_v34 = vmul.f32 %v7717_v59, %v6115_v31  ;;  %v6430_v28 = vmul.f32 %v7718_v41, %v6115_v31  ;;  %v6436_v7 = vmul.f32 %v7719_v58, %v6115_v31  ;;  %2259 = vperm.xlu1 %2778, %v3167_v4   ;;  %v2028_v29 = vpop.permute.xlu1 %2027 }
 0x2d2   :  { %v6442_v42 = vmul.f32 %v7720_v5, %v6115_v31  ;;  %v7721_v39 = vsub.f32 %v5701_v43, %v5903_v23  ;;  %v7722_v54 = vsub.f32 %v5593_v18, %v5903_v23  ;;  %v7723_v43 = vld [vmem:[#allocation30_spill] sm:$0xff]  ;;  %v7725_v32 = vsub.f32 %v5713_v21, %v5903_v23  ;;  %2299 = vperm.xlu0 %2780, %v3168_v60   ;;  %v7737_v60 = vld [vmem:[#allocation72_spill] sm:$0xff] }
 0x2d3   :  { %v7724_v0 = vsub.f32 %v7723_v43, %v5903_v23  ;;  %v6477_v18 = vmul.f32 %v2068_v8, %v1897_v10  ;;  %v7727_v59 = vsub.f32 %v5604_v37, %v5903_v23  ;;  %v7728_v21 = vsub.f32 %v5726_v63, %v5903_v23 }
 0x2d4   :  { %v6448_v22 = vmul.f32 %v7721_v39, %v6115_v31  ;;  %v6460_v11 = vmul.f32 %v7722_v54, %v6115_v31  ;;  %v6472_v36 = vmul.f32 %v7725_v32, %v6115_v31  ;;  %v7729_v5 = vsub.f32 %v5749_v38, %v5903_v23  ;;  %v7732_v54 = vld [vmem:[#allocation70_spill] sm:$0xff] }
 0x2d5   :  { %v6466_v53 = vmul.f32 %v7724_v0, %v6115_v31  ;;  %7726 = vst [vmem:[#allocation12_spill] sm:$0xff] %v6477_v18  ;;  %v6483_v41 = vmul.f32 %v7727_v59, %v6115_v31  ;;  %v6489_v58 = vmul.f32 %v7728_v21, %v6115_v31  ;;  %v6497_v10 = vmul.f32 %v2028_v29, %v1887_v46  ;;  %v7735_v0 = vld [vmem:[#allocation34_spill] sm:$0xff]  ;;  %v7739_v59 = vld [vmem:[#allocation39_spill] sm:$0xff] }
 0x2d6   :  { %v6495_v39 = vmul.f32 %v7729_v5, %v6115_v31  ;;  %v7730_v37 = vsub.f32 %v5671_v55, %v5903_v23  ;;  %v7731_v63 = vsub.f32 %v5770_v62, %v5903_v23  ;;  %v7733_v38 = vsub.f32 %v7732_v54, %v5903_v23  ;;  %v7789_v18 = vld [vmem:[#allocation87_spill] sm:$0xff] }
 0x2d7   :  { %v6517_v46 = vmul.f32 %v2060_v26, %v1895_v50  ;;  %v7736_v55 = vsub.f32 %v7735_v0, %v5903_v23  ;;  %v7738_v62 = vsub.f32 %v7737_v60, %v5903_v23  ;;  %v7740_v21 = vsub.f32 %v7739_v59, %v5903_v23  ;;  %v7741_v50 = vld [vmem:[#allocation125_spill] sm:$0xff]  ;;  %v7745_v0 = vld [vmem:[#allocation130_spill] sm:$0xff]  ;;  %v3170_v59 = vld [vmem:[%s6895_s1 + $0x28] sm:$0xff] }
 0x2d8   :  { %v6503_v4 = vmul.f32 %v7730_v37, %v6115_v31  ;;  %v6509_v8 = vmul.f32 %v7731_v63, %v6115_v31  ;;  %v6515_v43 = vmul.f32 %v7733_v38, %v6115_v31  ;;  %v7742_v26 = vsub.f32 %v7741_v50, %v5903_v23  ;;  %v7743_v63 = vld [vmem:[#allocation121_spill] sm:$0xff]  ;;  %v3171_v50 = vld [vmem:[%s6895_s1 + $0x80] sm:$0xff] }
 0x2d9   :  { %7734 = vst [vmem:[#allocation105_spill] sm:$0xff] %v6517_v46  ;;  %v6523_v32 = vmul.f32 %v7736_v55, %v6115_v31  ;;  %v6529_v29 = vmul.f32 %v7738_v62, %v6115_v31  ;;  %v6535_v5 = vmul.f32 %v7740_v21, %v6115_v31  ;;  %v7744_v54 = vsub.f32 %v7743_v63, %v5903_v23  ;;  %v3169_v62 = vld [vmem:[%s6895_s1 + $0x30] sm:$0xff]  ;;  %v2080_v21 = vpop.permute.xlu2 %2079  ;;  %v2072_v63 = vpop.permute.xlu0 %2071 }
 0x2da   :  { %v6541_v37 = vmul.f32 %v7742_v26, %v6115_v31  ;;  %v7746_v55 = vsub.f32 %v7745_v0, %v5903_v23  ;;  %2271 = vperm.xlu2 %2779, %v3169_v62   ;;  %2267 = vperm.xlu1 %2778, %v3170_v59   ;;  %v6564_v26 = vmul.f32 %v2080_v21, %v1900_v25  ;;  %v2040_v23 = vpop.permute.xlu1 %2039  ;;  %v3172_v0 = vld [vmem:[%s6895_s1 + $0x48] sm:$0xff]  ;;  %v3174_v25 = vld [vmem:[%s6895_s1 + $0x98] sm:$0xff] }
 0x2db   :  { %v6547_v38 = vmul.f32 %v7744_v54, %v6115_v31  ;;  %2311 = vperm.xlu0 %2780, %v3171_v50   ;;  %v6568_v54 = vmul.f32 %v2072_v63, %v1898_v40  ;;  %v3176_v63 = vld [vmem:[%s6895_s1 + $0x58] sm:$0xff] }
 0x2dc   :  { %v6553_v60 = vmul.f32 %v7746_v55, %v6115_v31  ;;  %v6566_v31 = vmul.f32 %v2040_v23, %v1890_v3  ;;  %v3173_v55 = vld [vmem:[%s6895_s1 + $0x40] sm:$0xff] }
 0x2dd   :  { %7747 = vst [vmem:[#allocation92_spill] sm:$0xff] %v6568_v54  ;;  %v3175_v23 = vld [vmem:[%s6895_s1 + $0x60] sm:$0xff] }
 0x2de   :  { %v7790_v54 = vld [vmem:[#allocation119_spill] sm:$0xff] }
 0x2e1   :  { %v2092_v62 = vpop.permute.xlu2 %2091  ;;  %v2084_v21 = vpop.permute.xlu0 %2083 }
 0x2e2   :  { %2283 = vperm.xlu2 %2779, %v3172_v0   ;;  %2279 = vperm.xlu1 %2778, %v3173_v55   ;;  %v6579_v3 = vmul.f32 %v2092_v62, %v1903_v44  ;;  %v2052_v40 = vpop.permute.xlu1 %2051  ;;  %v6583_v50 = vmul.f32 %v2084_v21, %v1901_v51  ;;  %v7748_v55 = vld [vmem:[#allocation85_spill] sm:$0xff] }
 0x2e3   :  { %2323 = vperm.xlu0 %2780, %v3174_v25   ;;  %v6581_v59 = vmul.f32 %v2052_v40, %v1893_v20  ;;  %v3177_v40 = vld [vmem:[%s6895_s1 + $0x78] sm:$0xff]  ;;  %v3178_v21 = vld [vmem:[%s6895_s1 + $0x70] sm:$0xff] }
 0x2e9   :  { %v2104_v0 = vpop.permute.xlu2 %2103  ;;  %v2096_v62 = vpop.permute.xlu0 %2095 }
 0x2ea   :  { %2295 = vperm.xlu2 %2779, %v3175_v23   ;;  %2291 = vperm.xlu1 %2778, %v3176_v63   ;;  %v6593_v44 = vmul.f32 %v2104_v0, %v6394_v12  ;;  %v2064_v20 = vpop.permute.xlu1 %2063  ;;  %v6599_v25 = vmul.f32 %v2096_v62, %v6406_v35  ;;  %v7750_v23 = vld [vmem:[#allocation46_spill] sm:$0xff]  ;;  %v3180_v62 = vld [vmem:[%s6895_s1 + $0x88] sm:$0xff] }
 0x2eb   :  { %2335 = vperm.xlu0 %2780, %v7748_v55   ;;  %v6596_v51 = vmul.f32 %v2064_v20, %v6400_v13  ;;  %v3179_v20 = vld [vmem:[%s6895_s1 + $0x90] sm:$0xff] }
 0x2ed   :  { %7749 = vst [vmem:[#allocation96_spill] sm:$0xff] %v6596_v51  ;;  %v7785_v51 = vld [vmem:[#allocation81_spill] sm:$0xff] }
 0x2f1   :  { %v2116_v12 = vpop.permute.xlu2 %2115  ;;  %v2108_v0 = vpop.permute.xlu0 %2107 }
 0x2f2   :  { %2307 = vperm.xlu2 %2779, %v3177_v40   ;;  %2303 = vperm.xlu1 %2778, %v3178_v21   ;;  %v6609_v13 = vmul.f32 %v2116_v12, %v6412_v61  ;;  %v2076_v63 = vpop.permute.xlu1 %2075  ;;  %v6615_v55 = vmul.f32 %v2108_v0, %v6424_v34  ;;  %v7752_v40 = vld [vmem:[#allocation31_spill] sm:$0xff] }
 0x2f3   :  { %2435 = vperm.xlu0 %2780, %v7750_v23   ;;  %v6612_v35 = vmul.f32 %v2076_v63, %v6418_v2  ;;  %v3181_v63 = vld [vmem:[%s6895_s1 + $0xa8] sm:$0xff]  ;;  %v3182_v0 = vld [vmem:[%s6895_s1 + $0xa0] sm:$0xff] }
 0x2f5   :  { %7751 = vst [vmem:[#allocation112_spill] sm:$0xff] %v6612_v35 }
 0x2f9   :  { %v2128_v61 = vpop.permute.xlu2 %2127  ;;  %v2120_v12 = vpop.permute.xlu0 %2119 }
 0x2fa   :  { %2319 = vperm.xlu2 %2779, %v3179_v20   ;;  %2315 = vperm.xlu1 %2778, %v3180_v62   ;;  %v6625_v2 = vmul.f32 %v2128_v61, %v6430_v28  ;;  %v2088_v21 = vpop.permute.xlu1 %2087  ;;  %v6631_v23 = vmul.f32 %v2120_v12, %v6442_v42  ;;  %v3185_v12 = vld [vmem:[%s6895_s1 + $0xb8] sm:$0xff] }
 0x2fb   :  { %2371 = vperm.xlu0 %2780, %v7752_v40   ;;  %v6628_v34 = vmul.f32 %v2088_v21, %v6436_v7  ;;  %v3183_v7 = vld [vmem:[%s6895_s1 + $0xf0] sm:$0xff]  ;;  %v3184_v21 = vld [vmem:[%s6895_s1 + $0xc0] sm:$0xff] }
 0x2fc   :  { %7753 = vst [vmem:[#allocation115_spill] sm:$0xff] %v6625_v2 }
 0x2fd   :  { %7754 = vst [vmem:[#allocation9_spill] sm:$0xff] %v6631_v23  ;;  %v7775_v23 = vld [vmem:[#allocation124_spill] sm:$0xff] }
 0x301   :  { %v2140_v28 = vpop.permute.xlu2 %2139  ;;  %v2132_v61 = vpop.permute.xlu0 %2131 }
 0x302   :  { %2331 = vperm.xlu2 %2779, %v3181_v63   ;;  %2327 = vperm.xlu1 %2778, %v3182_v0   ;;  %v6643_v20 = vmul.f32 %v2140_v28, %v6448_v22  ;;  %v2100_v42 = vpop.permute.xlu1 %2099  ;;  %v6649_v40 = vmul.f32 %v2132_v61, %v6466_v53  ;;  %v7757_v63 = vld [vmem:[#allocation32_spill] sm:$0xff] }
 0x303   :  { %2367 = vperm.xlu0 %2780, %v3183_v7   ;;  %v6646_v62 = vmul.f32 %v2100_v42, %v6460_v11  ;;  %v7759_v42 = vld [vmem:[#allocation83_spill] sm:$0xff]  ;;  %v7760_v61 = vld [vmem:[#allocation128_spill] sm:$0xff] }
 0x304   :  { %7755 = vst [vmem:[#allocation55_spill] sm:$0xff] %v6643_v20 }
 0x305   :  { %7756 = vst [vmem:[#allocation63_spill] sm:$0xff] %v6649_v40 }
 0x309   :  { %v2152_v22 = vpop.permute.xlu2 %2151  ;;  %v2144_v28 = vpop.permute.xlu0 %2143 }
 0x30a   :  { %2343 = vperm.xlu2 %2779, %v3184_v21   ;;  %2339 = vperm.xlu1 %2778, %v3185_v12   ;;  %v6659_v11 = vmul.f32 %v2152_v22, %v6472_v36  ;;  %v2112_v0 = vpop.permute.xlu1 %2111  ;;  %v6665_v7 = vmul.f32 %v2144_v28, %v6489_v58  ;;  %v7761_v12 = vld [vmem:[#allocation27_spill] sm:$0xff]  ;;  %v7764_v28 = vld [vmem:[#allocation33_spill] sm:$0xff] }
 0x30b   :  { %2363 = vperm.xlu0 %2780, %v7757_v63   ;;  %v6662_v53 = vmul.f32 %v2112_v0, %v6483_v41  ;;  %v7763_v58 = vld [vmem:[#allocation107_spill] sm:$0xff] }
 0x30c   :  { %7758 = vst [vmem:[#allocation108_spill] sm:$0xff] %v6665_v7 }
 0x311   :  { %v2164_v21 = vpop.permute.xlu2 %2163  ;;  %v2156_v41 = vpop.permute.xlu0 %2155 }
 0x312   :  { %2499 = vperm.xlu2 %2779, %v7759_v42   ;;  %2431 = vperm.xlu1 %2778, %v7760_v61   ;;  %v6671_v63 = vmul.f32 %v2164_v21, %v6495_v39  ;;  %v2124_v36 = vpop.permute.xlu1 %2123  ;;  %v6677_v0 = vmul.f32 %v2156_v41, %v6509_v8  ;;  %v3186_v61 = vld [vmem:[%s6895_s1 + $0xd8] sm:$0xff]  ;;  %v7767_v41 = vld [vmem:[#allocation43_spill] sm:$0xff] }
 0x313   :  { %2359 = vperm.xlu0 %2780, %v7761_v12   ;;  %v6674_v22 = vmul.f32 %v2124_v36, %v6503_v4  ;;  %v7766_v36 = vld [vmem:[#allocation100_spill] sm:$0xff] }
 0x315   :  { %7762 = vst [vmem:[#allocation111_spill] sm:$0xff] %v6674_v22 }
 0x319   :  { %v2176_v42 = vpop.permute.xlu2 %2175  ;;  %v2168_v12 = vpop.permute.xlu0 %2167 }
 0x31a   :  { %2495 = vperm.xlu2 %2779, %v7763_v58   ;;  %2427 = vperm.xlu1 %2778, %v7764_v28   ;;  %v6685_v39 = vmul.f32 %v2176_v42, %v6515_v43  ;;  %v2136_v21 = vpop.permute.xlu1 %2135  ;;  %v6691_v8 = vmul.f32 %v2168_v12, %v6529_v29  ;;  %v3187_v58 = vld [vmem:[%s6895_s1 + $0xd0] sm:$0xff]  ;;  %v7770_v12 = vld [vmem:[#allocation11_spill] sm:$0xff] }
 0x31b   :  { %2355 = vperm.xlu0 %2780, %v3186_v61   ;;  %v6688_v4 = vmul.f32 %v2136_v21, %v6523_v32  ;;  %v7769_v29 = vld [vmem:[#allocation93_spill] sm:$0xff] }
 0x31d   :  { %7765 = vst [vmem:[#allocation99_spill] sm:$0xff] %v6688_v4 }
 0x321   :  { %v2180_v42 = vpop.permute.xlu0 %2179  ;;  %v2252_v32 = vpop.permute.xlu2 %2251 }
 0x322   :  { %2491 = vperm.xlu2 %2779, %v7766_v36   ;;  %2423 = vperm.xlu1 %2778, %v7767_v41   ;;  %v2148_v28 = vpop.permute.xlu1 %2147  ;;  %v6702_v61 = vmul.f32 %v2180_v42, %v6541_v37  ;;  %v6705_v21 = vadd.f32 %v2252_v32, %v7769_v29  ;;  %v7771_v36 = vld [vmem:[#allocation48_spill] sm:$0xff]  ;;  %v7772_v32 = vld [vmem:[#allocation86_spill] sm:$0xff] }
 0x323   :  { %2351 = vperm.xlu0 %2780, %v3187_v58   ;;  %v6699_v43 = vmul.f32 %v2148_v28, %v6535_v5  ;;  %v3188_v41 = vld [vmem:[%s6895_s1 + $0xc8] sm:$0xff] }
 0x325   :  { %7768 = vst [vmem:[#allocation114_spill] sm:$0xff] %v6699_v43 }
 0x329   :  { %v2256_v42 = vpop.permute.xlu0 %2255 }
 0x32a   :  { %2487 = vperm.xlu2 %2779, %v7770_v12   ;;  %2419 = vperm.xlu1 %2778, %v7771_v36   ;;  %v2160_v58 = vpop.permute.xlu1 %2159  ;;  %v2264_v28 = vpop.permute.xlu2 %2263  ;;  %v6719_v29 = vadd.f32 %v2256_v42, %v7772_v32  ;;  %v7773_v12 = vld [vmem:[#allocation57_spill] sm:$0xff]  ;;  %v7779_v32 = vld [vmem:[#allocation58_spill] sm:$0xff] }
 0x32b   :  { %2347 = vperm.xlu0 %2780, %v3188_v41   ;;  %v6713_v5 = vmul.f32 %v2160_v58, %v6547_v38  ;;  %v6716_v37 = vadd.f32 %v2264_v28, %v6234_v48  ;;  %v7774_v36 = vld [vmem:[#allocation129_spill] sm:$0xff]  ;;  %v7776_v58 = vld [vmem:[#allocation14_spill] sm:$0xff] }
 0x32c   :  { %v7777_v28 = vld [vmem:[#allocation74_spill] sm:$0xff]  ;;  %v7778_v42 = vld [vmem:[#allocation69_spill] sm:$0xff] }
 0x331   :  { %v6730_v48 = vpop.permute.xlu0 %2275 }
 0x332   :  { %2483 = vperm.xlu2 %2779, %v7773_v12   ;;  %2415 = vperm.xlu1 %2778, %v7774_v36   ;;  %v2172_v22 = vpop.permute.xlu1 %2171  ;;  %v7780_v12 = vld [vmem:[#allocation126_spill] sm:$0xff]  ;;  %v7781_v36 = vld [vmem:[#allocation84_spill] sm:$0xff] }
 0x333   :  { %2399 = vperm.xlu0 %2780, %v7775_v23   ;;  %v6725_v41 = vmul.f32 %v2172_v22, %v6553_v60  ;;  %v2182_v46 = vmul.f32 %v7780_v12, %v7779_v32  ;;  %v7782_v22 = vld [vmem:[#allocation5_spill] sm:$0xff]  ;;  %v7786_v32 = vld [vmem:[#allocation35_spill] sm:$0xff]  ;;  %v7787_v12 = vld [vmem:[#allocation40_spill] sm:$0xff] }
 0x334   :  { %v2272_v38 = vpop.permute.xlu2 %2271 }
 0x335   :  { %v6728_v57 = vadd.f32 %v2272_v38, %v7776_v58  ;;  %v7783_v38 = vld [vmem:[#allocation123_spill] sm:$0xff]  ;;  %v7784_v58 = vld [vmem:[#allocation120_spill] sm:$0xff] }
 0x339   :  { %v2288_v60 = vpop.permute.xlu0 %2287 }
 0x33a   :  { %2479 = vperm.xlu2 %2779, %v7777_v28   ;;  %2411 = vperm.xlu1 %2778, %v7778_v42   ;;  %v2248_v2 = vpop.permute.xlu1 %2247 }
 0x33b   :  { %2463 = vperm.xlu0 %2780, %v7781_v36   ;;  %v6737_v40 = vadd.f32 %v2248_v2, %v2182_v46 }
 0x33c   :  { %v2284_v23 = vpop.permute.xlu2 %2283 }
 0x342   :  { %2475 = vperm.xlu2 %2779, %v7782_v22   ;;  %2407 = vperm.xlu1 %2778, %v7783_v38  }
 0x343   :  { %2387 = vperm.xlu0 %2780, %v7784_v58   ;;  %v6742_v28 = vpop.permute.xlu1 %2259  ;;  %v7788_v58 = vld [vmem:[#allocation91_spill] sm:$0xff] }
 0x344   :  { %v2296_v4 = vpop.permute.xlu2 %2295  ;;  %v2300_v42 = vpop.permute.xlu0 %2299 }
 0x345   :  { %v2515_v35 = vadd.f32 %v2300_v42, %v6293_v6 }
 0x34a   :  { %2471 = vperm.xlu2 %2779, %v7785_v51   ;;  %2403 = vperm.xlu1 %2778, %v7786_v32  }
 0x34b   :  { %2451 = vperm.xlu0 %2780, %v7787_v12  }
 0x34c   :  { %v2308_v36 = vpop.permute.xlu2 %2307  ;;  %v6747_v46 = vpop.permute.xlu1 %2267 }
 0x34d   :  { %v2312_v2 = vpop.permute.xlu0 %2311  ;;  %v2517_v22 = vadd.f32 %v2308_v36, %v6246_v24  ;;  %v7791_v24 = vld [vmem:[#allocation37_spill] sm:$0xff]  ;;  %v7792_v36 = vmov 0  }
 0x34e   :  { %v6751_v38 = vadd.f32 %v2312_v2, %v6303_v27  ;;  %v3189_v27 = vld [vmem:[%s6895_s1 + $0x120] sm:$0xff] }
 0x34f   :  { %2586 = vmatpush.msra.mxu0 %v2517_v22 }
 0x352   :  { %2395 = vperm.xlu2 %2779, %v7788_v58   ;;  %2467 = vperm.xlu1 %2778, %v7789_v18  }
 0x353   :  { %2375 = vperm.xlu0 %2780, %v7790_v54  }
 0x354   :  { %v2320_v51 = vpop.permute.xlu2 %2319  ;;  %v2280_v32 = vpop.permute.xlu1 %2279 }
 0x355   :  { %v6757_v12 = vadd.f32 %v2320_v51, %v6287_v1  ;;  %v2324_v20 = vpop.permute.xlu0 %2323 }
 0x356   :  { %v6760_v7 = vadd.f32 %v2324_v20, %v6348_v17  ;;  %v7793_v17 = vld [vmem:[#allocation36_spill] sm:$0xff]  ;;  %v7794_v20 = vld [vmem:[#allocation90_spill] sm:$0xff] }
 0x35a   :  { %2459 = vperm.xlu2 %2779, %v7791_v24   ;;  %2391 = vperm.xlu1 %2778, %v3189_v27  }
 0x35b   :  { %2781 = vset.pattern.permute.xlu0 %v7792_v36 }
 0x35c   :  { %v2332_v18 = vpop.permute.xlu2 %2331  ;;  %v2292_v54 = vpop.permute.xlu1 %2291 }
 0x35d   :  { %v6768_v2 = vadd.f32 %v2332_v18, %v6297_v19  ;;  %v2336_v1 = vpop.permute.xlu0 %2335  ;;  %v2514_v19 = vadd.f32 %v2296_v4, %v6237_v15  ;;  %v3190_v18 = vld [vmem:[%s6895_s1 + $0x108] sm:$0xff] }
 0x35e   :  { %v6771_v22 = vadd.f32 %v2336_v1, %v6358_v49  ;;  %v7795_v49 = vld [vmem:[#allocation52_spill] sm:$0xff]  ;;  %v7796_v1 = vld [vmem:[#allocation98_spill] sm:$0xff] }
 0x35f   :  { %v7797_v4 = vld [vmem:[#allocation104_spill] sm:$0xff] }
 0x360   :  { %v2511_v42 = vadd.f32 %v2284_v23, %v7797_v4 }
 0x362   :  { %2383 = vperm.xlu2 %2779, %v7793_v17   ;;  %2455 = vperm.xlu1 %2778, %v7794_v20   ;;  %v2513_v17 = vadd.f32 %v2292_v54, %v7796_v1  ;;  %v7798_v54 = vld [vmem:[#allocation80_spill] sm:$0xff] }
 0x364   :  { %v6775_v58 = vpop.permute.xlu2 %2343  ;;  %v2304_v51 = vpop.permute.xlu1 %2303 }
 0x365   :  { %v2516_v24 = vadd.f32 %v2304_v51, %v6231_v47  ;;  %v2436_v27 = vpop.permute.xlu0 %2435  ;;  %v2510_v51 = vadd.f32 %v2280_v32, %v7798_v54 }
 0x366   :  { %v2549_v43 = vadd.f32 %v2436_v27, %v6609_v13  ;;  %v2512_v13 = vadd.f32 %v2288_v60, %v6284_v33  ;;  %v7800_v33 = vld [vmem:[#allocation8_spill] sm:$0xff] }
 0x367   :  { %2587 = vmatpush.msra.mxu0 %v2516_v24  ;;  %v7799_v24 = vld [vmem:[#allocation76_spill] sm:$0xff] }
 0x368   :  { %2632 = vmatpush.msra.mxu2 %v2549_v43 }
 0x369   :  { %2588 = vmatpush.msra.mxu0 %v2515_v35 }
 0x36a   :  { %2447 = vperm.xlu2 %2779, %v7795_v49   ;;  %2379 = vperm.xlu1 %2778, %v3190_v18   ;;  %v7802_v49 = vld [vmem:[#allocation94_spill] sm:$0xff]  ;;  %v7804_v18 = vld [vmem:[#allocation97_spill] sm:$0xff] }
 0x36b   :  { %2589 = vmatpush.msra.mxu0 %v2514_v19  ;;  %v2507_v32 = vadd.f32 %v6747_v46, %v7802_v49  ;;  %v2505_v1 = vadd.f32 %v6742_v28, %v7804_v18 }
 0x36c   :  { %v2500_v47 = vpop.permute.xlu2 %2499  ;;  %v2316_v20 = vpop.permute.xlu1 %2315 }
 0x36d   :  { %v6788_v6 = vadd.f32 %v2316_v20, %v6240_v56  ;;  %v2372_v43 = vpop.permute.xlu0 %2371  ;;  %2590 = vmatpush.msra.mxu0 %v2513_v17  ;;  %v2565_v15 = vadd.f32 %v2500_v47, %v6702_v61  ;;  %v7801_v56 = vld [vmem:[#allocation110_spill] sm:$0xff] }
 0x36e   :  { %v2533_v35 = vadd.f32 %v2372_v43, %v6581_v59  ;;  %v2509_v60 = vadd.f32 %v6730_v48, %v7801_v56  ;;  %v7803_v48 = vmov 1  }
 0x36f   :  { %2591 = vmatpush.msra.mxu0 %v2512_v13  ;;  %2655 = vmatpush.msra.mxu3 %v2565_v15 }
 0x370   :  { %2609 = vmatpush.msra.mxu1 %v2533_v35 }
 0x371   :  { %2592 = vmatpush.msra.mxu0 %v2511_v42 }
 0x372   :  { %2439 = vperm.xlu2 %2779, %v7799_v24   ;;  %2443 = vperm.xlu1 %2778, %v7800_v33  }
 0x373   :  { %2593 = vmatpush.msra.mxu0 %v2510_v51 }
 0x374   :  { %v2496_v27 = vpop.permute.xlu2 %2495  ;;  %v6798_v61 = vpop.permute.xlu1 %2327 }
 0x375   :  { %v2564_v59 = vadd.f32 %v2496_v27, %v6685_v39  ;;  %v2368_v23 = vpop.permute.xlu0 %2367  ;;  %2594 = vmatpush.msra.mxu0 %v2509_v60 }
 0x376   :  { %v2532_v19 = vadd.f32 %v2368_v23, %v6360_v14 }
 0x377   :  { %2595 = vmatpush.msra.mxu0 %v6728_v57  ;;  %2656 = vmatpush.msra.mxu3 %v2564_v59  ;;  %v7808_v59 = vld [vmem:[#allocation108_spill] sm:$0xff] }
 0x378   :  { %2610 = vmatpush.msra.mxu1 %v2532_v19  ;;  %v7809_v19 = vld [vmem:[#allocation55_spill] sm:$0xff] }
 0x379   :  { %2596 = vmatpush.msra.mxu0 %v2507_v32 }
 0x37a   :  { %2782 = vset.pattern.permute.xlu1 %v7792_v36  ;;  %2783 = vset.pattern.permute.xlu2 %v7803_v48 }
 0x37b   :  { %2597 = vmatpush.msra.mxu0 %v6716_v37 }
 0x37c   :  { %v2492_v39 = vpop.permute.xlu2 %2491  ;;  %v2340_v17 = vpop.permute.xlu1 %2339 }
 0x37d   :  { %v2563_v14 = vadd.f32 %v2492_v39, %v6725_v41  ;;  %v2364_v47 = vpop.permute.xlu0 %2363  ;;  %2598 = vmatpush.msra.mxu0 %v2505_v1  ;;  %v7810_v1 = vld [vmem:[#allocation92_spill] sm:$0xff] }
 0x37e   :  { %v2531_v57 = vadd.f32 %v2364_v47, %v6346_v30  ;;  %v2570_v47 = vld [vmem:[%s6896_s2 + $0x20] sm:$0xf] }
 0x37f   :  { %2599 = vmatpush.msra.mxu0 %v6719_v29  ;;  %2657 = vmatpush.msra.mxu3 %v2563_v14 }
 0x380   :  { %2611 = vmatpush.msra.mxu1 %v2531_v57  ;;  %v7812_v57 = vld [vmem:[#allocation96_spill] sm:$0xff] }
 0x381   :  { %2600 = vmatpush.msra.mxu0 %v6705_v21 }
 0x383   :  { %2601 = vmatpush.msra.mxu0 %v6737_v40 }
 0x384   :  { %v2488_v46 = vpop.permute.xlu2 %2487  ;;  %v2432_v28 = vpop.permute.xlu1 %2431 }
 0x385   :  { %v2562_v37 = vadd.f32 %v2488_v46, %v6691_v8  ;;  %v2548_v36 = vadd.f32 %v2432_v28, %v6662_v53  ;;  %v2360_v20 = vpop.permute.xlu0 %2359 }
 0x386   :  { %v2530_v41 = vadd.f32 %v2360_v20, %v6566_v31  ;;  %v2575_v20 = vld [vmem:[%s6897_s3 + $0x8] sm:$0xf] }
 0x387   :  { %2633 = vmatpush.msra.mxu2 %v2548_v36  ;;  %2658 = vmatpush.msra.mxu3 %v2562_v37  ;;  %v2571_v37 = vld [vmem:[%s6896_s2 + $0x28] sm:$0xf]  ;;  %v2574_v36 = vld [vmem:[%s6897_s3] sm:$0xff] }
 0x388   :  { %2612 = vmatpush.msra.mxu1 %v2530_v41  ;;  %2578 = vperm.xlu1 %2782, %v2574_v36  }
 0x389   :  { %2583 = vperm.xlu0 %2781, %v2575_v20   ;;  %2719 = vperm.xlu2 %2783, %v2574_v36  }
 0x38c   :  { %v2484_v30 = vpop.permute.xlu2 %2483  ;;  %v2428_v29 = vpop.permute.xlu1 %2427 }
 0x38d   :  { %v2561_v13 = vadd.f32 %v2484_v30, %v6671_v63  ;;  %v2547_v21 = vadd.f32 %v2428_v29, %v6615_v55  ;;  %v2356_v43 = vpop.permute.xlu0 %2355  ;;  %v7813_v30 = vld [vmem:[#allocation99_spill] sm:$0xff] }
 0x38e   :  { %v2529_v40 = vadd.f32 %v2356_v43, %v6350_v16 }
 0x38f   :  { %2634 = vmatpush.msra.mxu2 %v2547_v21  ;;  %2659 = vmatpush.msra.mxu3 %v2561_v13  ;;  %v7814_v21 = vld [vmem:[#allocation63_spill] sm:$0xff] }
 0x390   :  { %2613 = vmatpush.msra.mxu1 %v2529_v40  ;;  %v7815_v40 = vld [vmem:[#allocation115_spill] sm:$0xff]  ;;  %2784 = vset.pattern.permute.xlu1 %v7803_v48 }
 0x391   :  { %2723 = vperm.xlu1 %2784, %v2575_v20  }
 0x394   :  { %v2480_v8 = vpop.permute.xlu2 %2479  ;;  %v2424_v53 = vpop.permute.xlu1 %2423 }
 0x395   :  { %v2560_v15 = vadd.f32 %v2480_v8, %v6713_v5  ;;  %v2546_v31 = vadd.f32 %v2424_v53, %v6593_v44  ;;  %v2352_v35 = vpop.permute.xlu0 %2351  ;;  %v2526_v44 = vadd.f32 %v6775_v58, %v6306_v9 }
 0x396   :  { %v2528_v4 = vadd.f32 %v2352_v35, %v6300_v52  ;;  %v2525_v52 = vadd.f32 %v2340_v17, %v6290_v45  ;;  %v7811_v17 = vld [vmem:[#allocation12_spill] sm:$0xff]  ;;  %v7817_v35 = vld [vmem:[#allocation105_spill] sm:$0xff] }
 0x397   :  { %2635 = vmatpush.msra.mxu2 %v2546_v31  ;;  %2660 = vmatpush.msra.mxu3 %v2560_v15  ;;  %v7816_v31 = vmov 2  }
 0x398   :  { %2614 = vmatpush.msra.mxu1 %v2528_v4  ;;  %2786 = vset.pattern.permute.xlu0 %v7816_v31 }
 0x399   :  { %2733 = vperm.xlu0 %2786, %v2575_v20   ;;  %2785 = vset.pattern.permute.xlu2 %v7816_v31 }
 0x39a   :  { %2729 = vperm.xlu2 %2785, %v2574_v36  }
 0x39c   :  { %v2476_v63 = vpop.permute.xlu2 %2475  ;;  %v2420_v55 = vpop.permute.xlu1 %2419 }
 0x39d   :  { %v2559_v42 = vadd.f32 %v2476_v63, %v6677_v0  ;;  %v2545_v16 = vadd.f32 %v2420_v55, %v6646_v62  ;;  %v2348_v54 = vpop.permute.xlu0 %2347  ;;  %v7818_v63 = vld [vmem:[#allocation101_spill] sm:$0xff] }
 0x39e   :  { %v2527_v51 = vadd.f32 %v2348_v54, %v6497_v10  ;;  %v7805_v10 = vld [vmem:[#allocation113_spill] sm:$0xff]  ;;  %v7819_v54 = vld [vmem:[#allocation111_spill] sm:$0xff] }
 0x39f   :  { %2636 = vmatpush.msra.mxu2 %v2545_v16  ;;  %2661 = vmatpush.msra.mxu3 %v2559_v42  ;;  %v2522_v62 = vadd.f32 %v6798_v61, %v7805_v10  ;;  %v2568_v42 = vld [vmem:[%s6896_s2 + $0x10] sm:$0xff] }
 0x3a0   :  { %2615 = vmatpush.msra.mxu1 %v2527_v51 }
 0x3a2   :  { %2616 = vmatpush.msra.mxu1 %v2526_v44  ;;  %v7820_v44 = vld [vmem:[#allocation9_spill] sm:$0xff] }
 0x3a4   :  { %2617 = vmatpush.msra.mxu1 %v2525_v52  ;;  %v2472_v5 = vpop.permute.xlu2 %2471  ;;  %v2416_v24 = vpop.permute.xlu1 %2415 }
 0x3a5   :  { %v2558_v33 = vadd.f32 %v2472_v5, %v6659_v11  ;;  %v2544_v0 = vadd.f32 %v2416_v24, %v6599_v25  ;;  %v2400_v25 = vpop.permute.xlu0 %2399  ;;  %v2569_v5 = vld [vmem:[%s6896_s2 + $0x18] sm:$0xff]  ;;  %v2572_v24 = vld [vmem:[%s6896_s2 + $0x30] sm:$0xf] }
 0x3a6   :  { %2618 = vmatpush.msra.mxu1 %v6771_v22  ;;  %v2540_v60 = vadd.f32 %v2400_v25, %v6564_v26  ;;  %v2566_v26 = vld [vmem:[%s6896_s2] sm:$0xff] }
 0x3a7   :  { %2637 = vmatpush.msra.mxu2 %v2544_v0  ;;  %2662 = vmatpush.msra.mxu3 %v2558_v33  ;;  %v2573_v33 = vld [vmem:[%s6896_s2 + $0x38] sm:$0xf] }
 0x3a8   :  { %2619 = vmatpush.msra.mxu1 %v6768_v2  ;;  %2602 = vmatmul.f32.vlgmr.msra.gmra.mxu0 %v2566_v26 }
 0x3aa   :  { %2620 = vmatpush.msra.mxu1 %v2522_v62 }
 0x3ac   :  { %2621 = vmatpush.msra.mxu1 %v6760_v7  ;;  %v2412_v45 = vpop.permute.xlu1 %2411  ;;  %v2396_v58 = vpop.permute.xlu2 %2395 }
 0x3ad   :  { %v2543_v9 = vadd.f32 %v2412_v45, %v6579_v3  ;;  %v2464_v7 = vpop.permute.xlu0 %2463  ;;  %v7806_v3 = vld [vmem:[#allocation112_spill] sm:$0xff] }
 0x3ae   :  { %2622 = vmatpush.msra.mxu1 %v6757_v12  ;;  %v2539_v12 = vadd.f32 %v2396_v58, %v7806_v3  ;;  %v2556_v23 = vadd.f32 %v2464_v7, %v7808_v59 }
 0x3af   :  { %2638 = vmatpush.msra.mxu2 %v2543_v9 }
 0x3b0   :  { %2623 = vmatpush.msra.mxu1 %v6788_v6  ;;  %2605 = vmatmul.f32.gmra.mxu0 %v2570_v47 }
 0x3b2   :  { %2624 = vmatpush.msra.mxu1 %v6751_v38  ;;  %v7807_v38 = vld [vmem:[#allocation114_spill] sm:$0xff] }
 0x3b4   :  { %v2408_v11 = vpop.permute.xlu1 %2407  ;;  %v2460_v27 = vpop.permute.xlu2 %2459 }
 0x3b5   :  { %v2542_v22 = vadd.f32 %v2408_v11, %v6628_v34  ;;  %v2388_v34 = vpop.permute.xlu0 %2387  ;;  %v2555_v49 = vadd.f32 %v2460_v27, %v7809_v19 }
 0x3b6   :  { %v2537_v14 = vadd.f32 %v2388_v34, %v7811_v17 }
 0x3b7   :  { %2639 = vmatpush.msra.mxu2 %v2542_v22 }
 0x3bc   :  { %v2404_v2 = vpop.permute.xlu1 %2403  ;;  %v2384_v32 = vpop.permute.xlu2 %2383 }
 0x3bd   :  { %v2541_v56 = vadd.f32 %v2404_v2, %v6583_v50  ;;  %v2567_v50 = vld [vmem:[%s6896_s2 + $0x8] sm:$0xff]  ;;  %v2536_v46 = vadd.f32 %v2384_v32, %v7812_v57  ;;  %v2452_v28 = vpop.permute.xlu0 %2451  ;;  %s3222_s2 = smov [#allocation2]  }
 0x3be   :  { %2625 = vmatmul.f32.vlgmr.msra.gmra.mxu1 %v2567_v50  ;;  %v2553_v43 = vadd.f32 %v2452_v28, %v7814_v21  ;;  %s2744_s14 = sshll.u32 %s3222_s2, 4  ;;  %s2745_s14 = int_to_ptr.vmem [resolvable:$true] %s2744_s14 }
 0x3bf   :  { %2640 = vmatpush.msra.mxu2 %v2541_v56 }
 0x3c1   :  { %2641 = vmatpush.msra.mxu2 %v2540_v60 }
 0x3c3   :  { %2642 = vmatpush.msra.mxu2 %v2539_v12 }
 0x3c4   :  { %v2468_v6 = vpop.permute.xlu1 %2467  ;;  %v2448_v13 = vpop.permute.xlu2 %2447 }
 0x3c5   :  { %v2557_v61 = vadd.f32 %v2468_v6, %v7807_v38  ;;  %v2552_v8 = vadd.f32 %v2448_v13, %v7815_v40  ;;  %v2376_v53 = vpop.permute.xlu0 %2375 }
 0x3c6   :  { %2628 = vmatmul.f32.gmra.mxu1 %v2571_v37  ;;  %v2534_v55 = vadd.f32 %v2376_v53, %v7818_v63 }
 0x3c7   :  { %2663 = vmatpush.msra.mxu3 %v2557_v61 }
 0x3c9   :  { %2664 = vmatpush.msra.mxu3 %v2556_v23 }
 0x3cb   :  { %2665 = vmatpush.msra.mxu3 %v2555_v49 }
 0x3cc   :  { %v2392_v18 = vpop.permute.xlu1 %2391  ;;  %v2440_v16 = vpop.permute.xlu2 %2439 }
 0x3cd   :  { %v2538_v39 = vadd.f32 %v2392_v18, %v7810_v1  ;;  %v2550_v52 = vadd.f32 %v2440_v16, %v7820_v44 }
 0x3cf   :  { %2643 = vmatpush.msra.mxu2 %v2538_v39 }
 0x3d1   :  { %2644 = vmatpush.msra.mxu2 %v2537_v14 }
 0x3d3   :  { %2645 = vmatpush.msra.mxu2 %v2536_v46 }
 0x3d4   :  { %v2456_v41 = vpop.permute.xlu1 %2455 }
 0x3d5   :  { %v2554_v29 = vadd.f32 %v2456_v41, %v7813_v30 }
 0x3d7   :  { %2666 = vmatpush.msra.mxu3 %v2554_v29 }
 0x3d9   :  { %2667 = vmatpush.msra.mxu3 %v2553_v43 }
 0x3db   :  { %2668 = vmatpush.msra.mxu3 %v2552_v8 }
 0x3dc   :  { %v2380_v15 = vpop.permute.xlu1 %2379 }
 0x3dd   :  { %v2535_v4 = vadd.f32 %v2380_v15, %v7817_v35 }
 0x3df   :  { %2646 = vmatpush.msra.mxu2 %v2535_v4 }
 0x3e1   :  { %2647 = vmatpush.msra.mxu2 %v2534_v55 }
 0x3e2   :  { %2648 = vmatmul.f32.vlgmr.msra.gmra.mxu2 %v2568_v42 }
 0x3e3   :  { %v2720_v40 = vpop.permute.xlu2 %2719 }
 0x3e4   :  { %v2444_v48 = vpop.permute.xlu1 %2443 }
 0x3e5   :  { %v2551_v51 = vadd.f32 %v2444_v48, %v7819_v54 }
 0x3e7   :  { %2669 = vmatpush.msra.mxu3 %v2551_v51 }
 0x3e9   :  { %2670 = vmatpush.msra.mxu3 %v2550_v52 }
 0x3ea   :  { %2671 = vmatmul.f32.vlgmr.msra.gmra.mxu3 %v2569_v5  ;;  %2651 = vmatmul.f32.gmra.mxu2 %v2572_v24 }
 0x3f2   :  { %2674 = vmatmul.f32.gmra.mxu3 %v2573_v33 }
 0x3f4   :  { %v2730_v48 = vpop.permute.xlu2 %2729 }
 0x3fa   :  { %v2579_v62 = vpop.permute.xlu1 %2578 }
 0x3fb   :  { %v2584_v25 = vpop.permute.xlu0 %2583 }
 0x403   :  { %v2724_v55 = vpop.permute.xlu1 %2723 }
 0x40b   :  { %v2734_v54 = vpop.permute.xlu0 %2733 }
 0x425   :  { %v2603_v0 = vpop.f32.mrf.mxu0 }
 0x426   :  { %v2604_v9 = vadd.f32 %v2603_v0, %v2579_v62 }
 0x42d   :  { %v2606_v11 = vpop.f32.mrf.mxu0 }
 0x42e   :  { %v2607_v22 = vadd.f32 %v2606_v11, %v2584_v25 }
 0x43b   :  { %v2626_v10 = vpop.f32.mrf.mxu1 }
 0x43c   :  { %v2627_v58 = vadd.f32 %v2626_v10, %v2604_v9 }
 0x443   :  { %v2629_v2 = vpop.f32.mrf.mxu1 }
 0x444   :  { %v2630_v7 = vadd.f32 %v2629_v2, %v2607_v22 }
 0x465   :  { %v2649_v45 = vpop.f32.mrf.mxu2 }
 0x466   :  { %v2650_v60 = vadd.f32 %v2649_v45, %v2627_v58 }
 0x46d   :  { %v2672_v56 = vpop.f32.mrf.mxu3  ;;  %v2652_v3 = vpop.f32.mrf.mxu2 }
 0x46e   :  { %v2653_v12 = vadd.f32 %v2652_v3, %v2630_v7  ;;  %v2673_v27 = vadd.f32 %v2672_v56, %v2650_v60 }
 0x470   :  { %3047 = vtanh.f32 %v2673_v27 }
 0x475   :  { %v2675_v6 = vpop.f32.mrf.mxu3 }
 0x476   :  { %v2676_v38 = vadd.f32 %v2675_v6, %v2653_v12  ;;  %v3048_v61 = vpop.eup %3047 }
 0x477   :  { %v2690_v19 = vmul.f32 %v3048_v61, %v3048_v61 }
 0x478   :  { %3049 = vtanh.f32 %v2676_v38 }
 0x47e   :  { %v3050_v59 = vpop.eup %3049 }
 0x47f   :  { %v2691_v23 = vmul.f32 %v3050_v59, %v3050_v59  ;;  %v2681_v34 = vsel %vm2680_vm6, %v3050_v59, 0.0 }
 0x480   :  { %v2682_v49 = vadd.f32 %v3048_v61, %v2681_v34 }
 0x481   :  { %v2692_v26 = vsel %vm2680_vm6, %v2691_v23, 0.0 }
 0x482   :  { %v2683_v50 = vrot.slane %v2682_v49, 4  ;;  %v2693_v32 = vadd.f32 %v2692_v26, %v2690_v19 }
 0x484   :  { %v2684_v18 = vadd.f32 %v2683_v50, %v2682_v49  ;;  %v2694_v1 = vrot.slane %v2693_v32, 4 }
 0x486   :  { %v2685_v39 = vrot.slane %v2684_v18, 2  ;;  %v2695_v17 = vadd.f32 %v2694_v1, %v2693_v32 }
 0x488   :  { %v2686_v14 = vadd.f32 %v2685_v39, %v2684_v18  ;;  %v2696_v47 = vrot.slane %v2695_v17, 2 }
 0x48a   :  { %v2687_v57 = vrot.slane %v2686_v14, 1  ;;  %v2697_v46 = vadd.f32 %v2696_v47, %v2695_v17 }
 0x48c   :  { %v2688_v28 = vadd.f32 %v2687_v57, %v2686_v14  ;;  %v2698_v37 = vrot.slane %v2697_v46, 1 }
 0x48e   :  { %v2689_v36 = vmul.f32 0.083333336, %v2688_v28  ;;  %v2699_v20 = vadd.f32 %v2698_v37, %v2697_v46 }
 0x490   :  { %v2700_v41 = vmul.f32 0.083333336, %v2699_v20  ;;  %v2701_v30 = vmul.f32 %v2689_v36, %v2689_v36  ;;  %v2714_v35 = vsub.f32 %v3048_v61, %v2689_v36  ;;  %v2715_v4 = vsub.f32 %v3050_v59, %v2689_v36 }
 0x492   :  { %v2702_v29 = vsub.f32 %v2700_v41, %v2701_v30 }
 0x494   :  { %v2703_v13 = vadd.f32 1e-05, %v2702_v29 }
 0x496   :  { %3051 = vrsqrt.f32 %v2703_v13  ;;  %vm2710_vm8 = vweird.f32 %v2703_v13 }
 0x49c   :  { %v3052_v21 = vpop.eup %3051 }
 0x49d   :  { %v2705_v43 = vmul.f32 %v3052_v21, %v2703_v13  ;;  %vm2711_vm7 = vweird.f32 %v3052_v21 }
 0x49e   :  { %vm2712_vm9 = vmor %vm2710_vm8, %vm2711_vm7 }
 0x49f   :  { %v2706_v8 = vmul.f32 %v3052_v21, %v2705_v43 }
 0x4a1   :  { %v2707_v53 = vmul.f32 0.5, %v2706_v8 }
 0x4a3   :  { %v2708_v15 = vsub.f32 1.5, %v2707_v53 }
 0x4a5   :  { %v2709_v31 = vmul.f32 %v3052_v21, %v2708_v15 }
 0x4a7   :  { %v2713_v63 = vsel %vm2712_vm9, %v3052_v21, %v2709_v31 }
 0x4a8   :  { %v2716_v42 = vmul.f32 %v2714_v35, %v2713_v63  ;;  %v2717_v16 = vmul.f32 %v2715_v4, %v2713_v63 }
 0x4aa   :  { %v2726_v51 = vmul.f32 %v2720_v40, %v2716_v42  ;;  %v2727_v44 = vmul.f32 %v2724_v55, %v2717_v16 }
 0x4ac   :  { %v2736_v52 = vadd.f32 %v2730_v48, %v2726_v51  ;;  %v2737_v5 = vadd.f32 %v2734_v54, %v2727_v44 }
 0x4ae   :  { %2738 = vst [vmem:[#allocation2] sm:$0xff] %v2736_v52 }
 0x4af   :  { %2739 = vst [vmem:[#allocation2 + $0x8] sm:$0xf] %v2737_v5 }
 0x4b0   :  { %2752 = dma.vmem_to_hbm [thread:$0]  %s2745_s14, 256, %s2747_s0, [#allocation3], %s3223_s17, %s3223_s17, %s3224_s18  }
 0x4b1   :  { %3215 = dma.done.wait [#allocation3], 256  }
 0x4b2   :  { %3216 = vsyncadd [#allocation3], 4294967040 }
 0x4b3   :  { %2757 = vsyncpa [#allocation3], 1 }

</bundles_post_ra>
